<compile_context>
chip_gen: v6e
topology: v6e:2x2x1
jax: 0.10.0
libtpu: 0.0.40
codegen_flags: <defaults>
</compile_context>

<pallas_src>
import functools
import math

import jax
import jax.numpy as jnp
from jax.experimental import pallas as pl
from jax.experimental.pallas import tpu as pltpu

EPS = 1e-5
LANE = 128
SUB = 8


def _round_up(x, m):
    return (x + m - 1) // m * m


def _lcm(a, b):
    return a * b // math.gcd(a, b)


def _physical_vmem_bytes():
    try:
        info = pltpu.get_tpu_info()
        for attr in ("vmem_capacity_bytes", "vmem_size_bytes", "vmem_bytes"):
            v = getattr(info, attr, None)
            if v:
                return int(v)
    except Exception:
        pass
    return 64 * 2**20                    # conservative: v7x per-TensorCore VMEM


def _pick_nb(n, s, target=256, row_cap=2048):
    """Largest divisor of n whose folded block (nb*s rows) reaches ~target."""
    nb = 1
    for d in range(1, n + 1):
        if n % d:
            continue
        if d * s > row_cap:
            break
        nb = d
        if d * s >= target:
            break
    return nb


# ----------------------------- Pallas kernel -------------------------------

def _down_layer_kernel(xp_ref, w1_ref, b1_ref, w2_ref, ws_ref, bj_ref,
                       o_ref, y1_ref, *, Mb, Wo, S, P, nb):
    rows = xp_ref.shape[0]               # nb * S block-local rows
    Cpp = o_ref.shape[-1]
    M1 = rows - P                        # rows fed to every matmul

    # Column-border predicates, computed once.  (S % Wo == 0 by construction,
    # so every real pixel row j has wo = j % Wo.)  Row borders need no masks:
    # they read zero halo rows (host padding for xp, zeroed scratch for y1).
    j = jax.lax.broadcasted_iota(jnp.int32, (M1, 1), 0)
    wo = j % Wo
    left_ok = wo > 0
    right_ok = wo < (Wo - 1)

    def xp_tap(off):
        return xp_ref[pl.ds(P + off, M1), :]

    # ---- stage 1: conv1 (3x3, stride 2, pad 1) over the phase-packed input
    #      as 4 shift-grouped accumulating matmuls (BN folded into weights),
    #      then bias + ReLU.  Shifts: (0,0), (0,-1), (-1,0), (-1,-1). --------
    acc1 = jnp.dot(xp_tap(0), w1_ref[0], preferred_element_type=jnp.float32)
    acc1 += jnp.dot(jnp.where(left_ok, xp_tap(-1), 0), w1_ref[1],
                    preferred_element_type=jnp.float32)
    acc1 += jnp.dot(xp_tap(-Wo), w1_ref[2], preferred_element_type=jnp.float32)
    acc1 += jnp.dot(jnp.where(left_ok, xp_tap(-Wo - 1), 0), w1_ref[3],
                    preferred_element_type=jnp.float32)
    y1 = jnp.maximum(acc1 + b1_ref[...], 0.0).astype(jnp.bfloat16)

    # ---- stash y1 (bf16) in a flat scratch with zero halos; only the top
    #      halo and the per-image junk/halo gaps are re-zeroed, never the
    #      whole scratch. ----------------------------------------------------
    y1_ref[pl.ds(0, P), :] = jnp.zeros((P, Cpp), jnp.bfloat16)
    y1_ref[pl.ds(P, M1), :] = y1
    gap = S - Mb                         # >= P >= Wo + 1 zero rows per image
    zgap = jnp.zeros((gap, Cpp), jnp.bfloat16)
    for i in range(nb):
        y1_ref[pl.ds(i * S + P + Mb, gap), :] = zgap

    # ---- stage 2: shortcut (1x1 s2 == ee-phase of xp, weights embedded) +
    #      conv2 (3x3 s1 p1) as 10 accumulating matmuls; the residual add is
    #      implicit; joint bias + ReLU; bf16 store. ---------------------------
    acc2 = jnp.dot(xp_tap(0), ws_ref[...], preferred_element_type=jnp.float32)
    t = 0
    for di in (-1, 0, 1):
        for dj in (-1, 0, 1):
            tap = y1_ref[pl.ds(P + di * Wo + dj, M1), :]
            if dj < 0:
                tap = jnp.where(left_ok, tap, 0)
            elif dj > 0:
                tap = jnp.where(right_ok, tap, 0)
            acc2 += jnp.dot(tap, w2_ref[t], preferred_element_type=jnp.float32)
            t += 1

    o_ref[pl.ds(0, P), :] = jnp.zeros((P, Cpp), o_ref.dtype)
    o_ref[pl.ds(P, M1), :] = jnp.maximum(acc2 + bj_ref[...],
                                         0.0).astype(o_ref.dtype)


# ------------------------------ kernel wrapper ------------------------------

def _fused_down_layer(xp, w1g, b1p, w2g, ws_emb, bj, *,
                      N, Mb, Wo, S, P, nb, Cpp):
    Kxp = xp.shape[-1]
    grid = N // nb
    rows = nb * S
    M1 = rows - P

    # Real per-step VMEM footprint (double-buffered I/O, weights, scratch,
    # live f32 accumulators), then a generation-aware cap at 75% of physical.
    footprint = (
        2 * rows * Kxp * 2                                # xp block (x2), bf16
        + 2 * rows * Cpp * 2                              # out block (x2), bf16
        + 2 * ((5 * Kxp * Cpp + 9 * Cpp * Cpp) * 2)       # weights (x2 buffers)
        + 2 * 2 * Cpp * 4                                 # biases
        + (rows + P) * Cpp * 2                            # y1 scratch, bf16
        + 6 * M1 * Cpp * 4                                # f32 accumulators/temps
    )
    vmem_limit = int(min(max(2 * footprint, 16 * 2**20),
                         (_physical_vmem_bytes() * 3) // 4))

    cost = pl.CostEstimate(
        flops=2 * grid * M1 * Cpp * (5 * Kxp + 9 * Cpp),
        transcendentals=0,
        bytes_accessed=int(xp.size * 2 + (w1g.size + w2g.size + ws_emb.size) * 2
                           + (b1p.size + bj.size) * 4 + xp.shape[0] * Cpp * 2),
    )

    kernel = functools.partial(_down_layer_kernel,
                               Mb=Mb, Wo=Wo, S=S, P=P, nb=nb)
    return pl.pallas_call(
        kernel,
        out_shape=jax.ShapeDtypeStruct((xp.shape[0], Cpp), jnp.bfloat16),
        grid_spec=pltpu.PrefetchScalarGridSpec(
            num_scalar_prefetch=0,
            grid=(grid,),
            in_specs=[
                pl.BlockSpec((rows, Kxp), lambda g: (g, 0)),
                pl.BlockSpec((4, Kxp, Cpp), lambda g: (0, 0, 0)),
                pl.BlockSpec((1, Cpp), lambda g: (0, 0)),
                pl.BlockSpec((9, Cpp, Cpp), lambda g: (0, 0, 0)),
                pl.BlockSpec((Kxp, Cpp), lambda g: (0, 0)),
                pl.BlockSpec((1, Cpp), lambda g: (0, 0)),
            ],
            out_specs=pl.BlockSpec((rows, Cpp), lambda g: (g, 0)),
            scratch_shapes=[pltpu.VMEM((rows + P, Cpp), jnp.bfloat16)],
        ),
        compiler_params=pltpu.CompilerParams(
            dimension_semantics=("parallel",),
            vmem_limit_bytes=vmem_limit),
        cost_estimate=cost,
    )(xp, w1g, b1p, w2g, ws_emb, bj)


# --------------------------------- glue -------------------------------------

def fold_bn(gamma, beta, rmean, rvar):
    scale = gamma / jnp.sqrt(rvar + EPS)
    bias = beta - rmean * scale
    return scale, bias


def prepare_params(params, Cin):
    """Fold BN into conv weights, group conv1 taps by phase shift, pad, bf16."""
    Cp = params["w1"].shape[0]
    Cpp = _round_up(Cp, LANE)
    Kx = 4 * Cin
    Kxp = _round_up(Kx, LANE)

    s1, b1 = fold_bn(*params["bn1"])
    s2, b2 = fold_bn(*params["bn2"])
    ss, bs = fold_bn(*params["bns"])

    def tap(w, ki, kj, scale):                      # (I, O), BN scale folded
        return w[:, :, ki, kj].T * scale[None, :]

    w1 = params["w1"]

    def phase_block(entries):                       # phase p -> (ki, kj)
        blocks = []
        for p in range(4):                          # 0=ee, 1=eo, 2=oe, 3=oo
            if p in entries:
                ki, kj = entries[p]
                blocks.append(tap(w1, ki, kj, s1))
            else:
                blocks.append(jnp.zeros((Cin, Cp), jnp.float32))
        return jnp.concatenate(blocks, axis=0)      # (4*Cin, Cp)

    # conv1 taps grouped by phase-image shift (matches kernel tap order).
    w1g = jnp.stack([
        phase_block({0: (1, 1), 1: (1, 2), 2: (2, 1), 3: (2, 2)}),  # ( 0,  0)
        phase_block({1: (1, 0), 3: (2, 0)}),                        # ( 0, -1)
        phase_block({2: (0, 1), 3: (0, 2)}),                        # (-1,  0)
        phase_block({3: (0, 0)}),                                   # (-1, -1)
    ])
    w1g = jnp.pad(w1g, ((0, 0), (0, Kxp - Kx), (0, Cpp - Cp))).astype(jnp.bfloat16)
    b1p = jnp.pad(b1.reshape(1, Cp), ((0, 0), (0, Cpp - Cp))).astype(jnp.float32)

    # conv2: 9 per-tap (Cp, Cp) matrices (ki outer, kj inner), BN folded.
    w2 = params["w2"]
    w2g = jnp.stack([tap(w2, ki, kj, s2) for ki in range(3) for kj in range(3)])
    w2g = jnp.pad(w2g, ((0, 0), (0, Cpp - Cp), (0, Cpp - Cp))).astype(jnp.bfloat16)

    # shortcut 1x1 s2 reads exactly the ee phase -> embed in first Cin rows.
    ws = params["ws"][:, :, 0, 0].T * ss[None, :]
    ws_emb = jnp.pad(ws, ((0, Kxp - Cin), (0, Cpp - Cp))).astype(jnp.bfloat16)

    bj = jnp.pad((b2 + bs).reshape(1, Cp), ((0, 0), (0, Cpp - Cp))).astype(jnp.float32)
    return w1g, b1p, w2g, ws_emb, bj, Cp, Cpp, Kxp


def down_layer_forward(x_nchw, params):
    """Pallas implementation of DownLayer(deep=False).forward (eval-mode BN)."""
    N, Cin, H, W = x_nchw.shape
    assert H % 2 == 0 and W % 2 == 0, "even spatial dims required"
    Ho, Wo = H // 2, W // 2
    Mb = Ho * Wo

    w1g, b1p, w2g, ws_emb, bj, Cp, Cpp, Kxp = prepare_params(params, Cin)

    P = _round_up(Wo + 1, SUB)                   # per-image top halo rows
    S = _round_up(P + Mb, _lcm(SUB, Wo))         # per-image row stride
    nb = _pick_nb(N, S)                          # images folded per grid step

    # Space-to-depth: pack the four stride-2 phases of x along channels so
    # conv1 (stride 2) becomes 4 stride-1 shifted matmuls in-kernel and the
    # 1x1 s2 shortcut is the ee-phase columns.  No 9x im2col is materialized.
    x_nhwc = jnp.transpose(x_nchw, (0, 2, 3, 1)).astype(jnp.float32)
    phases = [x_nhwc[:, pr::2, pc::2, :] for pr in (0, 1) for pc in (0, 1)]
    xp = jnp.concatenate(phases, axis=-1).reshape(N, Mb, 4 * Cin)
    xp = jnp.pad(xp, ((0, 0), (P, S - P - Mb), (0, Kxp - 4 * Cin)))
    xp = xp.reshape(N * S, Kxp).astype(jnp.bfloat16)

    out = _fused_down_layer(xp, w1g, b1p, w2g, ws_emb, bj,
                            N=N, Mb=Mb, Wo=Wo, S=S, P=P, nb=nb, Cpp=Cpp)
    out = out.reshape(N, S, Cpp)[:, P:P + Mb, :Cp].reshape(N, Ho, Wo, Cp)
    return jnp.transpose(out, (0, 3, 1, 2)).astype(jnp.float32)


# ---------------------------- pure-JAX reference ----------------------------

def ref_forward(x, params):
    def conv(x, w, stride, pad):
        return jax.lax.conv_general_dilated(
            x, w, (stride, stride), [(pad, pad), (pad, pad)],
            dimension_numbers=("NCHW", "OIHW", "NCHW"))

    def bn(x, stats):
        g, b, m, v = stats
        sh = (1, -1, 1, 1)
        return (x - m.reshape(sh)) / jnp.sqrt(v.reshape(sh) + EPS) \
            * g.reshape(sh) + b.reshape(sh)

    y = jax.nn.relu(bn(conv(x, params["w1"], 2, 1), params["bn1"]))
    y = bn(conv(y, params["w2"], 1, 1), params["bn2"])
    s = bn(conv(x, params["ws"], 2, 0), params["bns"])
    return jax.nn.relu(y + s)


# ----------------------------------- main -----------------------------------

def make_params(key, in_c, plain_c):
    ks = jax.random.split(key, 12)

    def bn_stats(k0, k1, k2, k3, c):
        gamma = 1.0 + 0.1 * jax.random.normal(k0, (c,), jnp.float32)
        beta = 0.1 * jax.random.normal(k1, (c,), jnp.float32)
        rmean = 0.1 * jax.random.normal(k2, (c,), jnp.float32)
        rvar = 0.5 + jnp.abs(jax.random.normal(k3, (c,), jnp.float32)) * 0.5
        return (gamma, beta, rmean, rvar)

    return {
        "w1": 0.1 * jax.random.normal(ks[0], (plain_c, in_c, 3, 3), jnp.float32),
        "bn1": bn_stats(ks[1], ks[2], ks[3], ks[4], plain_c),
        "w2": 0.1 * jax.random.normal(ks[5], (plain_c, plain_c, 3, 3), jnp.float32),
        "bn2": bn_stats(ks[6], ks[7], ks[8], ks[9], plain_c),
        "ws": 0.1 * jax.random.normal(ks[10], (plain_c, in_c, 1, 1), jnp.float32),
        "bns": bn_stats(ks[11], ks[0], ks[5], ks[10], plain_c),
    }


if __name__ == "__main__":
    N, in_c, plain_c, H, W = 2, 4, 8, 16, 16

    key = jax.random.PRNGKey(0)
    kx, kp = jax.random.split(key)
    x = jax.random.normal(kx, (N, in_c, H, W), jnp.float32)
    params = make_params(kp, in_c, plain_c)

    out = jax.jit(lambda x: down_layer_forward(x, params))(x)
    out = jax.block_until_ready(out)

    ref = jax.block_until_ready(ref_forward(x, params))
    assert out.shape == (N, plain_c, H // 2, W // 2), out.shape
    assert bool(jnp.all(jnp.isfinite(out)))
    assert bool(jnp.allclose(out, ref, rtol=2e-2, atol=2e-2)), \
        float(jnp.max(jnp.abs(out - ref)))

    print("KERNEL_OK")
</pallas_src>

<mosaic_0001>
module attributes {stable_mosaic.version = 11 : i64} {
  func.func @_down_layer_kernel(%arg0: i32, %arg1: memref<160x128xbf16, #tpu.memory_space<vmem>>, %arg2: memref<4x128x128xbf16, #tpu.memory_space<vmem>>, %arg3: memref<1x128xf32, #tpu.memory_space<vmem>>, %arg4: memref<9x128x128xbf16, #tpu.memory_space<vmem>>, %arg5: memref<128x128xbf16, #tpu.memory_space<vmem>>, %arg6: memref<1x128xf32, #tpu.memory_space<vmem>>, %arg7: memref<160x128xbf16, #tpu.memory_space<vmem>>, %arg8: memref<176x128xbf16, #tpu.memory_space<vmem>>) attributes {dimension_semantics = [#tpu.dimension_semantics<parallel>], iteration_bounds = array<i64: 1>, scalar_prefetch = 0 : i64, scratch_operands = 1 : i64, tpu.core_type = #tpu.core_type<tc>, window_params = [{transform_indices = @transform_0, window_bounds = array<i64: 160, 128>}, {pipeline_mode = #tpu.pipeline_mode<synchronous>, transform_indices = @transform_1, window_bounds = array<i64: 4, 128, 128>}, {pipeline_mode = #tpu.pipeline_mode<synchronous>, transform_indices = @transform_2, window_bounds = array<i64: 1, 128>}, {pipeline_mode = #tpu.pipeline_mode<synchronous>, transform_indices = @transform_3, window_bounds = array<i64: 9, 128, 128>}, {pipeline_mode = #tpu.pipeline_mode<synchronous>, transform_indices = @transform_4, window_bounds = array<i64: 128, 128>}, {pipeline_mode = #tpu.pipeline_mode<synchronous>, transform_indices = @transform_5, window_bounds = array<i64: 1, 128>}, {transform_indices = @transform_6, window_bounds = array<i64: 160, 128>}]} {
    %0 = tpu.iota {dimensions = array<i32: 0>} : vector<144x1xi32>
    %c8_i32 = arith.constant 8 : i32
    %c0_i32 = arith.constant 0 : i32
    %1 = arith.cmpi eq, %c8_i32, %c0_i32 : i32
    %c1_i32 = arith.constant 1 : i32
    %2 = arith.select %1, %c1_i32, %c8_i32 : i32
    %3 = vector.broadcast %2 : i32 to vector<144x1xi32>
    %4 = arith.remsi %0, %3 : vector<144x1xi32>
    %c0_i32_0 = arith.constant 0 : i32
    %5 = vector.broadcast %c0_i32_0 : i32 to vector<144x1xi32>
    %6 = arith.cmpi ne, %4, %5 : vector<144x1xi32>
    %c0_i32_1 = arith.constant 0 : i32
    %7 = vector.broadcast %c0_i32_1 : i32 to vector<144x1xi32>
    %8 = arith.cmpi slt, %4, %7 : vector<144x1xi32>
    %c0_i32_2 = arith.constant 0 : i32
    %9 = arith.cmpi slt, %2, %c0_i32_2 : i32
    %10 = vector.broadcast %9 : i1 to vector<144x1xi1>
    %11 = vector.broadcast %10 : vector<144x1xi1> to vector<144x1xi1>
    %12 = arith.xori %8, %11 : vector<144x1xi1>
    %13 = arith.andi %12, %6 : vector<144x1xi1>
    %14 = vector.broadcast %2 : i32 to vector<144x1xi32>
    %15 = arith.addi %4, %14 : vector<144x1xi32>
    %16 = arith.select %13, %15, %4 : vector<144x1xi1>, vector<144x1xi32>
    %c0_i32_3 = arith.constant 0 : i32
    %17 = vector.broadcast %c0_i32_3 : i32 to vector<144x1xi32>
    %18 = arith.cmpi sgt, %16, %17 : vector<144x1xi32>
    %c7_i32 = arith.constant 7 : i32
    %19 = vector.broadcast %c7_i32 : i32 to vector<144x1xi32>
    %20 = arith.cmpi slt, %16, %19 : vector<144x1xi32>
    %c16 = arith.constant 16 : index
    %c0 = arith.constant 0 : index
    %21 = vector.load %arg1[%c16, %c0] : memref<160x128xbf16, #tpu.memory_space<vmem>>, vector<144x128xbf16>
    %c0_4 = arith.constant 0 : index
    %c0_5 = arith.constant 0 : index
    %c0_6 = arith.constant 0 : index
    %22 = vector.load %arg2[%c0_4, %c0_5, %c0_6] : memref<4x128x128xbf16, #tpu.memory_space<vmem>>, vector<1x128x128xbf16>
    %23 = vector.shape_cast %22 : vector<1x128x128xbf16> to vector<128x128xbf16>
    %cst = arith.constant dense<0.000000e+00> : vector<144x128xf32>
    %24 = tpu.matmul %21, %23, %cst {dimension_numbers = #tpu.dot_dimension_numbers<[1], [0], [0], [1], [0, 0, 1, 1], [], []>} : vector<144x128xbf16>, vector<128x128xbf16>, vector<144x128xf32> -> vector<144x128xf32>
    %c15 = arith.constant 15 : index
    %c0_7 = arith.constant 0 : index
    %25 = vector.load %arg1[%c15, %c0_7] : memref<160x128xbf16, #tpu.memory_space<vmem>>, vector<144x128xbf16>
    %c0_i32_8 = arith.constant 0 : i32
    %26 = arith.sitofp %c0_i32_8 : i32 to bf16
    %27 = vector.shape_cast %18 : vector<144x1xi1> to vector<144x1xi1>
    %28 = vector.broadcast %27 : vector<144x1xi1> to vector<144x128xi1>
    %29 = vector.broadcast %26 : bf16 to vector<144x128xbf16>
    %30 = arith.select %28, %25, %29 : vector<144x128xi1>, vector<144x128xbf16>
    %c1 = arith.constant 1 : index
    %c0_9 = arith.constant 0 : index
    %c0_10 = arith.constant 0 : index
    %31 = vector.load %arg2[%c1, %c0_9, %c0_10] : memref<4x128x128xbf16, #tpu.memory_space<vmem>>, vector<1x128x128xbf16>
    %32 = vector.shape_cast %31 : vector<1x128x128xbf16> to vector<128x128xbf16>
    %cst_11 = arith.constant dense<0.000000e+00> : vector<144x128xf32>
    %33 = tpu.matmul %30, %32, %cst_11 {dimension_numbers = #tpu.dot_dimension_numbers<[1], [0], [0], [1], [0, 0, 1, 1], [], []>} : vector<144x128xbf16>, vector<128x128xbf16>, vector<144x128xf32> -> vector<144x128xf32>
    %34 = arith.addf %24, %33 : vector<144x128xf32>
    %c8 = arith.constant 8 : index
    %c0_12 = arith.constant 0 : index
    %35 = vector.load %arg1[%c8, %c0_12] : memref<160x128xbf16, #tpu.memory_space<vmem>>, vector<144x128xbf16>
    %c2 = arith.constant 2 : index
    %c0_13 = arith.constant 0 : index
    %c0_14 = arith.constant 0 : index
    %36 = vector.load %arg2[%c2, %c0_13, %c0_14] : memref<4x128x128xbf16, #tpu.memory_space<vmem>>, vector<1x128x128xbf16>
    %37 = vector.shape_cast %36 : vector<1x128x128xbf16> to vector<128x128xbf16>
    %cst_15 = arith.constant dense<0.000000e+00> : vector<144x128xf32>
    %38 = tpu.matmul %35, %37, %cst_15 {dimension_numbers = #tpu.dot_dimension_numbers<[1], [0], [0], [1], [0, 0, 1, 1], [], []>} : vector<144x128xbf16>, vector<128x128xbf16>, vector<144x128xf32> -> vector<144x128xf32>
    %39 = arith.addf %34, %38 : vector<144x128xf32>
    %c7 = arith.constant 7 : index
    %c0_16 = arith.constant 0 : index
    %40 = vector.load %arg1[%c7, %c0_16] : memref<160x128xbf16, #tpu.memory_space<vmem>>, vector<144x128xbf16>
    %c0_i32_17 = arith.constant 0 : i32
    %41 = arith.sitofp %c0_i32_17 : i32 to bf16
    %42 = vector.shape_cast %18 : vector<144x1xi1> to vector<144x1xi1>
    %43 = vector.broadcast %42 : vector<144x1xi1> to vector<144x128xi1>
    %44 = vector.broadcast %41 : bf16 to vector<144x128xbf16>
    %45 = arith.select %43, %40, %44 : vector<144x128xi1>, vector<144x128xbf16>
    %c3 = arith.constant 3 : index
    %c0_18 = arith.constant 0 : index
    %c0_19 = arith.constant 0 : index
    %46 = vector.load %arg2[%c3, %c0_18, %c0_19] : memref<4x128x128xbf16, #tpu.memory_space<vmem>>, vector<1x128x128xbf16>
    %47 = vector.shape_cast %46 : vector<1x128x128xbf16> to vector<128x128xbf16>
    %cst_20 = arith.constant dense<0.000000e+00> : vector<144x128xf32>
    %48 = tpu.matmul %45, %47, %cst_20 {dimension_numbers = #tpu.dot_dimension_numbers<[1], [0], [0], [1], [0, 0, 1, 1], [], []>} : vector<144x128xbf16>, vector<128x128xbf16>, vector<144x128xf32> -> vector<144x128xf32>
    %49 = arith.addf %39, %48 : vector<144x128xf32>
    %c0_21 = arith.constant 0 : index
    %c0_22 = arith.constant 0 : index
    %50 = vector.load %arg3[%c0_21, %c0_22] : memref<1x128xf32, #tpu.memory_space<vmem>>, vector<1x128xf32>
    %51 = vector.broadcast %50 : vector<1x128xf32> to vector<144x128xf32>
    %52 = arith.addf %49, %51 : vector<144x128xf32>
    %cst_23 = arith.constant 0.000000e+00 : f32
    %53 = vector.broadcast %cst_23 : f32 to vector<144x128xf32>
    %54 = arith.maximumf %52, %53 : vector<144x128xf32>
    %55 = arith.truncf %54 : vector<144x128xf32> to vector<144x128xbf16>
    %cst_24 = arith.constant 0.000000e+00 : bf16
    %56 = vector.broadcast %cst_24 : bf16 to vector<16x128xbf16>
    %c0_25 = arith.constant 0 : index
    %c0_26 = arith.constant 0 : index
    %57 = vector.load %arg8[%c0_25, %c0_26] : memref<176x128xbf16, #tpu.memory_space<vmem>>, vector<16x128xbf16>
    tpu.vector_store %arg8[%c0_25, %c0_26], %56 {strides = array<i32>} : memref<176x128xbf16, #tpu.memory_space<vmem>>, vector<16x128xbf16>,
    %c16_27 = arith.constant 16 : index
    %c0_28 = arith.constant 0 : index
    %58 = vector.load %arg8[%c16_27, %c0_28] : memref<176x128xbf16, #tpu.memory_space<vmem>>, vector<144x128xbf16>
    tpu.vector_store %arg8[%c16_27, %c0_28], %55 {strides = array<i32>} : memref<176x128xbf16, #tpu.memory_space<vmem>>, vector<144x128xbf16>,
    %cst_29 = arith.constant 0.000000e+00 : bf16
    %59 = vector.broadcast %cst_29 : bf16 to vector<16x128xbf16>
    %c80 = arith.constant 80 : index
    %c0_30 = arith.constant 0 : index
    %60 = vector.load %arg8[%c80, %c0_30] : memref<176x128xbf16, #tpu.memory_space<vmem>>, vector<16x128xbf16>
    tpu.vector_store %arg8[%c80, %c0_30], %59 {strides = array<i32>} : memref<176x128xbf16, #tpu.memory_space<vmem>>, vector<16x128xbf16>,
    %c160 = arith.constant 160 : index
    %c0_31 = arith.constant 0 : index
    %61 = vector.load %arg8[%c160, %c0_31] : memref<176x128xbf16, #tpu.memory_space<vmem>>, vector<16x128xbf16>
    tpu.vector_store %arg8[%c160, %c0_31], %59 {strides = array<i32>} : memref<176x128xbf16, #tpu.memory_space<vmem>>, vector<16x128xbf16>,
    %c16_32 = arith.constant 16 : index
    %c0_33 = arith.constant 0 : index
    %62 = vector.load %arg1[%c16_32, %c0_33] : memref<160x128xbf16, #tpu.memory_space<vmem>>, vector<144x128xbf16>
    %c0_34 = arith.constant 0 : index
    %c0_35 = arith.constant 0 : index
    %63 = vector.load %arg5[%c0_34, %c0_35] : memref<128x128xbf16, #tpu.memory_space<vmem>>, vector<128x128xbf16>
    %cst_36 = arith.constant dense<0.000000e+00> : vector<144x128xf32>
    %64 = tpu.matmul %62, %63, %cst_36 {dimension_numbers = #tpu.dot_dimension_numbers<[1], [0], [0], [1], [0, 0, 1, 1], [], []>} : vector<144x128xbf16>, vector<128x128xbf16>, vector<144x128xf32> -> vector<144x128xf32>
    %c7_37 = arith.constant 7 : index
    %c0_38 = arith.constant 0 : index
    %65 = vector.load %arg8[%c7_37, %c0_38] : memref<176x128xbf16, #tpu.memory_space<vmem>>, vector<144x128xbf16>
    %c0_i32_39 = arith.constant 0 : i32
    %66 = arith.sitofp %c0_i32_39 : i32 to bf16
    %67 = vector.shape_cast %18 : vector<144x1xi1> to vector<144x1xi1>
    %68 = vector.broadcast %67 : vector<144x1xi1> to vector<144x128xi1>
    %69 = vector.broadcast %66 : bf16 to vector<144x128xbf16>
    %70 = arith.select %68, %65, %69 : vector<144x128xi1>, vector<144x128xbf16>
    %c0_40 = arith.constant 0 : index
    %c0_41 = arith.constant 0 : index
    %c0_42 = arith.constant 0 : index
    %71 = vector.load %arg4[%c0_40, %c0_41, %c0_42] : memref<9x128x128xbf16, #tpu.memory_space<vmem>>, vector<1x128x128xbf16>
    %72 = vector.shape_cast %71 : vector<1x128x128xbf16> to vector<128x128xbf16>
    %cst_43 = arith.constant dense<0.000000e+00> : vector<144x128xf32>
    %73 = tpu.matmul %70, %72, %cst_43 {dimension_numbers = #tpu.dot_dimension_numbers<[1], [0], [0], [1], [0, 0, 1, 1], [], []>} : vector<144x128xbf16>, vector<128x128xbf16>, vector<144x128xf32> -> vector<144x128xf32>
    %74 = arith.addf %64, %73 : vector<144x128xf32>
    %c8_44 = arith.constant 8 : index
    %c0_45 = arith.constant 0 : index
    %75 = vector.load %arg8[%c8_44, %c0_45] : memref<176x128xbf16, #tpu.memory_space<vmem>>, vector<144x128xbf16>
    %c1_46 = arith.constant 1 : index
    %c0_47 = arith.constant 0 : index
    %c0_48 = arith.constant 0 : index
    %76 = vector.load %arg4[%c1_46, %c0_47, %c0_48] : memref<9x128x128xbf16, #tpu.memory_space<vmem>>, vector<1x128x128xbf16>
    %77 = vector.shape_cast %76 : vector<1x128x128xbf16> to vector<128x128xbf16>
    %cst_49 = arith.constant dense<0.000000e+00> : vector<144x128xf32>
    %78 = tpu.matmul %75, %77, %cst_49 {dimension_numbers = #tpu.dot_dimension_numbers<[1], [0], [0], [1], [0, 0, 1, 1], [], []>} : vector<144x128xbf16>, vector<128x128xbf16>, vector<144x128xf32> -> vector<144x128xf32>
    %79 = arith.addf %74, %78 : vector<144x128xf32>
    %c9 = arith.constant 9 : index
    %c0_50 = arith.constant 0 : index
    %80 = vector.load %arg8[%c9, %c0_50] : memref<176x128xbf16, #tpu.memory_space<vmem>>, vector<144x128xbf16>
    %c0_i32_51 = arith.constant 0 : i32
    %81 = arith.sitofp %c0_i32_51 : i32 to bf16
    %82 = vector.shape_cast %20 : vector<144x1xi1> to vector<144x1xi1>
    %83 = vector.broadcast %82 : vector<144x1xi1> to vector<144x128xi1>
    %84 = vector.broadcast %81 : bf16 to vector<144x128xbf16>
    %85 = arith.select %83, %80, %84 : vector<144x128xi1>, vector<144x128xbf16>
    %c2_52 = arith.constant 2 : index
    %c0_53 = arith.constant 0 : index
    %c0_54 = arith.constant 0 : index
    %86 = vector.load %arg4[%c2_52, %c0_53, %c0_54] : memref<9x128x128xbf16, #tpu.memory_space<vmem>>, vector<1x128x128xbf16>
    %87 = vector.shape_cast %86 : vector<1x128x128xbf16> to vector<128x128xbf16>
    %cst_55 = arith.constant dense<0.000000e+00> : vector<144x128xf32>
    %88 = tpu.matmul %85, %87, %cst_55 {dimension_numbers = #tpu.dot_dimension_numbers<[1], [0], [0], [1], [0, 0, 1, 1], [], []>} : vector<144x128xbf16>, vector<128x128xbf16>, vector<144x128xf32> -> vector<144x128xf32>
    %89 = arith.addf %79, %88 : vector<144x128xf32>
    %c15_56 = arith.constant 15 : index
    %c0_57 = arith.constant 0 : index
    %90 = vector.load %arg8[%c15_56, %c0_57] : memref<176x128xbf16, #tpu.memory_space<vmem>>, vector<144x128xbf16>
    %c0_i32_58 = arith.constant 0 : i32
    %91 = arith.sitofp %c0_i32_58 : i32 to bf16
    %92 = vector.shape_cast %18 : vector<144x1xi1> to vector<144x1xi1>
    %93 = vector.broadcast %92 : vector<144x1xi1> to vector<144x128xi1>
    %94 = vector.broadcast %91 : bf16 to vector<144x128xbf16>
    %95 = arith.select %93, %90, %94 : vector<144x128xi1>, vector<144x128xbf16>
    %c3_59 = arith.constant 3 : index
    %c0_60 = arith.constant 0 : index
    %c0_61 = arith.constant 0 : index
    %96 = vector.load %arg4[%c3_59, %c0_60, %c0_61] : memref<9x128x128xbf16, #tpu.memory_space<vmem>>, vector<1x128x128xbf16>
    %97 = vector.shape_cast %96 : vector<1x128x128xbf16> to vector<128x128xbf16>
    %cst_62 = arith.constant dense<0.000000e+00> : vector<144x128xf32>
    %98 = tpu.matmul %95, %97, %cst_62 {dimension_numbers = #tpu.dot_dimension_numbers<[1], [0], [0], [1], [0, 0, 1, 1], [], []>} : vector<144x128xbf16>, vector<128x128xbf16>, vector<144x128xf32> -> vector<144x128xf32>
    %99 = arith.addf %89, %98 : vector<144x128xf32>
    %c16_63 = arith.constant 16 : index
    %c0_64 = arith.constant 0 : index
    %100 = vector.load %arg8[%c16_63, %c0_64] : memref<176x128xbf16, #tpu.memory_space<vmem>>, vector<144x128xbf16>
    %c4 = arith.constant 4 : index
    %c0_65 = arith.constant 0 : index
    %c0_66 = arith.constant 0 : index
    %101 = vector.load %arg4[%c4, %c0_65, %c0_66] : memref<9x128x128xbf16, #tpu.memory_space<vmem>>, vector<1x128x128xbf16>
    %102 = vector.shape_cast %101 : vector<1x128x128xbf16> to vector<128x128xbf16>
    %cst_67 = arith.constant dense<0.000000e+00> : vector<144x128xf32>
    %103 = tpu.matmul %100, %102, %cst_67 {dimension_numbers = #tpu.dot_dimension_numbers<[1], [0], [0], [1], [0, 0, 1, 1], [], []>} : vector<144x128xbf16>, vector<128x128xbf16>, vector<144x128xf32> -> vector<144x128xf32>
    %104 = arith.addf %99, %103 : vector<144x128xf32>
    %c17 = arith.constant 17 : index
    %c0_68 = arith.constant 0 : index
    %105 = vector.load %arg8[%c17, %c0_68] : memref<176x128xbf16, #tpu.memory_space<vmem>>, vector<144x128xbf16>
    %c0_i32_69 = arith.constant 0 : i32
    %106 = arith.sitofp %c0_i32_69 : i32 to bf16
    %107 = vector.shape_cast %20 : vector<144x1xi1> to vector<144x1xi1>
    %108 = vector.broadcast %107 : vector<144x1xi1> to vector<144x128xi1>
    %109 = vector.broadcast %106 : bf16 to vector<144x128xbf16>
    %110 = arith.select %108, %105, %109 : vector<144x128xi1>, vector<144x128xbf16>
    %c5 = arith.constant 5 : index
    %c0_70 = arith.constant 0 : index
    %c0_71 = arith.constant 0 : index
    %111 = vector.load %arg4[%c5, %c0_70, %c0_71] : memref<9x128x128xbf16, #tpu.memory_space<vmem>>, vector<1x128x128xbf16>
    %112 = vector.shape_cast %111 : vector<1x128x128xbf16> to vector<128x128xbf16>
    %cst_72 = arith.constant dense<0.000000e+00> : vector<144x128xf32>
    %113 = tpu.matmul %110, %112, %cst_72 {dimension_numbers = #tpu.dot_dimension_numbers<[1], [0], [0], [1], [0, 0, 1, 1], [], []>} : vector<144x128xbf16>, vector<128x128xbf16>, vector<144x128xf32> -> vector<144x128xf32>
    %114 = arith.addf %104, %113 : vector<144x128xf32>
    %c23 = arith.constant 23 : index
    %c0_73 = arith.constant 0 : index
    %115 = vector.load %arg8[%c23, %c0_73] : memref<176x128xbf16, #tpu.memory_space<vmem>>, vector<144x128xbf16>
    %c0_i32_74 = arith.constant 0 : i32
    %116 = arith.sitofp %c0_i32_74 : i32 to bf16
    %117 = vector.shape_cast %18 : vector<144x1xi1> to vector<144x1xi1>
    %118 = vector.broadcast %117 : vector<144x1xi1> to vector<144x128xi1>
    %119 = vector.broadcast %116 : bf16 to vector<144x128xbf16>
    %120 = arith.select %118, %115, %119 : vector<144x128xi1>, vector<144x128xbf16>
    %c6 = arith.constant 6 : index
    %c0_75 = arith.constant 0 : index
    %c0_76 = arith.constant 0 : index
    %121 = vector.load %arg4[%c6, %c0_75, %c0_76] : memref<9x128x128xbf16, #tpu.memory_space<vmem>>, vector<1x128x128xbf16>
    %122 = vector.shape_cast %121 : vector<1x128x128xbf16> to vector<128x128xbf16>
    %cst_77 = arith.constant dense<0.000000e+00> : vector<144x128xf32>
    %123 = tpu.matmul %120, %122, %cst_77 {dimension_numbers = #tpu.dot_dimension_numbers<[1], [0], [0], [1], [0, 0, 1, 1], [], []>} : vector<144x128xbf16>, vector<128x128xbf16>, vector<144x128xf32> -> vector<144x128xf32>
    %124 = arith.addf %114, %123 : vector<144x128xf32>
    %c24 = arith.constant 24 : index
    %c0_78 = arith.constant 0 : index
    %125 = vector.load %arg8[%c24, %c0_78] : memref<176x128xbf16, #tpu.memory_space<vmem>>, vector<144x128xbf16>
    %c7_79 = arith.constant 7 : index
    %c0_80 = arith.constant 0 : index
    %c0_81 = arith.constant 0 : index
    %126 = vector.load %arg4[%c7_79, %c0_80, %c0_81] : memref<9x128x128xbf16, #tpu.memory_space<vmem>>, vector<1x128x128xbf16>
    %127 = vector.shape_cast %126 : vector<1x128x128xbf16> to vector<128x128xbf16>
    %cst_82 = arith.constant dense<0.000000e+00> : vector<144x128xf32>
    %128 = tpu.matmul %125, %127, %cst_82 {dimension_numbers = #tpu.dot_dimension_numbers<[1], [0], [0], [1], [0, 0, 1, 1], [], []>} : vector<144x128xbf16>, vector<128x128xbf16>, vector<144x128xf32> -> vector<144x128xf32>
    %129 = arith.addf %124, %128 : vector<144x128xf32>
    %c25 = arith.constant 25 : index
    %c0_83 = arith.constant 0 : index
    %130 = vector.load %arg8[%c25, %c0_83] : memref<176x128xbf16, #tpu.memory_space<vmem>>, vector<144x128xbf16>
    %c0_i32_84 = arith.constant 0 : i32
    %131 = arith.sitofp %c0_i32_84 : i32 to bf16
    %132 = vector.shape_cast %20 : vector<144x1xi1> to vector<144x1xi1>
    %133 = vector.broadcast %132 : vector<144x1xi1> to vector<144x128xi1>
    %134 = vector.broadcast %131 : bf16 to vector<144x128xbf16>
    %135 = arith.select %133, %130, %134 : vector<144x128xi1>, vector<144x128xbf16>
    %c8_85 = arith.constant 8 : index
    %c0_86 = arith.constant 0 : index
    %c0_87 = arith.constant 0 : index
    %136 = vector.load %arg4[%c8_85, %c0_86, %c0_87] : memref<9x128x128xbf16, #tpu.memory_space<vmem>>, vector<1x128x128xbf16>
    %137 = vector.shape_cast %136 : vector<1x128x128xbf16> to vector<128x128xbf16>
    %cst_88 = arith.constant dense<0.000000e+00> : vector<144x128xf32>
    %138 = tpu.matmul %135, %137, %cst_88 {dimension_numbers = #tpu.dot_dimension_numbers<[1], [0], [0], [1], [0, 0, 1, 1], [], []>} : vector<144x128xbf16>, vector<128x128xbf16>, vector<144x128xf32> -> vector<144x128xf32>
    %139 = arith.addf %129, %138 : vector<144x128xf32>
    %cst_89 = arith.constant 0.000000e+00 : bf16
    %140 = vector.broadcast %cst_89 : bf16 to vector<16x128xbf16>
    %c0_90 = arith.constant 0 : index
    %c0_91 = arith.constant 0 : index
    %141 = vector.load %arg7[%c0_90, %c0_91] : memref<160x128xbf16, #tpu.memory_space<vmem>>, vector<16x128xbf16>
    tpu.vector_store %arg7[%c0_90, %c0_91], %140 {strides = array<i32>} : memref<160x128xbf16, #tpu.memory_space<vmem>>, vector<16x128xbf16>,
    %c0_92 = arith.constant 0 : index
    %c0_93 = arith.constant 0 : index
    %142 = vector.load %arg6[%c0_92, %c0_93] : memref<1x128xf32, #tpu.memory_space<vmem>>, vector<1x128xf32>
    %143 = vector.broadcast %142 : vector<1x128xf32> to vector<144x128xf32>
    %144 = arith.addf %139, %143 : vector<144x128xf32>
    %cst_94 = arith.constant 0.000000e+00 : f32
    %145 = vector.broadcast %cst_94 : f32 to vector<144x128xf32>
    %146 = arith.maximumf %144, %145 : vector<144x128xf32>
    %147 = arith.truncf %146 : vector<144x128xf32> to vector<144x128xbf16>
    %c16_95 = arith.constant 16 : index
    %c0_96 = arith.constant 0 : index
    %148 = vector.load %arg7[%c16_95, %c0_96] : memref<160x128xbf16, #tpu.memory_space<vmem>>, vector<144x128xbf16>
    tpu.vector_store %arg7[%c16_95, %c0_96], %147 {strides = array<i32>} : memref<160x128xbf16, #tpu.memory_space<vmem>>, vector<144x128xbf16>,
    return
  }
  func.func @transform_0(%arg0: i32) -> (i32, i32) {
    %c0_i32 = arith.constant 0 : i32
    %c0_i32_0 = arith.constant 0 : i32
    return %arg0, %c0_i32 : i32, i32
  }
  func.func @transform_1(%arg0: i32) -> (i32, i32, i32) {
    %c0_i32 = arith.constant 0 : i32
    %c0_i32_0 = arith.constant 0 : i32
    %c0_i32_1 = arith.constant 0 : i32
    %c0_i32_2 = arith.constant 0 : i32
    return %c0_i32, %c0_i32_0, %c0_i32_1 : i32, i32, i32
  }
  func.func @transform_2(%arg0: i32) -> (i32, i32) {
    %c0_i32 = arith.constant 0 : i32
    %c0_i32_0 = arith.constant 0 : i32
    %c0_i32_1 = arith.constant 0 : i32
    return %c0_i32, %c0_i32_0 : i32, i32
  }
  func.func @transform_3(%arg0: i32) -> (i32, i32, i32) {
    %c0_i32 = arith.constant 0 : i32
    %c0_i32_0 = arith.constant 0 : i32
    %c0_i32_1 = arith.constant 0 : i32
    %c0_i32_2 = arith.constant 0 : i32
    return %c0_i32, %c0_i32_0, %c0_i32_1 : i32, i32, i32
  }
  func.func @transform_4(%arg0: i32) -> (i32, i32) {
    %c0_i32 = arith.constant 0 : i32
    %c0_i32_0 = arith.constant 0 : i32
    %c0_i32_1 = arith.constant 0 : i32
    return %c0_i32, %c0_i32_0 : i32, i32
  }
  func.func @transform_5(%arg0: i32) -> (i32, i32) {
    %c0_i32 = arith.constant 0 : i32
    %c0_i32_0 = arith.constant 0 : i32
    %c0_i32_1 = arith.constant 0 : i32
    return %c0_i32, %c0_i32_0 : i32, i32
  }
  func.func @transform_6(%arg0: i32) -> (i32, i32) {
    %c0_i32 = arith.constant 0 : i32
    %c0_i32_0 = arith.constant 0 : i32
    return %arg0, %c0_i32 : i32, i32
  }
}

</mosaic_0001>

<bundles_post_ra>
// kernel: _lambda_.1
= control target key start
LH: loop header
LB: loop body
LE: loop exit
PB: predicated region body
PF: predicated region fallthrough
CT: control target
= control target key end

     0   :  { %v26_v0 = vlaneseq  ;;  %v10427_v1 = vmov 0.0   ;;  %v10406_v3 = vmov 0   ;;  %vm10378_vm0 = vmmov 0   ;;  %s10370_s1 = inlined_call_operand.vmem [shape: bf16[4,128,128], index: 1, kind: input, shape index: {}]   ;;  %s10371_s0 = inlined_call_operand.vmem [shape: bf16[160,128], index: 0, kind: input, shape index: {}]   ;;  %s10372_s4 = inlined_call_operand.vmem [shape: bf16[128,128], index: 4, kind: input, shape index: {}]   ;;  %s10373_s3 = inlined_call_operand.vmem [shape: bf16[9,128,128], index: 3, kind: input, shape index: {}]   ;;  %s10374_s2 = inlined_call_operand.vmem [shape: f32[1,128], index: 2, kind: input, shape index: {}]   ;;  %s10375_s6 = inlined_call_operand.vmem [shape: bf16[160,128], index: 6, kind: output, shape index: {}]   ;;  %s10376_s5 = inlined_call_operand.vmem [shape: f32[1,128], index: 5, kind: input, shape index: {}]  }
   0x1   :  { %6245 = vmatprep.subr.bf16.mxu0 %v10427_v1  ;;  %6297 = vmatprep.subr.bf16.mxu1 %v10427_v1  ;;  %v6976_v2 = vld [vmem:[%s10370_s1 + $0x78] sm:$0xff]   ;;  %1814 = vst [vmem:[#allocation2] sm:$0xf] %v10406_v3  ;;  %1815 = vst [vmem:[#allocation2 + $0x4] sm:$0xf] %v10406_v3  ;;  %v6978_v5 = vld [vmem:[%s10370_s1 + $0x70] sm:$0xff]  }
   0x2   :  { %1899 = vst [vmem:[#allocation2 + $0x50] sm:$0xf] %v10406_v3  ;;  %1900 = vst [vmem:[#allocation2 + $0x54] sm:$0xf] %v10406_v3  ;;  %v6977_v4 = vld [vmem:[%s10370_s1 + $0x38] sm:$0xff]   ;;  %6261 = vmatprep.mubr.msk.bf16.mxu0 %vm10378_vm0, %v10427_v1  ;;  %6313 = vmatprep.mubr.msk.bf16.mxu1 %vm10378_vm0, %v10427_v1  ;;  %v6979_v6 = vld [vmem:[%s10370_s1 + $0x30] sm:$0xff]  }
   0x3   :  { %6246 = vmatpush3.bf16.msra.mxu0 %v6976_v2  ;;  %6298 = vmatpush3.bf16.msra.mxu1 %v6977_v4  ;;  %v7209_v7 = vshrl.u32 %v26_v0, 7  ;;  %v6980_v8 = vld [vmem:[%s10370_s1 + $0x68] sm:$0xff]   ;;  %v6982_v13 = vld [vmem:[%s10370_s1 + $0x60] sm:$0xff]   ;;  %v6984_v19 = vld [vmem:[%s10370_s1 + $0x58] sm:$0xff]   ;;  %vm404_vm6 = vsmask.f32 3328 }
   0x4   :  { %6247 = vmatprep.subr.bf16.mxu0 %v10427_v1  ;;  %6299 = vmatprep.subr.bf16.mxu1 %v10427_v1  ;;  %v6981_v9 = vld [vmem:[%s10370_s1 + $0x28] sm:$0xff]   ;;  %v6983_v15 = vld [vmem:[%s10370_s1 + $0x20] sm:$0xff]   ;;  %v6985_v21 = vld [vmem:[%s10370_s1 + $0x18] sm:$0xff]   ;;  %vm405_vm8 = vsmask.f32 7440 }
   0x5   :  { %v7220_v10 = vadd.s32 8, %v7209_v7  ;;  %v7224_v11 = vadd.s32 16, %v7209_v7  ;;  %v7227_v12 = vadd.s32 24, %v7209_v7  ;;  %v10410_v14 = vand.u32 7, %v7209_v7  ;;  %v6986_v25 = vld [vmem:[%s10370_s1 + $0x50] sm:$0xff]   ;;  %v6988_v42 = vld [vmem:[%s10370_s1 + $0x48] sm:$0xff]   ;;  %vm7334_vm12 = vmor %vm404_vm6, %vm405_vm8 }
   0x6   :  { %v7268_v24 = vadd.s32 32, %v7209_v7  ;;  %v6987_v27 = vld [vmem:[%s10370_s1 + $0x10] sm:$0xff]   ;;  %v331_v29 = vld [vmem:[%s10371_s0 + $0x4] sm:$0x8]  ;;  %v7298_v33 = vadd.s32 40, %v7209_v7  ;;  %v6989_v47 = vld [vmem:[%s10370_s1 + $0x8] sm:$0xff]  }
   0x7   :  { %6248 = vmatpush3.bf16.msra.mxu0 %v6978_v5  ;;  %6300 = vmatpush3.bf16.msra.mxu1 %v6979_v6  ;;  %v10409_v16 = vand.u32 7, %v7220_v10  ;;  %v10408_v17 = vand.u32 7, %v7224_v11  ;;  %v10405_v18 = vand.u32 7, %v7227_v12  ;;  %vm7246_vm1 = vcmp.gt.s32.totalorder %v10410_v14, 0  ;;  %v7319_v48 = vld [vmem:[%s10371_s0 + $0x8] sm:$0xf] }
   0x8   :  { %6249 = vmatprep.subr.bf16.mxu0 %v10427_v1  ;;  %6301 = vmatprep.subr.bf16.mxu1 %v10427_v1  ;;  %vm368_vm5 = vmpackc.low %vm7246_vm1, %vm7246_vm1  ;;  %v10404_v37 = vand.u32 7, %v7268_v24  ;;  %v7324_v49 = vld [vmem:[%s10371_s0 + $0xc] sm:$0xf]  ;;  %v6990_v53 = vld [vmem:[%s10370_s1 + $0x40] sm:$0xff]   ;;  %v10403_v60 = vand.u32 7, %v7298_v33  ;;  %v7346_v2 = vadd.s32 48, %v7209_v7 }
   0x9   :  { %vm7256_vm2 = vcmp.gt.s32.totalorder %v10409_v16, 0  ;;  %vm7263_vm3 = vcmp.gt.s32.totalorder %v10408_v17, 0  ;;  %vm7275_vm4 = vcmp.gt.s32.totalorder %v10405_v18, 0  ;;  %v386_v28 = vsel %vm368_vm5, 65537, %v10406_v3  ;;  %v6991_v4 = vld [vmem:[%s10370_s1] sm:$0xff]   ;;  %v6994_v23 = vld [vmem:[%s10370_s1 + $0xf8] sm:$0xff]  }
   0xa   :  { %vm369_vm7 = vmpackc.low %vm7256_vm2, %vm7256_vm2  ;;  %v408_v31 = vshll.u32 %v386_v28, 16  ;;  %v411_v32 = vshrl.u32 %v386_v28, 16  ;;  %vm265_vm13 = vcmp.gt.s32.totalorder %v10404_v37, 0  ;;  %v5437_v0 = vcombine.low %v7319_v48, %v7324_v49  ;;  %v7355_v5 = vld [vmem:[%s10371_s0 + $0x10] sm:$0xf] }
   0xb   :  { %6250 = vmatpush3.bf16.msra.mxu0 %v6980_v8  ;;  %6302 = vmatpush3.bf16.msra.mxu1 %v6981_v9  ;;  %vm370_vm9 = vmpackc.low %vm7263_vm3, %vm7263_vm3  ;;  %v387_v30 = vsel %vm369_vm7, 65537, %v10406_v3  ;;  %vm266_vm15 = vcmp.gt.s32.totalorder %v10403_v60, 0 }
   0xc   :  { %6251 = vmatprep.subr.bf16.mxu0 %v10427_v1  ;;  %6303 = vmatprep.subr.bf16.mxu1 %v10427_v1  ;;  %vm371_vm10 = vmpackc.low %vm7275_vm4, %vm7275_vm4  ;;  %v388_v34 = vsel %vm370_vm9, 65537, %v10406_v3  ;;  %v417_v35 = vshll.u32 %v387_v30, 16  ;;  %v421_v36 = vshrl.u32 %v387_v30, 16  ;;  %v7307_v39 = vrot.slane %v408_v31, 5 }
   0xd   :  { %v389_v38 = vsel %vm371_vm10, 65537, %v10406_v3  ;;  %v413_v40 = vrot.slane %v411_v32, 4  ;;  %v427_v41 = vshll.u32 %v388_v34, 16  ;;  %v431_v45 = vshrl.u32 %v388_v34, 16  ;;  %vm372_vm14 = vmpackc.low %vm265_vm13, %vm265_vm13  ;;  %v300_v32 = vld [vmem:[%s10371_s0 + $0x14] sm:$0xf] }
   0xe   :  { %10537 = vst [vmem:[#allocation3_spill] sm:$0xff] %v7307_v39  ;;  %v419_v43 = vrot.slane %v417_v35, 5  ;;  %v423_v44 = vrot.slane %v421_v36, 4  ;;  %v437_v46 = vshll.u32 %v389_v38, 16  ;;  %v441_v52 = vshrl.u32 %v389_v38, 16  ;;  %vm373_vm2 = vmpackc.low %vm266_vm15, %vm266_vm15 }
   0xf   :  { %6252 = vmatpush3.bf16.msra.mxu0 %v6982_v13  ;;  %6304 = vmatpush3.bf16.msra.mxu1 %v6983_v15  ;;  %v414_v50 = vor.u32 %v413_v40, %v7307_v39  ;;  %v429_v51 = vrot.slane %v427_v41, 5  ;;  %vm10377_vm11 = vcmp.ne.s16.totalorder %v7307_v39, 0  ;;  %v433_v56 = vrot.slane %v431_v45, 4 }
  0x10   :  { %6253 = vmatprep.subr.bf16.mxu0 %v10427_v1  ;;  %6305 = vmatprep.subr.bf16.mxu1 %v10427_v1  ;;  %v424_v55 = vor.u32 %v423_v44, %v419_v43  ;;  %v439_v57 = vrot.slane %v437_v46, 5  ;;  %v605_v58 = vsel %vm10377_vm11, %v331_v29, 0  ;;  %v443_v61 = vrot.slane %v441_v52, 4 }
  0x11   :  { %v415_v59 = vrot.slane %v414_v50, 4  ;;  %v434_v63 = vor.u32 %v433_v56, %v429_v51  ;;  %v390_v8 = vsel %vm372_vm14, 65537, %v10406_v3  ;;  %vm10382_vm4 = vsmask.f32 4352  ;;  %v6997_v56 = vld [vmem:[%s10370_s1 + $0xf0] sm:$0xff]  }
  0x12   :  { %v425_v62 = vrot.slane %v424_v55, 4  ;;  %v444_v9 = vor.u32 %v443_v61, %v439_v57  ;;  %v447_v20 = vshll.u32 %v390_v8, 16  ;;  %v10546_v31 = vmov 0 }
  0x13   :  { %6254 = vmatpush3.bf16.msra.mxu0 %v6984_v19  ;;  %6306 = vmatpush3.bf16.msra.mxu1 %v6985_v21  ;;  %v420_v6 = vsel %vm7334_vm12, %v415_v59, %v419_v43  ;;  %v435_v15 = vrot.slane %v434_v63, 4  ;;  %v10540_v19 = vmov 0  ;;  %v10543_v21 = vmov 0 }
  0x14   :  { %6255 = vmatprep.subr.bf16.mxu0 %v10427_v1  ;;  %6307 = vmatprep.subr.bf16.mxu1 %v10427_v1  ;;  %v430_v13 = vsel %vm7334_vm12, %v425_v62, %v429_v51  ;;  %vm7365_vm1 = vcmp.ne.s16.totalorder %v420_v6, 0  ;;  %v445_v26 = vrot.slane %v444_v9, 4  ;;  %v449_v30 = vrot.slane %v447_v20, 5  ;;  %v7427_v6 = vld [vmem:[%s10371_s0 + $0x1c] sm:$0xf] }
  0x15   :  { %v10541_v19 = vsel %vm7365_vm1, 4294967295, %v10540_v19  ;;  %vm7369_vm3 = vcmp.ne.s16.totalorder %v430_v13, 0  ;;  %v606_v22 = vsel %vm7365_vm1, %v7319_v48, 0  ;;  %v451_v34 = vshrl.u32 %v390_v8, 16 }
  0x16   :  { %10542 = vst [vmem:[#allocation4_spill] sm:$0xff] %v10541_v19  ;;  %v10544_v21 = vsel %vm7369_vm3, 4294967295, %v10543_v21  ;;  %v607_v28 = vsel %vm7369_vm3, %v7324_v49, 0  ;;  %v5419_v29 = vcombine.low %v605_v58, %v606_v22  ;;  %v10549_v46 = vmov 0 }
  0x17   :  { %6256 = vmatpush3.bf16.msra.mxu0 %v6986_v25  ;;  %6308 = vmatpush3.bf16.msra.mxu1 %v6987_v27  ;;  %10545 = vst [vmem:[#allocation5_spill] sm:$0xff] %v10544_v21  ;;  %v391_v25 = vsel %vm373_vm2, 65537, %v10406_v3  ;;  %v440_v27 = vsel %vm7334_vm12, %v435_v15, %v439_v57  ;;  %v453_v44 = vrot.slane %v451_v34, 4  ;;  %v7406_v50 = vadd.s32 56, %v7209_v7  ;;  %v7852_v21 = vld [vmem:[%s10371_s0 + $0x18] sm:$0xf] }
  0x18   :  { %6257 = vmatprep.subr.bf16.mxu0 %v10427_v1  ;;  %6309 = vmatprep.subr.bf16.mxu1 %v10427_v1  ;;  %vm7385_vm5 = vcmp.ne.s16.totalorder %v440_v27, 0  ;;  %v457_v35 = vshll.u32 %v391_v25, 16  ;;  %v461_v36 = vshrl.u32 %v391_v25, 16  ;;  %v691_v40 = vshrl.u32 %v5419_v29, 16 }
  0x19   :  { %v10547_v31 = vsel %vm7385_vm5, 4294967295, %v10546_v31  ;;  %v608_v38 = vsel %vm7385_vm5, %v7355_v5, 0  ;;  %v694_v41 = vshll.u32 %v5419_v29, 16  ;;  %v454_v55 = vor.u32 %v453_v44, %v449_v30 }
  0x1a   :  { %10548 = vst [vmem:[#allocation6_spill] sm:$0xff] %v10547_v31  ;;  %v5420_v43 = vcombine.low %v607_v28, %v608_v38  ;;  %v459_v45 = vrot.slane %v457_v35, 5  ;;  %v10402_v57 = vand.u32 7, %v7346_v2  ;;  %v5438_v59 = vcombine.low %v7355_v5, %v300_v32  ;;  %v6993_v5 = vld [vmem:[%s10370_s1 + $0xb8] sm:$0xff]   ;;  %v7000_v35 = vld [vmem:[%s10370_s1 + $0xe8] sm:$0xff]  }
  0x1b   :  { %6258 = vmatpush3.bf16.msra.mxu0 %v6988_v42  ;;  %6310 = vmatpush3.bf16.msra.mxu1 %v6989_v47  ;;  %v450_v42 = vsel %vm7334_vm12, %v445_v26, %v449_v30  ;;  %v693_v47 = vrot.slane %v691_v40, 3  ;;  %v696_v48 = vrot.slane %v694_v41, 4  ;;  %v10401_v61 = vand.u32 7, %v7406_v50 }
  0x1c   :  { %6259 = vmatprep.subr.bf16.mxu0 %v10427_v1  ;;  %6311 = vmatprep.subr.bf16.mxu1 %v10427_v1  ;;  %vm7399_vm6 = vcmp.ne.s16.totalorder %v450_v42, 0  ;;  %v699_v51 = vshrl.u32 %v5420_v43, 16  ;;  %v702_v52 = vshll.u32 %v5420_v43, 16  ;;  %v463_v62 = vrot.slane %v461_v36, 4  ;;  %v6996_v42 = vld [vmem:[%s10370_s1 + $0xb0] sm:$0xff]  }
  0x1d   :  { %v10550_v46 = vsel %vm7399_vm6, 4294967295, %v10549_v46  ;;  %v609_v49 = vsel %vm7399_vm6, %v300_v32, 0  ;;  %v697_v58 = vor.u32 %v696_v48, %v693_v47  ;;  %vm267_vm7 = vcmp.gt.s32.totalorder %v10402_v57, 0 }
  0x1e   :  { %10551 = vst [vmem:[#allocation7_spill] sm:$0xff] %v10550_v46  ;;  %v701_v63 = vrot.slane %v699_v51, 3  ;;  %vm268_vm8 = vcmp.gt.s32.totalorder %v10401_v61, 0  ;;  %vm374_vm9 = vmpackc.low %vm267_vm7, %vm267_vm7  ;;  %v464_v8 = vor.u32 %v463_v62, %v459_v45  ;;  %v7437_v13 = vadd.s32 64, %v7209_v7 }
  0x1f   :  { %6260 = vmatpush3.bf16.msra.mxu0 %v6990_v53  ;;  %6312 = vmatpush3.bf16.msra.mxu1 %v6991_v4  ;;  %v7413_v53 = vld [vmem:[%s10371_s0 + $0x18] sm:$0xf]  ;;  %v455_v4 = vrot.slane %v454_v55, 4  ;;  %vm375_vm10 = vmpackc.low %vm268_vm8, %vm268_vm8  ;;  %v392_v22 = vsel %vm374_vm9, 65537, %v10406_v3  ;;  %v10552_v25 = vmov 0  ;;  %v7469_v47 = vadd.s32 80, %v7209_v7 }
  0x20   :  { %6349 = vmatprep.subr.bf16.mxu0 %v10427_v1  ;;  %6401 = vmatprep.subr.bf16.mxu1 %v10427_v1  ;;  %v5439_v9 = vcombine.low %v7413_v53, %v7427_v6  ;;  %v393_v26 = vsel %vm375_vm10, 65537, %v10406_v3  ;;  %v465_v27 = vrot.slane %v464_v8, 4  ;;  %v467_v28 = vshll.u32 %v392_v22, 16 }
  0x21   :  { %v460_v20 = vsel %vm7334_vm12, %v455_v4, %v459_v45  ;;  %v471_v32 = vshrl.u32 %v392_v22, 16  ;;  %v477_v34 = vshll.u32 %v393_v26, 16  ;;  %v481_v40 = vshrl.u32 %v393_v26, 16  ;;  %v7495_v4 = vld [vmem:[%s10371_s0 + $0x20] sm:$0xf] }
  0x22   :  { %6314 = vmatmul.mubr.bf16.vlgmr.msra.gmra.mxu1 %v5437_v0  ;;  %v704_v0 = vrot.slane %v702_v52, 4  ;;  %vm7447_vm13 = vcmp.ne.s16.totalorder %v460_v20, 0  ;;  %v469_v38 = vrot.slane %v467_v28, 5  ;;  %v10400_v41 = vand.u32 7, %v7437_v13  ;;  %v7507_v28 = vld [vmem:[%s10371_s0 + $0x24] sm:$0xf] }
  0x23   :  { %6402 = vmatpush3.bf16.msra.mxu1 %v6994_v23  ;;  %6317 = vmatprep.mubr.msk.bf16.mxu1 %vm10378_vm0, %v10427_v1  ;;  %v7445_v23 = vadd.s32 72, %v7209_v7  ;;  %v10553_v25 = vsel %vm7447_vm13, 4294967295, %v10552_v25  ;;  %v610_v30 = vsel %vm7447_vm13, %v7413_v53, 0  ;;  %v473_v43 = vrot.slane %v471_v32, 4  ;;  %v7002_v53 = vld [vmem:[%s10370_s1 + $0xa0] sm:$0xff]  }
  0x24   :  { %6403 = vmatprep.subr.bf16.mxu1 %v10427_v1  ;;  %v7439_v15 = vor.u32 %v704_v0, %v701_v63  ;;  %10554 = vst [vmem:[#allocation8_spill] sm:$0xff] %v10553_v25  ;;  %v5421_v36 = vcombine.low %v609_v49, %v610_v30  ;;  %v479_v44 = vrot.slane %v477_v34, 5  ;;  %v470_v51 = vsel %vm7334_vm12, %v465_v27, %v469_v38  ;;  %v6999_v27 = vld [vmem:[%s10370_s1 + $0xa8] sm:$0xff]  }
  0x25   :  { %v10394_v45 = vand.u32 7, %v7445_v23  ;;  %vm269_vm14 = vcmp.gt.s32.totalorder %v10400_v41, 0  ;;  %v474_v52 = vor.u32 %v473_v43, %v469_v38  ;;  %vm7478_vm15 = vcmp.ne.s16.totalorder %v470_v51, 0 }
  0x26   :  { %v706_v29 = vsel %vm10382_vm4, %v697_v58, %v7439_v15  ;;  %v708_v48 = vshrl.u32 %v5421_v36, 16  ;;  %v711_v49 = vshll.u32 %v5421_v36, 16  ;;  %v10555_v55 = vmov 0  ;;  %vm376_vm7 = vmpackc.low %vm269_vm14, %vm269_vm14  ;;  %v7003_v58 = vld [vmem:[%s10370_s1 + $0xe0] sm:$0xff]  }
  0x27   :  { %6404 = vmatpush3.bf16.msra.mxu1 %v6997_v56  ;;  %6262 = vmatmul.mubr.bf16.vlgmr.msra.gmra.mxu0 %v706_v29  ;;  %v10556_v55 = vsel %vm7478_vm15, 4294967295, %v10555_v55  ;;  %vm270_vm2 = vcmp.gt.s32.totalorder %v10394_v45, 0  ;;  %v483_v56 = vrot.slane %v481_v40, 4  ;;  %v611_v63 = vsel %vm7478_vm15, %v7427_v6, 0  ;;  %v7006_v40 = vld [vmem:[%s10370_s1 + $0xd8] sm:$0xff]  }
  0x28   :  { %6405 = vmatprep.subr.bf16.mxu1 %v10427_v1  ;;  %6350 = vmatpush3.bf16.msra.mxu0 %v6993_v5  ;;  %10557 = vst [vmem:[#allocation9_spill] sm:$0xff] %v10556_v55  ;;  %v713_v62 = vrot.slane %v711_v49, 4  ;;  %vm377_vm8 = vmpackc.low %vm270_vm2, %vm270_vm2  ;;  %v394_v0 = vsel %vm376_vm7, 65537, %v10406_v3  ;;  %v475_v5 = vrot.slane %v474_v52, 4  ;;  %v7512_v38 = vadd.s32 88, %v7209_v7 }
  0x29   :  { %6265 = vmatprep.mubr.msk.bf16.mxu0 %vm10378_vm0, %v10427_v1  ;;  %6351 = vmatprep.subr.bf16.mxu0 %v10427_v1  ;;  %v395_v8 = vsel %vm377_vm8, 65537, %v10406_v3  ;;  %v484_v20 = vor.u32 %v483_v56, %v479_v44  ;;  %v487_v22 = vshll.u32 %v394_v0, 16  ;;  %v491_v29 = vshrl.u32 %v394_v0, 16  ;;  %v7545_v52 = vld [vmem:[%s10371_s0 + $0x28] sm:$0xf] }
  0x2a   :  { %6318 = vmatmul.mubr.bf16.gmra.mxu1 %v5438_v59  ;;  %v710_v59 = vrot.slane %v708_v48, 3  ;;  %v497_v30 = vshll.u32 %v395_v8, 16  ;;  %v501_v32 = vshrl.u32 %v395_v8, 16  ;;  %v480_v34 = vsel %vm7334_vm12, %v475_v5, %v479_v44  ;;  %v7010_v8 = vld [vmem:[%s10370_s1 + $0xd0] sm:$0xff]   ;;  %v7013_v5 = vld [vmem:[%s10370_s1 + $0xc8] sm:$0xff]  }
  0x2b   :  { %6321 = vmatprep.mubr.msk.bf16.mxu1 %vm10378_vm0, %v10427_v1  ;;  %6406 = vmatpush3.bf16.msra.mxu1 %v7000_v35  ;;  %v485_v35 = vrot.slane %v484_v20, 4  ;;  %v489_v36 = vrot.slane %v487_v22, 5  ;;  %vm7520_vm9 = vcmp.ne.s16.totalorder %v480_v34, 0  ;;  %v10558_v43 = vmov 0 }
  0x2c   :  { %6407 = vmatprep.subr.bf16.mxu1 %v10427_v1  ;;  %6352 = vmatpush3.bf16.msra.mxu0 %v6996_v42  ;;  %v7498_v26 = vor.u32 %v713_v62, %v710_v59  ;;  %v10559_v43 = vsel %vm7520_vm9, 4294967295, %v10558_v43  ;;  %v493_v44 = vrot.slane %v491_v29, 4  ;;  %v499_v48 = vrot.slane %v497_v30, 5  ;;  %v7554_v59 = vld [vmem:[%s10371_s0 + $0x2c] sm:$0xf] }
  0x2d   :  { %6353 = vmatprep.subr.bf16.mxu0 %v10427_v1  ;;  %10560 = vst [vmem:[#allocation10_spill] sm:$0xff] %v10559_v43  ;;  %v612_v49 = vsel %vm7520_vm9, %v7495_v4, 0  ;;  %v10390_v6 = vand.u32 7, %v7469_v47  ;;  %v503_v62 = vrot.slane %v501_v32, 4  ;;  %v5440_v0 = vcombine.low %v7495_v4, %v7507_v28 }
  0x2e   :  { %v715_v42 = vsel %vm10382_vm4, %v7439_v15, %v7498_v26  ;;  %v490_v15 = vsel %vm7334_vm12, %v485_v35, %v489_v36  ;;  %v5422_v51 = vcombine.low %v611_v63, %v612_v49  ;;  %v494_v56 = vor.u32 %v493_v44, %v489_v36 }
  0x2f   :  { %6408 = vmatpush3.bf16.msra.mxu1 %v7003_v58  ;;  %6266 = vmatmul.mubr.bf16.gmra.mxu0 %v715_v42  ;;  %vm7547_vm10 = vcmp.ne.s16.totalorder %v490_v15, 0  ;;  %v10561_v58 = vmov 0  ;;  %vm271_vm14 = vcmp.gt.s32.totalorder %v10390_v6, 0  ;;  %v504_v4 = vor.u32 %v503_v62, %v499_v48  ;;  %v7005_v42 = vld [vmem:[%s10370_s1 + $0x98] sm:$0xff]  }
  0x30   :  { %6409 = vmatprep.subr.bf16.mxu1 %v10427_v1  ;;  %6269 = vmatprep.mubr.msk.bf16.mxu0 %vm10378_vm0, %v10427_v1  ;;  %v10562_v58 = vsel %vm7547_vm10, 4294967295, %v10561_v58  ;;  %v613_v63 = vsel %vm7547_vm10, %v7507_v28, 0  ;;  %v717_v20 = vshrl.u32 %v5422_v51, 16  ;;  %v720_v22 = vshll.u32 %v5422_v51, 16  ;;  %vm378_vm7 = vmpackc.low %vm271_vm14, %vm271_vm14 }
  0x31   :  { %6354 = vmatpush3.bf16.msra.mxu0 %v6999_v27  ;;  %v495_v27 = vrot.slane %v494_v56, 4  ;;  %v396_v28 = vsel %vm378_vm7, 65537, %v10406_v3  ;;  %v5441_v29 = vcombine.low %v7545_v52, %v7554_v59  ;;  %v7581_v30 = vadd.s32 96, %v7209_v7 }
  0x32   :  { %6322 = vmatmul.mubr.bf16.gmra.mxu1 %v5439_v9  ;;  %v10388_v9 = vand.u32 7, %v7512_v38  ;;  %6355 = vmatprep.subr.bf16.mxu0 %v10427_v1  ;;  %v7584_v32 = vadd.s32 104, %v7209_v7  ;;  %v719_v34 = vrot.slane %v717_v20, 3  ;;  %v722_v35 = vrot.slane %v720_v22, 4 }
  0x33   :  { %6325 = vmatprep.mubr.msk.bf16.mxu1 %vm10378_vm0, %v10427_v1  ;;  %6410 = vmatpush3.bf16.msra.mxu1 %v7006_v40  ;;  %v500_v36 = vsel %vm7334_vm12, %v495_v27, %v499_v48  ;;  %v10565_v44 = vmov 0  ;;  %v505_v49 = vrot.slane %v504_v4, 4  ;;  %v507_v15 = vshll.u32 %v396_v28, 16 }
  0x34   :  { %vm7566_vm2 = vcmp.gt.s32.totalorder %v10388_v9, 0  ;;  %6411 = vmatprep.subr.bf16.mxu1 %v10427_v1  ;;  %vm7592_vm14 = vcmp.ne.s16.totalorder %v500_v36, 0  ;;  %v511_v51 = vshrl.u32 %v396_v28, 16  ;;  %v723_v56 = vor.u32 %v722_v35, %v719_v34  ;;  %v7008_v35 = vld [vmem:[%s10370_s1 + $0x90] sm:$0xff]  }
  0x35   :  { %vm379_vm8 = vmpackc.low %vm7566_vm2, %vm7566_vm2  ;;  %6356 = vmatpush3.bf16.msra.mxu0 %v7002_v53  ;;  %v10566_v44 = vsel %vm7592_vm14, 4294967295, %v10565_v44  ;;  %v614_v48 = vsel %vm7592_vm14, %v7545_v52, 0  ;;  %v509_v22 = vrot.slane %v507_v15, 5  ;;  %v10381_v27 = vand.u32 7, %v7581_v30 }
  0x36   :  { %v397_v40 = vsel %vm379_vm8, 65537, %v10406_v3  ;;  %6357 = vmatprep.subr.bf16.mxu0 %v10427_v1  ;;  %v5423_v20 = vcombine.low %v613_v63, %v614_v48  ;;  %v724_v4 = vsel %vm10382_vm4, %v7498_v26, %v723_v56  ;;  %v10380_v28 = vand.u32 7, %v7584_v32  ;;  %v7621_v26 = vld [vmem:[%s10371_s0 + $0x30] sm:$0xf] }
  0x37   :  { %6412 = vmatpush3.bf16.msra.mxu1 %v7010_v8  ;;  %v517_v53 = vshll.u32 %v397_v40, 16  ;;  %v521_v62 = vshrl.u32 %v397_v40, 16  ;;  %v513_v8 = vrot.slane %v511_v51, 4  ;;  %6270 = vmatmul.mubr.bf16.gmra.mxu0 %v724_v4  ;;  %v510_v40 = vsel %vm7334_vm12, %v505_v49, %v509_v22 }
  0x38   :  { %6413 = vmatprep.subr.bf16.mxu1 %v10427_v1  ;;  %v726_v63 = vshrl.u32 %v5423_v20, 16  ;;  %v729_v36 = vshll.u32 %v5423_v20, 16  ;;  %6273 = vmatprep.mubr.msk.bf16.mxu0 %vm10378_vm0, %v10427_v1  ;;  %vm7623_vm2 = vcmp.ne.s16.totalorder %v510_v40, 0  ;;  %vm273_vm7 = vcmp.gt.s32.totalorder %v10381_v27, 0 }
  0x39   :  { %6358 = vmatpush3.bf16.msra.mxu0 %v7005_v42  ;;  %v523_v34 = vrot.slane %v521_v62, 4  ;;  %v514_v15 = vor.u32 %v513_v8, %v509_v22  ;;  %v10567_v42 = vmov 0  ;;  %vm7631_vm8 = vcmp.gt.s32.totalorder %v10380_v28, 0  ;;  %vm380_vm11 = vmpackc.low %vm273_vm7, %vm273_vm7  ;;  %v7016_v22 = vld [vmem:[%s10370_s1 + $0xc0] sm:$0xff]  }
  0x3a   :  { %6326 = vmatmul.mubr.bf16.gmra.mxu1 %v5440_v0  ;;  %v519_v0 = vrot.slane %v517_v53, 5  ;;  %6359 = vmatprep.subr.bf16.mxu0 %v10427_v1  ;;  %v10568_v42 = vsel %vm7623_vm2, 4294967295, %v10567_v42  ;;  %v728_v48 = vrot.slane %v726_v63, 3  ;;  %v731_v53 = vrot.slane %v729_v36, 4  ;;  %v7011_v63 = vld [vmem:[%s10370_s1 + $0x88] sm:$0xff]  }
  0x3b   :  { %6329 = vmatprep.mubr.msk.bf16.mxu1 %vm10378_vm0, %v10427_v1  ;;  %10569 = vst [vmem:[#allocation11_spill] sm:$0xff] %v10568_v42  ;;  %6414 = vmatpush3.bf16.msra.mxu1 %v7013_v5  ;;  %v515_v62 = vrot.slane %v514_v15, 4  ;;  %v615_v20 = vsel %vm7623_vm2, %v7554_v59, 0  ;;  %vm381_vm0 = vmpackc.low %vm7631_vm8, %vm7631_vm8  ;;  %v398_v5 = vsel %vm380_vm11, 65537, %v10406_v3  ;;  %v7647_v4 = vadd.s32 112, %v7209_v7 }
  0x3c   :  { %v524_v51 = vor.u32 %v523_v34, %v519_v0  ;;  %6415 = vmatprep.subr.bf16.mxu1 %v10427_v1  ;;  %v7650_v34 = vadd.s32 120, %v7209_v7  ;;  %v7655_v36 = vor.u32 %v731_v53, %v728_v48  ;;  %v399_v15 = vsel %vm381_vm0, 65537, %v10406_v3 }
  0x3d   :  { %6360 = vmatpush3.bf16.msra.mxu0 %v7008_v35  ;;  %v520_v40 = vsel %vm7334_vm12, %v515_v62, %v519_v0  ;;  %v527_v49 = vshll.u32 %v398_v5, 16  ;;  %v10572_v35 = vmov 0  ;;  %v537_v28 = vshll.u32 %v399_v15, 16  ;;  %v308_v62 = vld [vmem:[%s10371_s0 + $0x34] sm:$0xf] }
  0x3e   :  { %v525_v8 = vrot.slane %v524_v51, 4  ;;  %6361 = vmatprep.subr.bf16.mxu0 %v10427_v1  ;;  %vm7661_vm11 = vcmp.ne.s16.totalorder %v520_v40, 0  ;;  %v531_v51 = vshrl.u32 %v398_v5, 16  ;;  %v541_v48 = vshrl.u32 %v399_v15, 16  ;;  %v7015_v15 = vld [vmem:[%s10370_s1 + $0x80] sm:$0xff]  }
  0x3f   :  { %v10573_v35 = vsel %vm7661_vm11, 4294967295, %v10572_v35  ;;  %v733_v53 = vsel %vm10382_vm4, %v723_v56, %v7655_v36  ;;  %v616_v0 = vsel %vm7661_vm11, %v7621_v26, 0  ;;  %vm10575_vm0 = vmmov 0   ;;  %6416 = vmatpush3.bf16.msra.mxu1 %v7016_v22 }
  0x40   :  { %10574 = vst [vmem:[#allocation12_spill] sm:$0xff] %v10573_v35  ;;  %v529_v40 = vrot.slane %v527_v49, 5  ;;  %v10385_v52 = vand.u32 7, %v7647_v4  ;;  %v5424_v59 = vcombine.low %v615_v20, %v616_v0  ;;  %v5442_v5 = vcombine.low %v7621_v26, %v308_v62  ;;  %6505 = vmatprep.subr.bf16.mxu1 %v10427_v1  ;;  %6274 = vmatmul.mubr.bf16.gmra.mxu0 %v733_v53 }
  0x41   :  { %v10389_v56 = vand.u32 7, %v7650_v34  ;;  %6362 = vmatpush3.bf16.msra.mxu0 %v7011_v63  ;;  %v539_v27 = vrot.slane %v537_v28, 5  ;;  %v543_v20 = vrot.slane %v541_v48, 4  ;;  %6277 = vmatprep.mubr.msk.bf16.mxu0 %vm10575_vm0, %v10427_v1  ;;  %v7706_v9 = vadd.s32 128, %v7209_v7 }
  0x42   :  { %6330 = vmatmul.mubr.bf16.gmra.mxu1 %v5441_v29  ;;  %v533_v29 = vrot.slane %v531_v51, 4  ;;  %v530_v49 = vsel %vm7334_vm12, %v525_v8, %v529_v40  ;;  %vm275_vm7 = vcmp.gt.s32.totalorder %v10385_v52, 0  ;;  %6363 = vmatprep.subr.bf16.mxu0 %v10427_v1  ;;  %v735_v26 = vshrl.u32 %v5424_v59, 16 }
  0x43   :  { %6333 = vmatprep.mubr.msk.bf16.mxu1 %vm10575_vm0, %v10427_v1  ;;  %v738_v22 = vshll.u32 %v5424_v59, 16  ;;  %vm7692_vm8 = vcmp.ne.s16.totalorder %v530_v49, 0  ;;  %v10576_v51 = vmov 0  ;;  %vm382_vm4 = vmpackc.low %vm275_vm7, %vm275_vm7  ;;  %vm276_vm11 = vcmp.gt.s32.totalorder %v10389_v56, 0 }
  0x44   :  { %v534_v63 = vor.u32 %v533_v29, %v529_v40  ;;  %v10577_v51 = vsel %vm7692_vm8, 4294967295, %v10576_v51  ;;  %v617_v28 = vsel %vm7692_vm8, %v308_v62, 0  ;;  %v400_v8 = vsel %vm382_vm4, 65537, %v10406_v3  ;;  %vm383_vm2 = vmpackc.low %vm276_vm11, %vm276_vm11  ;;  %v309_v40 = vld [vmem:[%s10371_s0 + $0x38] sm:$0xf] }
  0x45   :  { %10578 = vst [vmem:[#allocation13_spill] sm:$0xff] %v10577_v51  ;;  %v544_v48 = vor.u32 %v543_v20, %v539_v27  ;;  %v737_v53 = vrot.slane %v735_v26, 3  ;;  %v740_v0 = vrot.slane %v738_v22, 4  ;;  %v547_v59 = vshll.u32 %v400_v8, 16  ;;  %6364 = vmatpush3.bf16.msra.mxu0 %v7015_v15 }
  0x46   :  { %v535_v52 = vrot.slane %v534_v63, 4  ;;  %v401_v29 = vsel %vm383_vm2, 65537, %v10406_v3  ;;  %v551_v62 = vshrl.u32 %v400_v8, 16  ;;  %6453 = vmatprep.subr.bf16.mxu0 %v10427_v1  ;;  %v10579_v63 = vmov 0  ;;  %v310_v8 = vld [vmem:[%s10371_s0 + $0x3c] sm:$0xf] }
  0x47   :  { %v545_v49 = vrot.slane %v544_v48, 4  ;;  %v741_v20 = vor.u32 %v740_v0, %v737_v53  ;;  %v549_v22 = vrot.slane %v547_v59, 5  ;;  %v557_v15 = vshll.u32 %v401_v29, 16 }
  0x48   :  { %v540_v26 = vsel %vm7334_vm12, %v535_v52, %v539_v27  ;;  %v553_v48 = vrot.slane %v551_v62, 4  ;;  %v561_v56 = vshrl.u32 %v401_v29, 16  ;;  %v7721_v53 = vadd.s32 136, %v7209_v7  ;;  %v7732_v62 = vld [vmem:[%s10371_s0 + $0x40] sm:$0xf] }
  0x49   :  { %vm7711_vm4 = vcmp.ne.s16.totalorder %v540_v26, 0  ;;  %vm10583_vm2 = vsmask.f32 4352  ;;  %v559_v0 = vrot.slane %v557_v15, 5  ;;  %v10584_v26 = vmov 0 }
  0x4a   :  { %6334 = vmatmul.mubr.bf16.gmra.mxu1 %v5442_v5  ;;  %v10580_v63 = vsel %vm7711_vm4, 4294967295, %v10579_v63  ;;  %10582 = vst [vmem:[#allocation15_spill] sm:$0xff] %v7721_v53  ;;  %v742_v27 = vsel %vm10583_vm2, %v7655_v36, %v741_v20  ;;  %v618_v52 = vsel %vm7711_vm4, %v309_v40, 0  ;;  %v550_v5 = vsel %vm7334_vm12, %v545_v49, %v549_v22 }
  0x4b   :  { %10581 = vst [vmem:[#allocation14_spill] sm:$0xff] %v10580_v63  ;;  %6337 = vmatprep.mubr.msk.bf16.mxu1 %vm10575_vm0, %v10427_v1  ;;  %6278 = vmatmul.mubr.bf16.gmra.mxu0 %v742_v27  ;;  %v5425_v59 = vcombine.low %v617_v28, %v618_v52  ;;  %v554_v29 = vor.u32 %v553_v48, %v549_v22  ;;  %vm7734_vm11 = vcmp.ne.s16.totalorder %v550_v5, 0  ;;  %v10393_v36 = vand.u32 7, %v7706_v9  ;;  %v7745_v28 = vld [vmem:[%s10371_s0 + $0x44] sm:$0xf] }
  0x4c   :  { %v10585_v26 = vsel %vm7734_vm11, 4294967295, %v10584_v26  ;;  %6281 = vmatprep.mubr.msk.bf16.mxu0 %vm10575_vm0, %v10427_v1  ;;  %v5443_v6 = vcombine.low %v309_v40, %v310_v8  ;;  %v10399_v49 = vand.u32 7, %v7721_v53  ;;  %v563_v15 = vrot.slane %v561_v56, 4  ;;  %v7752_v52 = vld [vmem:[%s10371_s0 + $0x4] sm:$0xf] }
  0x4d   :  { %10586 = vst [vmem:[#allocation16_spill] sm:$0xff] %v10585_v26  ;;  %v744_v27 = vshrl.u32 %v5425_v59, 16  ;;  %v747_v22 = vshll.u32 %v5425_v59, 16  ;;  %v555_v48 = vrot.slane %v554_v29, 4  ;;  %vm277_vm7 = vcmp.gt.s32.totalorder %v10393_v36, 0 }
  0x4e   :  { %v619_v40 = vsel %vm7734_vm11, %v310_v8, 0  ;;  %vm278_vm2 = vcmp.gt.s32.totalorder %v10399_v49, 0  ;;  %vm384_vm4 = vmpackc.low %vm277_vm7, %vm277_vm7  ;;  %v564_v5 = vor.u32 %v563_v15, %v559_v0  ;;  %v5444_v56 = vcombine.low %v7732_v62, %v7745_v28  ;;  %v7763_v59 = vld [vmem:[%s10371_s0 + $0x8] sm:$0xf] }
  0x4f   :  { %v746_v29 = vrot.slane %v744_v27, 3  ;;  %v749_v36 = vrot.slane %v747_v22, 4  ;;  %v560_v45 = vsel %vm7334_vm12, %v555_v48, %v559_v0  ;;  %vm385_vm8 = vmpackc.low %vm278_vm2, %vm278_vm2  ;;  %v402_v8 = vsel %vm384_vm4, 65537, %v10406_v3  ;;  %v7776_v27 = vld [vmem:[%s10371_s0 + $0xc] sm:$0xf] }
  0x50   :  { %vm7768_vm11 = vcmp.ne.s16.totalorder %v560_v45, 0  ;;  %v10587_v49 = vmov 0  ;;  %v403_v15 = vsel %vm385_vm8, 65537, %v10406_v3  ;;  %v565_v41 = vrot.slane %v564_v5, 4  ;;  %v1408_v0 = vld [vmem:[%s10371_s0] sm:$0x8] }
  0x51   :  { %v10588_v49 = vsel %vm7768_vm11, 4294967295, %v10587_v49  ;;  %v567_v61 = vshll.u32 %v402_v8, 16  ;;  %v750_v22 = vor.u32 %v749_v36, %v746_v29  ;;  %v620_v45 = vsel %vm7768_vm11, %v7732_v62, 0  ;;  %v7796_v29 = vld [vmem:[%s10371_s0 + $0x10] sm:$0xf] }
  0x52   :  { %10589 = vst [vmem:[#allocation17_spill] sm:$0xff] %v10588_v49  ;;  %6338 = vmatmul.mubr.bf16.gmra.mxu1 %v5443_v6  ;;  %v571_v6 = vshrl.u32 %v402_v8, 16  ;;  %v577_v48 = vshll.u32 %v403_v15, 16  ;;  %v5426_v5 = vcombine.low %v619_v40, %v620_v45  ;;  %v581_v60 = vshrl.u32 %v403_v15, 16 }
  0x53   :  { %6341 = vmatprep.mubr.msk.bf16.mxu1 %vm10575_vm0, %v10427_v1  ;;  %v569_v57 = vrot.slane %v567_v61, 5  ;;  %v1410_v37 = vsel %vm7365_vm1, %v7752_v52, 0  ;;  %vm10590_vm8 = vsmask.f32 4352  ;;  %v1411_v62 = vsel %vm7369_vm3, %v7763_v59, 0 }
  0x54   :  { %v751_v18 = vsel %vm10590_vm8, %v741_v20, %v750_v22  ;;  %v573_v3 = vrot.slane %v571_v6, 4  ;;  %v579_v36 = vrot.slane %v577_v48, 5  ;;  %v7801_v61 = vld [vmem:[%s10371_s0 + $0x14] sm:$0xf]  ;;  %v753_v40 = vshrl.u32 %v5426_v5, 16  ;;  %vm10596_vm2 = vmmov %vm10590_vm8 }
  0x55   :  { %6282 = vmatmul.mubr.bf16.gmra.mxu0 %v751_v18  ;;  %v756_v8 = vshll.u32 %v5426_v5, 16  ;;  %v570_v20 = vsel %vm7334_vm12, %v565_v41, %v569_v57  ;;  %v583_v15 = vrot.slane %v581_v60, 4  ;;  %v10591_v6 = vmov 0  ;;  %v313_v60 = vld [vmem:[%s10371_s0 + $0x48] sm:$0xf] }
  0x56   :  { %6285 = vmatprep.mubr.msk.bf16.mxu0 %vm10575_vm0, %v10427_v1  ;;  %v574_v45 = vor.u32 %v573_v3, %v569_v57  ;;  %vm7807_vm4 = vcmp.ne.s16.totalorder %v570_v20, 0  ;;  %vm10594_vm7 = vcmp.ne.s16.totalorder %v7307_v39, 0  ;;  %v1412_v18 = vsel %vm7385_vm5, %v7776_v27, 0 }
  0x57   :  { %v10592_v6 = vsel %vm7807_vm4, 4294967295, %v10591_v6  ;;  %v1409_v48 = vsel %vm10594_vm7, %v1408_v0, 0  ;;  %v755_v5 = vrot.slane %v753_v40, 3  ;;  %v758_v17 = vrot.slane %v756_v8, 4  ;;  %v314_v0 = vld [vmem:[%s10371_s0 + $0x4c] sm:$0xf] }
  0x58   :  { %10593 = vst [vmem:[#allocation18_spill] sm:$0xff] %v10592_v6  ;;  %v584_v16 = vor.u32 %v583_v15, %v579_v36  ;;  %v575_v41 = vrot.slane %v574_v45, 4  ;;  %v621_v3 = vsel %vm7807_vm4, %v7745_v28, 0  ;;  %v5503_v57 = vcombine.low %v1409_v48, %v1410_v37 }
  0x59   :  { %v5504_v20 = vcombine.low %v1411_v62, %v1412_v18  ;;  %v759_v14 = vor.u32 %v758_v17, %v755_v5  ;;  %v1413_v8 = vsel %vm7399_vm6, %v7796_v29, 0  ;;  %v1414_v15 = vsel %vm7447_vm13, %v7801_v61, 0 }
  0x5a   :  { %6342 = vmatmul.mubr.bf16.gmra.mxu1 %v5444_v56  ;;  %v7825_v40 = vrot.slane %v584_v16, 4  ;;  %v580_v37 = vsel %vm7334_vm12, %v575_v41, %v579_v36  ;;  %v1494_v17 = vshrl.u32 %v5503_v57, 16  ;;  %v1497_v28 = vshll.u32 %v5503_v57, 16  ;;  %vm10600_vm12 = vmmov %vm10596_vm2 }
  0x5b   :  { %6345 = vmatprep.mubr.msk.bf16.mxu1 %vm10575_vm0, %v10427_v1  ;;  %v1502_v56 = vshrl.u32 %v5504_v20, 16  ;;  %v760_v16 = vsel %vm10596_vm2, %v750_v22, %v759_v14  ;;  %vm7838_vm8 = vcmp.ne.s16.totalorder %v580_v37, 0  ;;  %v10597_v62 = vmov 0 }
  0x5c   :  { %10595 = vst [vmem:[#allocation19_spill] sm:$0xff] %v7825_v40  ;;  %v10598_v62 = vsel %vm7838_vm8, 4294967295, %v10597_v62  ;;  %vm10420_vm7 = vcmp.ne.s16.totalorder %v7825_v40, 0  ;;  %v1505_v45 = vshll.u32 %v5504_v20, 16  ;;  %v622_v48 = vsel %vm7838_vm8, %v313_v60, 0 }
  0x5d   :  { %10599 = vst [vmem:[#allocation20_spill] sm:$0xff] %v10598_v62  ;;  %v623_v54 = vsel %vm10420_vm7, %v314_v0, 0  ;;  %v5445_v36 = vcombine.low %v313_v60, %v314_v0  ;;  %6286 = vmatmul.mubr.bf16.gmra.mxu0 %v760_v16  ;;  %v5427_v18 = vcombine.low %v621_v3, %v622_v48  ;;  %v1496_v41 = vrot.slane %v1494_v17, 3  ;;  %v7857_v60 = vld [vmem:[%s10371_s0 + $0x1c] sm:$0xf] }
  0x5e   :  { %v5428_v5 = vcombine.low %v623_v54, %v623_v54  ;;  %v1499_v57 = vrot.slane %v1497_v28, 4  ;;  %6289 = vmatprep.mubr.msk.bf16.mxu0 %vm10575_vm0, %v10427_v1  ;;  %v1504_v22 = vrot.slane %v1502_v56, 3  ;;  %v1507_v37 = vrot.slane %v1505_v45, 4 }
  0x5f   :  { %v5505_v25 = vcombine.low %v1413_v8, %v1414_v15  ;;  %v762_v46 = vshrl.u32 %v5427_v18, 16  ;;  %v765_v20 = vshll.u32 %v5427_v18, 16  ;;  %v1415_v56 = vsel %vm7478_vm15, %v7852_v21, 0 }
  0x60   :  { %v771_v53 = vshrl.u32 %v5428_v5, 16  ;;  %v774_v31 = vshll.u32 %v5428_v5, 16  ;;  %v1500_v17 = vor.u32 %v1499_v57, %v1496_v41  ;;  %v1508_v8 = vor.u32 %v1507_v37, %v1504_v22 }
  0x61   :  { %v764_v3 = vrot.slane %v762_v46, 3  ;;  %v767_v0 = vrot.slane %v765_v20, 4  ;;  %v1511_v15 = vshrl.u32 %v5505_v25, 16  ;;  %v1514_v28 = vshll.u32 %v5505_v25, 16  ;;  %v7872_v25 = vld [vmem:[%s10371_s0 + $0x20] sm:$0xf] }
  0x62   :  { %6346 = vmatmul.mubr.bf16.gmra.mxu1 %v5445_v36  ;;  %v773_v45 = vrot.slane %v771_v53, 3  ;;  %v776_v48 = vrot.slane %v774_v31, 4  ;;  %v1416_v46 = vsel %vm7520_vm9, %v7857_v60, 0  ;;  %v1509_v36 = vsel %vm10596_vm2, %v1500_v17, %v1508_v8  ;;  %v7877_v31 = vld [vmem:[%s10371_s0 + $0x24] sm:$0xf] }
  0x63   :  { %6417 = vmatprep.mubr.msk.bf16.mxu1 %vm10575_vm0, %v10427_v1  ;;  %v768_v16 = vor.u32 %v767_v0, %v764_v3  ;;  %v1513_v18 = vrot.slane %v1511_v15, 3  ;;  %v1516_v5 = vrot.slane %v1514_v28, 4  ;;  %v5506_v41 = vcombine.low %v1415_v56, %v1416_v46 }
  0x64   :  { %v1417_v53 = vsel %vm7547_vm10, %v7872_v25, 0  ;;  %v1418_v57 = vsel %vm7592_vm14, %v7877_v31, 0  ;;  %vm10604_vm7 = vsmask.f32 4352  ;;  %vm2829_vm14 = vsmask.f32 4368 }
  0x65   :  { %v769_v54 = vsel %vm10600_vm12, %v759_v14, %v768_v16  ;;  %v777_v14 = vor.u32 %v776_v48, %v773_v45  ;;  %v1517_v22 = vor.u32 %v1516_v5, %v1513_v18  ;;  %v1520_v37 = vshrl.u32 %v5506_v41, 16  ;;  %vm10601_vm12 = vmmov %vm10596_vm2  ;;  %v7896_v45 = vld [vmem:[%s10371_s0 + $0x28] sm:$0xf]  ;;  %v7901_v48 = vld [vmem:[%s10371_s0 + $0x2c] sm:$0xf] }
  0x66   :  { %6290 = vmatmul.mubr.bf16.gmra.mxu0 %v769_v54  ;;  %v1523_v20 = vshll.u32 %v5506_v41, 16  ;;  %v5507_v0 = vcombine.low %v1417_v53, %v1418_v57  ;;  %v7026_v41 = vld [vmem:[%s10372_s4 + $0x38] sm:$0xff]   ;;  %v7925_v53 = vld [vmem:[%s10371_s0 + $0x34] sm:$0xf]  ;;  %v10640_v49 = vand.u32 7, %v7437_v13 }
  0x67   :  { %6293 = vmatprep.mubr.msk.bf16.mxu0 %vm10575_vm0, %v10427_v1  ;;  %v778_v3 = vsel %vm10601_vm12, %v768_v16, %v777_v14  ;;  %v1518_v17 = vsel %vm10596_vm2, %v1508_v8, %v1517_v22  ;;  %v1522_v15 = vrot.slane %v1520_v37, 3  ;;  %v5470_v8 = vcombine.low %v7752_v52, %v7763_v59  ;;  %v7920_v14 = vld [vmem:[%s10371_s0 + $0x30] sm:$0xf] }
  0x68   :  { %v1525_v28 = vrot.slane %v1523_v20, 4  ;;  %v1529_v56 = vshrl.u32 %v5507_v0, 16  ;;  %v1532_v16 = vshll.u32 %v5507_v0, 16  ;;  %vm10602_vm12 = vnez %v10568_v42  ;;  %v7027_v57 = vld [vmem:[%s10372_s4 + $0x30] sm:$0xff]  }
  0x69   :  { %v1419_v54 = vsel %vm10602_vm12, %v7896_v45, 0  ;;  %vm10603_vm2 = vnez %v10573_v35  ;;  %vm10607_vm12 = vsmask.f32 4352  ;;  %v10672_v42 = vand.u32 7, %v7706_v9 }
  0x6a   :  { %6418 = vmatmul.mubr.bf16.vlgmr.msra.gmra.mxu1 %v1509_v36  ;;  %v1526_v46 = vor.u32 %v1525_v28, %v1522_v15  ;;  %v1420_v36 = vsel %vm10603_vm2, %v7901_v48, 0  ;;  %v1531_v18 = vrot.slane %v1529_v56, 3  ;;  %v1534_v5 = vrot.slane %v1532_v16, 4  ;;  %v7951_v16 = vld [vmem:[%s10371_s0 + $0x38] sm:$0xf] }
  0x6b   :  { %6421 = vmatprep.mubr.msk.bf16.mxu1 %vm10575_vm0, %v10427_v1  ;;  %v5508_v59 = vcombine.low %v1419_v54, %v1420_v36  ;;  %6506 = vmatpush3.bf16.msra.mxu1 %v7026_v41  ;;  %vm10606_vm2 = vnez %v10580_v63  ;;  %v5472_v54 = vcombine.low %v7801_v61, %v7852_v21  ;;  %v7977_v21 = vld [vmem:[%s10371_s0 + $0x40] sm:$0xf]  ;;  %v7982_v61 = vld [vmem:[%s10371_s0 + $0x44] sm:$0xf] }
  0x6c   :  { %v1527_v52 = vsel %vm10604_vm7, %v1517_v22, %v1526_v46  ;;  %6507 = vmatprep.subr.bf16.mxu1 %v10427_v1  ;;  %v5471_v22 = vcombine.low %v7776_v27, %v7796_v29  ;;  %v1535_v37 = vor.u32 %v1534_v5, %v1531_v18  ;;  %vm10605_vm7 = vnez %v10577_v51  ;;  %v7028_v27 = vld [vmem:[%s10372_s4 + $0x28] sm:$0xff]   ;;  %v2737_v63 = vld [vmem:[#allocation2 + $0x4] sm:$0xf] }
  0x6d   :  { %v1538_v20 = vshrl.u32 %v5508_v59, 16  ;;  %v1421_v0 = vsel %vm10605_vm7, %v7920_v14, 0 }
  0x6e   :  { %6294 = vmatmul.mubr.bf16.gmra.mxu0 %v778_v3  ;;  %v1541_v3 = vshll.u32 %v5508_v59, 16  ;;  %v1536_v29 = vsel %vm10607_vm12, %v1526_v46, %v1535_v37  ;;  %v7029_v46 = vld [vmem:[%s10372_s4 + $0x20] sm:$0xff]   ;;  %vm10608_vm12 = vnez %v10585_v26  ;;  %v7030_v59 = vld [vmem:[%s10372_s4 + $0x18] sm:$0xff]  }
  0x6f   :  { %6365 = vmatprep.mubr.msk.bf16.mxu0 %vm10575_vm0, %v10427_v1  ;;  %6508 = vmatpush3.bf16.msra.mxu1 %v7027_v57  ;;  %v1540_v15 = vrot.slane %v1538_v20, 3  ;;  %v1423_v36 = vsel %vm10608_vm12, %v7951_v16, 0  ;;  %vm10610_vm12 = vcmp.ne.s16.totalorder %v7825_v40, 0 }
  0x70   :  { %6509 = vmatprep.subr.bf16.mxu1 %v10427_v1  ;;  %v1543_v28 = vrot.slane %v1541_v3, 4 }
  0x72   :  { %6422 = vmatmul.mubr.bf16.gmra.mxu1 %v1518_v17  ;;  %v1422_v17 = vsel %vm10606_vm2, %v7925_v53, 0  ;;  %v1544_v18 = vor.u32 %v1543_v28, %v1540_v15  ;;  %v5473_v28 = vcombine.low %v7857_v60, %v7872_v25 }
  0x73   :  { %6425 = vmatprep.mubr.msk.bf16.mxu1 %vm10575_vm0, %v10427_v1  ;;  %v5509_v56 = vcombine.low %v1421_v0, %v1422_v17  ;;  %6510 = vmatpush3.bf16.msra.mxu1 %v7028_v27  ;;  %v1425_v17 = vsel %vm7807_vm4, %v7977_v21, 0  ;;  %v1426_v27 = vsel %vm7838_vm8, %v7982_v61, 0 }
  0x74   :  { %6511 = vmatprep.subr.bf16.mxu1 %v10427_v1 }
  0x75   :  { %v1547_v5 = vshrl.u32 %v5509_v56, 16  ;;  %v1550_v41 = vshll.u32 %v5509_v56, 16 }
  0x76   :  { %6366 = vmatmul.mubr.bf16.vlgmr.msra.gmra.mxu0 %v5470_v8  ;;  %v7958_v8 = vld [vmem:[%s10371_s0 + $0x3c] sm:$0xf] }
  0x77   :  { %6369 = vmatprep.mubr.msk.bf16.mxu0 %vm10575_vm0, %v10427_v1  ;;  %6512 = vmatpush3.bf16.msra.mxu1 %v7029_v46  ;;  %v1549_v3 = vrot.slane %v1547_v5, 3  ;;  %v1552_v0 = vrot.slane %v1550_v41, 4  ;;  %v7032_v5 = vld [vmem:[%s10372_s4 + $0x8] sm:$0xff]  }
  0x78   :  { %6513 = vmatprep.subr.bf16.mxu1 %v10427_v1 }
  0x79   :  { %v1553_v56 = vor.u32 %v1552_v0, %v1549_v3  ;;  %v7034_v0 = vld [vmem:[%s10372_s4] sm:$0xff]  }
  0x7a   :  { %6426 = vmatmul.mubr.bf16.gmra.mxu1 %v1527_v52  ;;  %v1424_v52 = vsel %vm7768_vm11, %v7958_v8, 0  ;;  %vm10609_vm11 = vsmask.f32 4352 }
  0x7b   :  { %6429 = vmatprep.mubr.msk.bf16.mxu1 %vm10575_vm0, %v10427_v1  ;;  %v5510_v57 = vcombine.low %v1423_v36, %v1424_v52  ;;  %v1545_v20 = vsel %vm10609_vm11, %v1535_v37, %v1544_v18  ;;  %6514 = vmatpush3.bf16.msra.mxu1 %v7030_v59  ;;  %v7031_v37 = vld [vmem:[%s10372_s4 + $0x10] sm:$0xff]   ;;  %v1554_v52 = vsel %vm10609_vm11, %v1544_v18, %v1553_v56 }
  0x7c   :  { %6515 = vmatprep.subr.bf16.mxu1 %v10427_v1  ;;  %v5474_v18 = vcombine.low %v7877_v31, %v7896_v45  ;;  %v5475_v31 = vcombine.low %v7901_v48, %v7920_v14  ;;  %v5476_v48 = vcombine.low %v7925_v53, %v7951_v16  ;;  %v5477_v53 = vcombine.low %v7958_v8, %v7977_v21  ;;  %v7035_v16 = vld [vmem:[%s10371_s0 + $0x8] sm:$0xff]   ;;  %v7037_v21 = vld [vmem:[%s10371_s0 + $0x10] sm:$0xff]  }
  0x7d   :  { %v1556_v15 = vshrl.u32 %v5510_v57, 16  ;;  %v1559_v46 = vshll.u32 %v5510_v57, 16 }
  0x7e   :  { %6370 = vmatmul.mubr.bf16.gmra.mxu0 %v5471_v22  ;;  %v7991_v22 = vld [vmem:[%s10371_s0 + $0x48] sm:$0xf] }
  0x7f   :  { %6373 = vmatprep.mubr.msk.bf16.mxu0 %vm10575_vm0, %v10427_v1  ;;  %6516 = vmatpush3.bf16.msra.mxu1 %v7031_v37  ;;  %v1558_v41 = vrot.slane %v1556_v15, 3  ;;  %v1561_v59 = vrot.slane %v1559_v46, 4  ;;  %v7036_v15 = vld [vmem:[%s10373_s3 + $0x30] sm:$0xff]   ;;  %v5478_v8 = vcombine.low %v7982_v61, %v7991_v22  ;;  %v7039_v61 = vld [vmem:[%s10371_s0 + $0x18] sm:$0xff]  }
  0x80   :  { %6517 = vmatprep.subr.bf16.mxu1 %v10427_v1 }
  0x82   :  { %6430 = vmatmul.mubr.bf16.gmra.mxu1 %v1536_v29  ;;  %v1427_v29 = vsel %vm10610_vm12, %v7991_v22, 0  ;;  %vm10611_vm12 = vmmov %vm10609_vm11  ;;  %v7046_v22 = vld [vmem:[%s10373_s3 + $0xb8] sm:$0xff]  }
  0x83   :  { %6433 = vmatprep.mubr.msk.bf16.mxu1 %vm10575_vm0, %v10427_v1  ;;  %v5512_v36 = vcombine.low %v1427_v29, %v1427_v29  ;;  %6518 = vmatpush3.bf16.msra.mxu1 %v7032_v5  ;;  %v7040_v5 = vld [vmem:[%s10373_s3 + $0x20] sm:$0xff]  }
  0x84   :  { %6519 = vmatprep.subr.bf16.mxu1 %v10427_v1 }
  0x85   :  { %v1574_v57 = vshrl.u32 %v5512_v36, 16  ;;  %v1577_v3 = vshll.u32 %v5512_v36, 16 }
  0x86   :  { %6374 = vmatmul.mubr.bf16.gmra.mxu0 %v5472_v54  ;;  %v5511_v54 = vcombine.low %v1425_v17, %v1426_v27  ;;  %v1562_v17 = vor.u32 %v1561_v59, %v1558_v41  ;;  %v7042_v41 = vld [vmem:[%s10373_s3 + $0x18] sm:$0xff]   ;;  %v7049_v59 = vld [vmem:[%s10373_s3 + $0xa8] sm:$0xff]  }
  0x87   :  { %6377 = vmatprep.mubr.msk.bf16.mxu0 %vm10575_vm0, %v10427_v1  ;;  %6520 = vmatpush3.bf16.msra.mxu1 %v7034_v0  ;;  %v1579_v46 = vrot.slane %v1577_v3, 4  ;;  %v7043_v3 = vld [vmem:[%s10371_s0 + $0x28] sm:$0xff]  }
  0x88   :  { %v1565_v60 = vshrl.u32 %v5511_v54, 16  ;;  %v1568_v25 = vshll.u32 %v5511_v54, 16  ;;  %6609 = vmatprep.subr.bf16.mxu1 %v10427_v1  ;;  %v1563_v37 = vsel %vm10611_vm12, %v1553_v56, %v1562_v17  ;;  %v7038_v54 = vld [vmem:[%s10373_s3 + $0x28] sm:$0xff]   ;;  %vm10612_vm12 = vmmov %vm10609_vm11 }
  0x89   :  { %v7050_v0 = vld [vmem:[%s10373_s3 + $0x8] sm:$0xff]  }
  0x8a   :  { %6434 = vmatmul.mubr.bf16.gmra.mxu1 %v1545_v20  ;;  %v7033_v20 = vld [vmem:[%s10373_s3 + $0x38] sm:$0xff]   ;;  %v1567_v27 = vrot.slane %v1565_v60, 3  ;;  %v1570_v29 = vrot.slane %v1568_v25, 4  ;;  %v7041_v60 = vld [vmem:[%s10371_s0 + $0x20] sm:$0xff]   ;;  %v7045_v25 = vld [vmem:[%s10373_s3 + $0x10] sm:$0xff]  }
  0x8b   :  { %6437 = vmatprep.mubr.msk.bf16.mxu1 %vm10575_vm0, %v10427_v1  ;;  %6454 = vmatpush3.bf16.msra.mxu0 %v7033_v20  ;;  %v7053_v20 = vld [vmem:[%s10373_s3 + $0x98] sm:$0xff]  }
  0x8c   :  { %6455 = vmatprep.subr.bf16.mxu0 %v10427_v1  ;;  %v1571_v45 = vor.u32 %v1570_v29, %v1567_v27  ;;  %v7057_v27 = vld [vmem:[%s10373_s3 + $0x88] sm:$0xff]   ;;  %v7044_v29 = vld [vmem:[%s10371_s0 + $0x30] sm:$0xff]  }
  0x8e   :  { %6378 = vmatmul.mubr.bf16.gmra.mxu0 %v5473_v28  ;;  %v1576_v28 = vrot.slane %v1574_v57, 3  ;;  %v1572_v56 = vsel %vm10609_vm11, %v1562_v17, %v1571_v45  ;;  %v7051_v57 = vld [vmem:[%s10373_s3 + $0xa0] sm:$0xff]  }
  0x8f   :  { %6381 = vmatprep.mubr.msk.bf16.mxu0 %vm10575_vm0, %v10427_v1  ;;  %6456 = vmatpush3.bf16.msra.mxu0 %v7036_v15  ;;  %v7054_v17 = vld [vmem:[%s10373_s3] sm:$0xff]  }
  0x90   :  { %6457 = vmatprep.subr.bf16.mxu0 %v10427_v1  ;;  %v1580_v14 = vor.u32 %v1579_v46, %v1576_v28  ;;  %v7052_v46 = vld [vmem:[%s10371_s0 + $0x40] sm:$0xff]  }
  0x92   :  { %6438 = vmatmul.mubr.bf16.gmra.mxu1 %v1554_v52  ;;  %v1581_v36 = vsel %vm10612_vm12, %v1571_v45, %v1580_v14  ;;  %v7047_v52 = vld [vmem:[%s10373_s3 + $0xb0] sm:$0xff]  }
  0x93   :  { %6441 = vmatprep.mubr.msk.bf16.mxu1 %vm10575_vm0, %v10427_v1  ;;  %6458 = vmatpush3.bf16.msra.mxu0 %v7038_v54 }
  0x94   :  { %6459 = vmatprep.subr.bf16.mxu0 %v10427_v1 }
  0x96   :  { %6382 = vmatmul.mubr.bf16.gmra.mxu0 %v5474_v18  ;;  %v7055_v18 = vld [vmem:[%s10373_s3 + $0x90] sm:$0xff]  }
  0x97   :  { %6385 = vmatprep.mubr.msk.bf16.mxu0 %vm10575_vm0, %v10427_v1  ;;  %6460 = vmatpush3.bf16.msra.mxu0 %v7040_v5 }
  0x98   :  { %6461 = vmatprep.subr.bf16.mxu0 %v10427_v1 }
  0x9a   :  { %6442 = vmatmul.mubr.bf16.gmra.mxu1 %v1563_v37  ;;  %v7059_v37 = vld [vmem:[%s10373_s3 + $0x80] sm:$0xff]  }
  0x9b   :  { %6445 = vmatprep.mubr.msk.bf16.mxu1 %vm10575_vm0, %v10427_v1  ;;  %6462 = vmatpush3.bf16.msra.mxu0 %v7042_v41 }
  0x9c   :  { %6463 = vmatprep.subr.bf16.mxu0 %v10427_v1 }
  0x9e   :  { %6386 = vmatmul.mubr.bf16.gmra.mxu0 %v5475_v31  ;;  %v7048_v31 = vld [vmem:[%s10371_s0 + $0x38] sm:$0xff]  }
  0x9f   :  { %6389 = vmatprep.mubr.msk.bf16.mxu0 %vm10575_vm0, %v10427_v1  ;;  %6464 = vmatpush3.bf16.msra.mxu0 %v7045_v25 }
  0xa0   :  { %6465 = vmatprep.subr.bf16.mxu0 %v10427_v1 }
  0xa2   :  { %6446 = vmatmul.mubr.bf16.gmra.mxu1 %v1572_v56 }
  0xa3   :  { %6449 = vmatprep.mubr.msk.bf16.mxu1 %vm10575_vm0, %v10427_v1  ;;  %6466 = vmatpush3.bf16.msra.mxu0 %v7050_v0 }
  0xa4   :  { %6467 = vmatprep.subr.bf16.mxu0 %v10427_v1 }
  0xa6   :  { %6390 = vmatmul.mubr.bf16.gmra.mxu0 %v5476_v48 }
  0xa7   :  { %6393 = vmatprep.mubr.msk.bf16.mxu0 %vm10575_vm0, %v10427_v1  ;;  %6468 = vmatpush3.bf16.msra.mxu0 %v7054_v17 }
  0xa8   :  { %6557 = vmatprep.subr.bf16.mxu0 %v10427_v1 }
  0xaa   :  { %6450 = vmatmul.mubr.bf16.gmra.mxu1 %v1581_v36 }
  0xab   :  { %6521 = vmatprep.mubr.msk.bf16.mxu1 %vm10575_vm0, %v10427_v1 }
  0xae   :  { %6394 = vmatmul.mubr.bf16.gmra.mxu0 %v5477_v53 }
  0xaf   :  { %6397 = vmatprep.mubr.msk.bf16.mxu0 %vm10575_vm0, %v10427_v1 }
  0xb2   :  { %6522 = vmatmul.mubr.bf16.vlgmr.msra.gmra.mxu1 %v7035_v16 }
  0xb3   :  { %6525 = vmatprep.mubr.msk.bf16.mxu1 %vm10575_vm0, %v10427_v1  ;;  %6610 = vmatpush3.bf16.msra.mxu1 %v7046_v22 }
  0xb4   :  { %6611 = vmatprep.subr.bf16.mxu1 %v10427_v1 }
  0xb6   :  { %6398 = vmatmul.mubr.bf16.gmra.mxu0 %v5478_v8  ;;  %v7056_v8 = vld [vmem:[%s10371_s0 + $0x48] sm:$0xff]  }
  0xb7   :  { %6469 = vmatprep.mubr.msk.bf16.mxu0 %vm10575_vm0, %v10427_v1  ;;  %6612 = vmatpush3.bf16.msra.mxu1 %v7047_v52 }
  0xb8   :  { %6613 = vmatprep.subr.bf16.mxu1 %v10427_v1 }
  0xba   :  { %6526 = vmatmul.mubr.bf16.gmra.mxu1 %v7037_v21 }
  0xbb   :  { %6529 = vmatprep.mubr.msk.bf16.mxu1 %vm10575_vm0, %v10427_v1  ;;  %6614 = vmatpush3.bf16.msra.mxu1 %v7049_v59 }
  0xbc   :  { %6615 = vmatprep.subr.bf16.mxu1 %v10427_v1 }
  0xbf   :  { %6616 = vmatpush3.bf16.msra.mxu1 %v7051_v57 }
  0xc0   :  { %6617 = vmatprep.subr.bf16.mxu1 %v10427_v1 }
  0xc2   :  { %6530 = vmatmul.mubr.bf16.gmra.mxu1 %v7039_v61 }
  0xc3   :  { %6533 = vmatprep.mubr.msk.bf16.mxu1 %vm10575_vm0, %v10427_v1  ;;  %6618 = vmatpush3.bf16.msra.mxu1 %v7053_v20 }
  0xc4   :  { %6619 = vmatprep.subr.bf16.mxu1 %v10427_v1 }
  0xc7   :  { %6620 = vmatpush3.bf16.msra.mxu1 %v7055_v18 }
  0xc8   :  { %6621 = vmatprep.subr.bf16.mxu1 %v10427_v1 }
  0xca   :  { %6534 = vmatmul.mubr.bf16.gmra.mxu1 %v7041_v60 }
  0xcb   :  { %6537 = vmatprep.mubr.msk.bf16.mxu1 %vm10575_vm0, %v10427_v1  ;;  %6622 = vmatpush3.bf16.msra.mxu1 %v7057_v27 }
  0xcc   :  { %6623 = vmatprep.subr.bf16.mxu1 %v10427_v1 }
  0xcf   :  { %6624 = vmatpush3.bf16.msra.mxu1 %v7059_v37 }
  0xd0   :  { %6713 = vmatprep.subr.bf16.mxu1 %v10427_v1 }
  0xd2   :  { %6538 = vmatmul.mubr.bf16.gmra.mxu1 %v7043_v3 }
  0xd3   :  { %6541 = vmatprep.mubr.msk.bf16.mxu1 %vm10575_vm0, %v10427_v1 }
  0xda   :  { %6542 = vmatmul.mubr.bf16.gmra.mxu1 %v7044_v29 }
  0xdb   :  { %6545 = vmatprep.mubr.msk.bf16.mxu1 %vm10575_vm0, %v10427_v1 }
  0xe2   :  { %v1077_v45 = vpop.f32.mrf.mxu1  ;;  %6546 = vmatmul.mubr.bf16.gmra.mxu1 %v7048_v31 }
  0xe3   :  { %6549 = vmatprep.mubr.msk.bf16.mxu1 %vm10575_vm0, %v10427_v1 }
  0xe4   :  { %v6315_v15 = vpop.f32.mrf.mxu1 }
  0xe6   :  { %v1080_v28 = vpop.f32.mrf.mxu1 }
  0xe7   :  { %v870_v48 = vpop.f32.mrf.mxu0 }
  0xe8   :  { %v6316_v56 = vpop.f32.mrf.mxu1  ;;  %v8158_v54 = vadd.f32 %v1077_v45, %v870_v48 }
  0xe9   :  { %v6263_v36 = vpop.f32.mrf.mxu0 }
  0xea   :  { %v1085_v14 = vpop.f32.mrf.mxu1  ;;  %6550 = vmatmul.mubr.bf16.gmra.mxu1 %v7052_v46 }
  0xeb   :  { %6553 = vmatprep.mubr.msk.bf16.mxu1 %vm10575_vm0, %v10427_v1  ;;  %v873_v16 = vpop.f32.mrf.mxu0 }
  0xec   :  { %v6319_v53 = vpop.f32.mrf.mxu1  ;;  %v8165_v21 = vadd.f32 %v1080_v28, %v873_v16 }
  0xed   :  { %v6264_v41 = vpop.f32.mrf.mxu0 }
  0xee   :  { %v1088_v5 = vpop.f32.mrf.mxu1 }
  0xef   :  { %v878_v52 = vpop.f32.mrf.mxu0 }
  0xf0   :  { %v6320_v61 = vpop.f32.mrf.mxu1  ;;  %v8169_v59 = vadd.f32 %v1085_v14, %v878_v52 }
  0xf1   :  { %v6267_v25 = vpop.f32.mrf.mxu0 }
  0xf2   :  { %v1093_v22 = vpop.f32.mrf.mxu1  ;;  %6554 = vmatmul.mubr.bf16.gmra.mxu1 %v7056_v8 }
  0xf3   :  { %6625 = vmatprep.mubr.msk.bf16.mxu1 %vm10575_vm0, %v10427_v1  ;;  %v881_v20 = vpop.f32.mrf.mxu0  ;;  %v10620_v1 = vand.u32 7, %v7268_v24 }
  0xf4   :  { %v6323_v60 = vpop.f32.mrf.mxu1  ;;  %v8171_v3 = vadd.f32 %v1088_v5, %v881_v20 }
  0xf5   :  { %v6268_v18 = vpop.f32.mrf.mxu0 }
  0xf6   :  { %v1096_v57 = vpop.f32.mrf.mxu1 }
  0xf7   :  { %v886_v29 = vpop.f32.mrf.mxu0 }
  0xf8   :  { %v6324_v0 = vpop.f32.mrf.mxu1  ;;  %v8173_v37 = vadd.f32 %v1093_v22, %v886_v29 }
  0xf9   :  { %v6271_v45 = vpop.f32.mrf.mxu0 }
  0xfa   :  { %v1101_v17 = vpop.f32.mrf.mxu1 }
  0xfb   :  { %v889_v28 = vpop.f32.mrf.mxu0 }
  0xfc   :  { %v6327_v27 = vpop.f32.mrf.mxu1  ;;  %v8175_v46 = vadd.f32 %v1096_v57, %v889_v28 }
  0xfd   :  { %v6272_v48 = vpop.f32.mrf.mxu0 }
  0xfe   :  { %v1104_v31 = vpop.f32.mrf.mxu1 }
 0x100   :  { %v6328_v15 = vpop.f32.mrf.mxu1  ;;  %v894_v36 = vpop.f32.mrf.mxu0 }
 0x101   :  { %v8177_v53 = vadd.f32 %v1101_v17, %v894_v36 }
 0x102   :  { %v1109_v56 = vpop.f32.mrf.mxu1  ;;  %v6275_v5 = vpop.f32.mrf.mxu0 }
 0x103   :  { %v10613_v5 = vand.u32 7, %v7209_v7  ;;  %v10616_v7 = vmov 0  }
 0x104   :  { %v6331_v14 = vpop.f32.mrf.mxu1  ;;  %v897_v41 = vpop.f32.mrf.mxu0 }
 0x105   :  { %v8179_v61 = vadd.f32 %v1104_v31, %v897_v41  ;;  %vm279_vm11 = vcmp.lt.s32.totalorder %v10613_v5, 7 }
 0x106   :  { %v1112_v16 = vpop.f32.mrf.mxu1  ;;  %v6276_v52 = vpop.f32.mrf.mxu0  ;;  %vm2792_vm4 = vmpackc.low %vm279_vm11, %vm279_vm11 }
 0x107   :  { %v10614_v52 = vand.u32 7, %v7220_v10 }
 0x108   :  { %v6332_v8 = vpop.f32.mrf.mxu1 }
 0x109   :  { %vm280_vm12 = vcmp.lt.s32.totalorder %v10614_v52, 7  ;;  %v1935_v52 = vld [vmem:[#allocation2] sm:$0x8] }
 0x10a   :  { %v1117_v22 = vpop.f32.mrf.mxu1  ;;  %vm2793_vm2 = vmpackc.low %vm280_vm12, %vm280_vm12 }
 0x10b   :  { %v902_v25 = vpop.f32.mrf.mxu0 }
 0x10c   :  { %v6335_v60 = vpop.f32.mrf.mxu1  ;;  %v8181_v20 = vadd.f32 %v1109_v56, %v902_v25  ;;  %v10615_v25 = vand.u32 7, %v7224_v11 }
 0x10d   :  { %v6279_v0 = vpop.f32.mrf.mxu0 }
 0x10e   :  { %v1120_v57 = vpop.f32.mrf.mxu1  ;;  %vm281_vm8 = vcmp.lt.s32.totalorder %v10615_v25, 7 }
 0x10f   :  { %v905_v27 = vpop.f32.mrf.mxu0  ;;  %vm2794_vm7 = vmpackc.low %vm281_vm8, %vm281_vm8 }
 0x110   :  { %v6336_v18 = vpop.f32.mrf.mxu1  ;;  %v8183_v29 = vadd.f32 %v1112_v16, %v905_v27  ;;  %v2810_v27 = vsel %vm2792_vm4, 65537, %v10616_v7  ;;  %vm8212_vm4 = vcmp.lt.s32.totalorder %v10620_v1, 7 }
 0x111   :  { %v6280_v45 = vpop.f32.mrf.mxu0  ;;  %v2835_v24 = vshll.u32 %v2810_v27, 16 }
 0x112   :  { %v1125_v17 = vpop.f32.mrf.mxu1 }
 0x114   :  { %v6339_v15 = vpop.f32.mrf.mxu1 }
 0x115   :  { %v910_v28 = vpop.f32.mrf.mxu0  ;;  %v2811_v15 = vsel %vm2793_vm2, 65537, %v10616_v7  ;;  %vm10623_vm2 = vcmp.ne.s16.totalorder %v7307_v39, 0 }
 0x116   :  { %v1128_v48 = vpop.f32.mrf.mxu1  ;;  %v8185_v14 = vadd.f32 %v1117_v22, %v910_v28 }
 0x117   :  { %v6283_v31 = vpop.f32.mrf.mxu0 }
 0x118   :  { %v6340_v36 = vpop.f32.mrf.mxu1  ;;  %v2812_v31 = vsel %vm2794_vm7, 65537, %v10616_v7 }
 0x119   :  { %v913_v56 = vpop.f32.mrf.mxu0  ;;  %v2832_v36 = vshrl.u32 %v2810_v27, 16 }
 0x11a   :  { %v1133_v8 = vpop.f32.mrf.mxu1  ;;  %v8189_v41 = vadd.f32 %v1120_v57, %v913_v56 }
 0x11b   :  { %v6284_v16 = vpop.f32.mrf.mxu0 }
 0x11c   :  { %v6343_v60 = vpop.f32.mrf.mxu1  ;;  %v1936_v16 = vld [vmem:[#allocation2 + $0x4] sm:$0xf] }
 0x11d   :  { %v918_v22 = vpop.f32.mrf.mxu0  ;;  %v10617_v60 = vand.u32 7, %v7227_v12  ;;  %v1955_v12 = vsel %vm7365_vm1, %v1936_v16, 0 }
 0x11e   :  { %v1136_v0 = vpop.f32.mrf.mxu1  ;;  %v8195_v18 = vadd.f32 %v1125_v17, %v918_v22  ;;  %v2840_v17 = vshrl.u32 %v2811_v15, 16  ;;  %v2849_v22 = vshrl.u32 %v2812_v31, 16 }
 0x11f   :  { %v6287_v45 = vpop.f32.mrf.mxu0  ;;  %vm8204_vm8 = vcmp.lt.s32.totalorder %v10617_v60, 7  ;;  %v10624_v60 = vand.u32 7, %v7298_v33 }
 0x120   :  { %v6344_v57 = vpop.f32.mrf.mxu1  ;;  %vm2795_vm11 = vmpackc.low %vm8204_vm8, %vm8204_vm8  ;;  %v2842_v62 = vrot.slane %v2840_v17, 7  ;;  %vm2828_vm8 = vsmask.f32 256 }
 0x121   :  { %v921_v10 = vpop.f32.mrf.mxu0  ;;  %v2834_v57 = vrot.slane %v2832_v36, 7  ;;  %vm8222_vm7 = vcmp.lt.s32.totalorder %v10624_v60, 7  ;;  %v2852_v60 = vshll.u32 %v2812_v31, 16  ;;  %v8248_v27 = vsel %vm2795_vm11, 65537, %v10616_v7 }
 0x122   :  { %v1141_v28 = vpop.f32.mrf.mxu1  ;;  %v8200_v11 = vadd.f32 %v1128_v48, %v921_v10  ;;  %vm2797_vm10 = vmpackc.low %vm8222_vm7, %vm8222_vm7 }
 0x123   :  { %v6288_v5 = vpop.f32.mrf.mxu0  ;;  %v2838_v17 = vrot.slane %v2834_v57, 4  ;;  %v8255_v48 = vor.u32 %v2835_v24, %v2834_v57  ;;  %v2815_v16 = vsel %vm2797_vm10, 65537, %v10616_v7  ;;  %v2858_v24 = vshrl.u32 %v8248_v27, 16 }
 0x124   :  { %v6347_v56 = vpop.f32.mrf.mxu1  ;;  %v1954_v5 = vsel %vm10623_vm2, %v1935_v52, 0  ;;  %v10628_v52 = vand.u32 7, %v7346_v2  ;;  %vm2796_vm2 = vmpackc.low %vm8212_vm4, %vm8212_vm4 }
 0x125   :  { %v2843_v56 = vshll.u32 %v2811_v15, 16  ;;  %v8237_v15 = vrot.slane %v2849_v22, 7  ;;  %v5540_v25 = vcombine.low %v1954_v5, %v1955_v12  ;;  %10632 = vst [vmem:[#allocation23_spill] sm:$0xff] %v8255_v48  ;;  %v2814_v5 = vsel %vm2796_vm2, 65537, %v10616_v7  ;;  %vm8258_vm4 = vmor %vm2828_vm8, %vm2829_vm14 }
 0x126   :  { %v8208_v45 = vpop.f32.mrf.mxu1  ;;  %v926_v10 = vpop.f32.mrf.mxu0  ;;  %vm8233_vm12 = vcmp.lt.s32.totalorder %v10628_v52, 7  ;;  %vm8285_vm14 = vcmp.lt.s32.totalorder %v10640_v49, 7  ;;  %v2860_v13 = vrot.slane %v2858_v24, 7  ;;  %v2870_v49 = vshll.u32 %v2814_v5, 16 }
 0x127   :  { %v8226_v36 = vadd.f32 %v1133_v8, %v926_v10  ;;  %vm2798_vm9 = vmpackc.low %vm8233_vm12, %vm8233_vm12  ;;  %v2845_v10 = vor.u32 %v2843_v56, %v2842_v62  ;;  %v2854_v52 = vor.u32 %v2852_v60, %v8237_v15  ;;  %v2038_v56 = vshrl.u32 %v5540_v25, 16 }
 0x128   :  { %v6348_v1 = vpop.f32.mrf.mxu1  ;;  %v6291_v33 = vpop.f32.mrf.mxu0  ;;  %vm2800_vm12 = vmpackc.low %vm8285_vm14, %vm8285_vm14  ;;  %v2856_v35 = vrot.slane %v8237_v15, 4  ;;  %vm10657_vm8 = vcmp.ne.s16.totalorder %v7307_v39, 0 }
 0x129   :  { %10627 = vst [vmem:[#allocation21_spill] sm:$0xff] %v8226_v36  ;;  %v2847_v1 = vrot.slane %v2842_v62, 4  ;;  %v10635_v33 = vand.u32 7, %v7406_v50  ;;  %v2867_v62 = vshrl.u32 %v2814_v5, 16  ;;  %v8278_v50 = vsel %vm8258_vm4, %v2838_v17, %v2845_v10  ;;  %v3352_v5 = vld [vmem:[#allocation2 + $0x4] sm:$0x8] }
 0x12a   :  { %v8242_v8 = vpop.f32.mrf.mxu1  ;;  %v929_v2 = vpop.f32.mrf.mxu0  ;;  %10639 = vst [vmem:[#allocation25_spill] sm:$0xff] %v8278_v50  ;;  %v2861_v17 = vshll.u32 %v8248_v27, 16  ;;  %v8352_v15 = vsel %vm2800_vm12, 65537, %v10616_v7 }
 0x12b   :  { %v8253_v31 = vadd.f32 %v1136_v0, %v929_v2  ;;  %vm8266_vm7 = vcmp.lt.s32.totalorder %v10635_v33, 7  ;;  %v2816_v2 = vsel %vm2798_vm9, 65537, %v10616_v7  ;;  %v2876_v33 = vshrl.u32 %v2815_v16, 16 }
 0x12c   :  { %v6419_v22 = vpop.f32.mrf.mxu1  ;;  %v6292_v40 = vpop.f32.mrf.mxu0  ;;  %vm2799_vm10 = vmpackc.low %vm8266_vm7, %vm8266_vm7  ;;  %vm10451_vm9 = vcmp.ne.s16.totalorder %v8255_v48, 0  ;;  %v2885_v10 = vshrl.u32 %v2816_v2, 16 }
 0x12d   :  { %10631 = vst [vmem:[#allocation22_spill] sm:$0xff] %v8253_v31  ;;  %v2041_v40 = vshll.u32 %v5540_v25, 16  ;;  %v8313_v27 = vsel %vm2799_vm10, 65537, %v10616_v7  ;;  %v8329_v0 = vsel %vm10451_vm9, %v2737_v63, 0 }
 0x12e   :  { %v8270_v57 = vpop.f32.mrf.mxu1  ;;  %v934_v22 = vpop.f32.mrf.mxu0  ;;  %v8332_v36 = vrot.slane %v2885_v10, 7  ;;  %v2863_v10 = vor.u32 %v2861_v17, %v2860_v13 }
 0x12f   :  { %v8274_v6 = vadd.f32 %v1141_v28, %v934_v22  ;;  %v8291_v28 = vsel %vm8258_vm4, %v2847_v1, %v2854_v52  ;;  %v8305_v1 = vrot.slane %v2041_v40, 4  ;;  %v2869_v52 = vrot.slane %v2867_v62, 7 }
 0x130   :  { %v6420_v60 = vpop.f32.mrf.mxu1  ;;  %v6295_v25 = vpop.f32.mrf.mxu0  ;;  %10643 = vst [vmem:[#allocation26_spill] sm:$0xff] %v8291_v28  ;;  %v2878_v40 = vrot.slane %v2876_v33, 7  ;;  %v2879_v62 = vshll.u32 %v2815_v16, 16  ;;  %v2894_v16 = vshrl.u32 %v8313_v27, 16 }
 0x131   :  { %10638 = vst [vmem:[#allocation24_spill] sm:$0xff] %v8274_v6  ;;  %v8297_v60 = vrot.slane %v2038_v56, 3  ;;  %v10644_v6 = vand.u32 7, %v7445_v23  ;;  %v10647_v23 = vand.u32 7, %v7469_v47  ;;  %v2888_v47 = vshll.u32 %v2816_v2, 16 }
 0x132   :  { %v8295_v22 = vpop.f32.mrf.mxu1  ;;  %v937_v51 = vpop.f32.mrf.mxu0  ;;  %v8365_v2 = vsel %vm10657_vm8, %v3352_v5, 0 }
 0x133   :  { %vm8301_vm11 = vcmp.lt.s32.totalorder %v10644_v6, 7  ;;  %vm8320_vm2 = vcmp.lt.s32.totalorder %v10647_v23, 7  ;;  %v8325_v56 = vadd.f32 %v8208_v45, %v937_v51  ;;  %v10651_v51 = vand.u32 7, %v7512_v38  ;;  %v8409_v6 = vld [vmem:[%s10374_s2] ss:$0 sm:$0xff] }
 0x134   :  { %v6423_v24 = vpop.f32.mrf.mxu1  ;;  %v6296_v31 = vpop.f32.mrf.mxu0  ;;  %vm2802_vm10 = vmpackc.low %vm8320_vm2, %vm8320_vm2  ;;  %v10654_v38 = vand.u32 7, %v7581_v30  ;;  %v2865_v23 = vrot.slane %v2860_v13, 4  ;;  %v2881_v30 = vor.u32 %v2879_v62, %v2878_v40  ;;  %v2883_v13 = vrot.slane %v2878_v40, 4 }
 0x135   :  { %10650 = vst [vmem:[#allocation27_spill] sm:$0xff] %v8325_v56  ;;  %vm8339_vm7 = vcmp.lt.s32.totalorder %v10651_v51, 7  ;;  %v2872_v24 = vor.u32 %v2870_v49, %v2869_v52  ;;  %v2874_v56 = vrot.slane %v2869_v52, 4  ;;  %vm10658_vm14 = vmpackc.low %vm8301_vm11, %vm8301_vm11  ;;  %v2890_v49 = vor.u32 %v2888_v47, %v8332_v36 }
 0x136   :  { %v8343_v63 = vpop.f32.mrf.mxu1  ;;  %vm8359_vm9 = vcmp.lt.s32.totalorder %v10654_v38, 7  ;;  %v1319_v33 = vpop.f32.mrf.mxu0  ;;  %v8376_v5 = vsel %vm10658_vm14, 65537, %v10616_v7  ;;  %vm2803_vm12 = vmpackc.low %vm8339_vm7, %vm8339_vm7  ;;  %v8397_v40 = vrot.slane %v2894_v16, 7  ;;  %v2897_v62 = vshll.u32 %v8313_v27, 16 }
 0x137   :  { %v1390_v51 = vadd.f32 %v1319_v33, %v8158_v54  ;;  %v2903_v54 = vshrl.u32 %v8352_v15, 16  ;;  %vm2804_vm11 = vmpackc.low %vm8359_vm9, %vm8359_vm9  ;;  %v10659_v47 = vand.u32 7, %v7584_v32  ;;  %v8417_v16 = vsel %vm8258_vm4, %v2865_v23, %v2872_v24 }
 0x138   :  { %v6424_v48 = vpop.f32.mrf.mxu1  ;;  %v6367_v17 = vpop.f32.mrf.mxu0  ;;  %10663 = vst [vmem:[#allocation29_spill] sm:$0xff] %v8417_v16  ;;  %v2912_v32 = vshrl.u32 %v8376_v5, 16  ;;  %v10664_v27 = vand.u32 7, %v7647_v4  ;;  %v2822_v4 = vsel %vm2804_vm11, 65537, %v10616_v7  ;;  %v8446_v24 = vsel %vm8258_vm4, %v2883_v13, %v2890_v49 }
 0x139   :  { %v8389_v48 = vsel %vm2802_vm10, 65537, %v10616_v7  ;;  %v1744_v25 = vadd.f32 %v8242_v8, %v1390_v51  ;;  %vm8402_vm8 = vcmp.lt.s32.totalorder %v10659_v47, 7  ;;  %v8413_v8 = vsel %vm8258_vm4, %v2856_v35, %v2863_v10  ;;  %10668 = vst [vmem:[#allocation31_spill] sm:$0xff] %v8446_v24 }
 0x13a   :  { %v8395_v52 = vpop.f32.mrf.mxu1  ;;  %v1322_v33 = vpop.f32.mrf.mxu0  ;;  %10662 = vst [vmem:[#allocation28_spill] sm:$0xff] %v8413_v8  ;;  %vm8422_vm2 = vcmp.lt.s32.totalorder %v10664_v27, 7  ;;  %v2821_v35 = vsel %vm2803_vm12, 65537, %v10616_v7  ;;  %v2921_v10 = vshrl.u32 %v8389_v48, 16  ;;  %v8448_v45 = vrot.slane %v2903_v54, 7  ;;  %vm2805_vm7 = vmpackc.low %vm8402_vm8, %vm8402_vm8 }
 0x13b   :  { %v1391_v17 = vadd.f32 %v1322_v33, %v8165_v21  ;;  %v8442_v21 = vsel %vm8258_vm4, %v2874_v56, %v2881_v30  ;;  %v2906_v33 = vshll.u32 %v8352_v15, 16  ;;  %v1769_v31 = vadd.f32 %v8409_v6, %v1744_v25  ;;  %vm2806_vm9 = vmpackc.low %vm8422_vm2, %vm8422_vm2 }
 0x13c   :  { %v6427_v47 = vpop.f32.mrf.mxu1  ;;  %v6368_v23 = vpop.f32.mrf.mxu0  ;;  %10667 = vst [vmem:[#allocation30_spill] sm:$0xff] %v8442_v21  ;;  %v2892_v56 = vrot.slane %v8332_v36, 4  ;;  %v2899_v30 = vor.u32 %v2897_v62, %v8397_v40  ;;  %v8464_v49 = vrot.slane %v2912_v32, 7  ;;  %v2930_v54 = vshrl.u32 %v2821_v35, 16 }
 0x13d   :  { %v1745_v27 = vadd.f32 %v8270_v57, %v1391_v17  ;;  %v2939_v23 = vshrl.u32 %v2822_v4, 16  ;;  %v2915_v36 = vshll.u32 %v8376_v5, 16  ;;  %v8469_v26 = vrot.slane %v2921_v10, 7 }
 0x13e   :  { %v8456_v47 = vpop.f32.mrf.mxu1  ;;  %v1327_v13 = vpop.f32.mrf.mxu0  ;;  %v2924_v51 = vshll.u32 %v8389_v48, 16  ;;  %v2933_v39 = vshll.u32 %v2821_v35, 16  ;;  %v8478_v32 = vsel %vm2805_vm7, 65537, %v10616_v7  ;;  %v10669_v48 = vand.u32 7, %v7650_v34 }
 0x13f   :  { %v1770_v25 = vadd.f32 %v8409_v6, %v1745_v27  ;;  %v1392_v57 = vadd.f32 %v1327_v13, %v8169_v59  ;;  %v8481_v27 = vsel %vm2806_vm9, 65537, %v10616_v7  ;;  %v1787_v59 = vmax.f32 %v1769_v31, 0.0 }
 0x140   :  { %v6428_v17 = vpop.f32.mrf.mxu1  ;;  %v6371_v62 = vpop.f32.mrf.mxu0  ;;  %vm8488_vm10 = vcmp.lt.s32.totalorder %v10669_v48, 7  ;;  %v2932_v38 = vrot.slane %v2930_v54, 7  ;;  %v2942_v15 = vshll.u32 %v2822_v4, 16  ;;  %vm8496_vm14 = vcmp.lt.s32.totalorder %v10672_v42, 7 }
 0x141   :  { %v1788_v13 = vmax.f32 %v1770_v25, 0.0  ;;  %v1746_v5 = vadd.f32 %v8295_v22, %v1392_v57  ;;  %v8492_v62 = vrot.slane %v2939_v23, 7  ;;  %vm10469_vm12 = vcmp.ne.s16.totalorder %v8278_v50, 0  ;;  %vm2807_vm11 = vmpackc.low %vm8488_vm10, %vm8488_vm10 }
 0x142   :  { %v8484_v10 = vpop.f32.mrf.mxu1  ;;  %v1330_v17 = vpop.f32.mrf.mxu0  ;;  %v2908_v34 = vor.u32 %v2906_v33, %v8448_v45  ;;  %v2948_v48 = vshrl.u32 %v8478_v32, 16  ;;  %v8506_v4 = vsel %vm8258_vm4, %v2892_v56, %v2899_v30  ;;  %v2910_v9 = vrot.slane %v8448_v45, 4  ;;  %vm2808_vm8 = vmpackc.low %vm8496_vm14, %vm8496_vm14 }
 0x143   :  { %v5902_v22 = vpack.c.bf16 %v1788_v13, %v1787_v59  ;;  %v1393_v25 = vadd.f32 %v1330_v17, %v8171_v3  ;;  %10675 = vst [vmem:[#allocation32_spill] sm:$0xff] %v8506_v4  ;;  %v2917_v42 = vor.u32 %v2915_v36, %v8464_v49  ;;  %v2957_v3 = vshrl.u32 %v8481_v27, 16 }
 0x144   :  { %v6431_v57 = vpop.f32.mrf.mxu1  ;;  %v6372_v54 = vpop.f32.mrf.mxu0  ;;  %v1771_v33 = vadd.f32 %v8409_v6, %v1746_v5  ;;  %v2919_v56 = vrot.slane %v8464_v49, 4  ;;  %v2926_v30 = vor.u32 %v2924_v51, %v8469_v26  ;;  %v2928_v36 = vrot.slane %v8469_v26, 4 }
 0x145   :  { %5989 = vst [vmem:[#allocation2 + $0x8] sm:$0xff] %v5902_v22   ;;  %v1747_v23 = vadd.f32 %v8343_v63, %v1393_v25  ;;  %v2935_v13 = vor.u32 %v2933_v39, %v2932_v38  ;;  %v2937_v17 = vrot.slane %v2932_v38, 4  ;;  %v2944_v22 = vor.u32 %v2942_v15, %v8492_v62 }
 0x146   :  { %v8516_v59 = vpop.f32.mrf.mxu1  ;;  %v1335_v45 = vpop.f32.mrf.mxu0  ;;  %vm10485_vm2 = vcmp.ne.s16.totalorder %v8291_v28, 0  ;;  %v8528_v49 = vrot.slane %v2948_v48, 7  ;;  %v8536_v26 = vsel %vm2807_vm11, 65537, %v10616_v7  ;;  %v2951_v15 = vshll.u32 %v8478_v32, 16 }
 0x147   :  { %v1772_v5 = vadd.f32 %v8409_v6, %v1747_v23  ;;  %v1394_v63 = vadd.f32 %v1335_v45, %v8173_v37  ;;  %v8539_v51 = vrot.slane %v2957_v3, 7  ;;  %v2960_v37 = vshll.u32 %v8481_v27, 16 }
 0x148   :  { %v6432_v25 = vpop.f32.mrf.mxu1  ;;  %v6375_v39 = vpop.f32.mrf.mxu0  ;;  %v8548_v38 = vsel %vm2808_vm8, 65537, %v10616_v7  ;;  %v1789_v57 = vmax.f32 %v1771_v33, 0.0  ;;  %v10676_v32 = vrot.slane %v8397_v40, 4  ;;  %vm10474_vm7 = vcmp.ne.s16.totalorder %v8413_v8, 0 }
 0x149   :  { %v1790_v35 = vmax.f32 %v1772_v5, 0.0  ;;  %v1748_v48 = vadd.f32 %v8395_v52, %v1394_v63  ;;  %v8562_v31 = vsel %vm8258_vm4, %v2910_v9, %v2917_v42  ;;  %v8566_v33 = vsel %vm8258_vm4, %v2919_v56, %v2926_v30 }
 0x14a   :  { %v8551_v54 = vpop.f32.mrf.mxu1  ;;  %v8557_v3 = vsel %vm8258_vm4, %v10676_v32, %v2908_v34  ;;  %v1338_v27 = vpop.f32.mrf.mxu0  ;;  %10678 = vst [vmem:[#allocation34_spill] sm:$0xff] %v8562_v31  ;;  %10679 = vst [vmem:[#allocation35_spill] sm:$0xff] %v8566_v33  ;;  %v2966_v23 = vshrl.u32 %v8536_v26, 16  ;;  %v2955_v5 = vrot.slane %v8528_v49, 4  ;;  %v2975_v63 = vshrl.u32 %v8548_v38, 16 }
 0x14b   :  { %10677 = vst [vmem:[#allocation33_spill] sm:$0xff] %v8557_v3  ;;  %v5907_v40 = vpack.c.bf16 %v1790_v35, %v1789_v57  ;;  %v1395_v45 = vadd.f32 %v1338_v27, %v8175_v46  ;;  %v8579_v56 = vsel %vm8258_vm4, %v2928_v36, %v2935_v13  ;;  %v8583_v30 = vsel %vm8258_vm4, %v2937_v17, %v2944_v22 }
 0x14c   :  { %v6435_v34 = vpop.f32.mrf.mxu1  ;;  %v6376_v25 = vpop.f32.mrf.mxu0  ;;  %v1937_v39 = vld [vmem:[#allocation2 + $0x8] sm:$0xf]  ;;  %v8573_v9 = vld [vmem:[#allocation2 + $0xc] sm:$0xf]  ;;  %10681 = vst [vmem:[#allocation37_spill] sm:$0xff] %v8579_v56  ;;  %10682 = vst [vmem:[#allocation38_spill] sm:$0xff] %v8583_v30  ;;  %v2953_v46 = vor.u32 %v2951_v15, %v8528_v49  ;;  %v2962_v57 = vor.u32 %v2960_v37, %v8539_v51  ;;  %v1773_v35 = vadd.f32 %v8409_v6, %v1748_v48 }
 0x14d   :  { %v8575_v42 = vld [vmem:[#allocation2 + $0x8] sm:$0xf]  ;;  %5990 = vst [vmem:[#allocation2 + $0x10] sm:$0xff] %v5907_v40   ;;  %v1749_v32 = vadd.f32 %v8456_v47, %v1395_v45  ;;  %v1956_v34 = vsel %vm7369_vm3, %v1937_v39, 0  ;;  %v1957_v36 = vsel %vm7385_vm5, %v8573_v9, 0  ;;  %v8601_v37 = vrot.slane %v2966_v23, 7 }
 0x14e   :  { %10680 = vst [vmem:[#allocation36_spill] sm:$0xff] %v8575_v42  ;;  %v8594_v13 = vpop.f32.mrf.mxu1  ;;  %v8596_v17 = vld [vmem:[#allocation2 + $0xc] sm:$0xf]  ;;  %v1343_v22 = vpop.f32.mrf.mxu0  ;;  %v5541_v49 = vcombine.low %v1956_v34, %v1957_v36  ;;  %v3012_v15 = vsel %vm10469_vm12, %v8575_v42, 0  ;;  %vm10471_vm9 = vcmp.ne.s16.totalorder %v8417_v16, 0  ;;  %v8611_v50 = vrot.slane %v2975_v63, 7 }
 0x14f   :  { %10685 = vst [vmem:[#allocation39_spill] sm:$0xff] %v8596_v17  ;;  %v1774_v48 = vadd.f32 %v8409_v6, %v1749_v32  ;;  %v1396_v40 = vadd.f32 %v1343_v22, %v8177_v53  ;;  %v8607_v39 = vcombine.low %v8329_v0, %v3012_v15  ;;  %v1791_v47 = vmax.f32 %v1773_v35, 0.0 }
 0x150   :  { %v6436_v45 = vpop.f32.mrf.mxu1  ;;  %v6379_v30 = vpop.f32.mrf.mxu0  ;;  %v2046_v34 = vshrl.u32 %v5541_v49, 16  ;;  %v2049_v36 = vshll.u32 %v5541_v49, 16  ;;  %vm10495_vm10 = vsmask.f32 7424  ;;  %v3013_v63 = vsel %vm10485_vm2, %v8596_v17, 0 }
 0x151   :  { %v1792_v32 = vmax.f32 %v1774_v48, 0.0  ;;  %v1750_v53 = vadd.f32 %v8484_v10, %v1396_v40  ;;  %v3099_v0 = vshll.u32 %v8607_v39, 16  ;;  %vm10470_vm14 = vcmp.ne.s16.totalorder %v8442_v21, 0  ;;  %v7058_v10 = vld [vmem:[%s10373_s3 + $0x78] sm:$0xff]  }
 0x152   :  { %v8617_v22 = vpop.f32.mrf.mxu1  ;;  %v1346_v15 = vpop.f32.mrf.mxu0  ;;  %v2048_v30 = vrot.slane %v2046_v34, 3  ;;  %v2051_v45 = vrot.slane %v2049_v36, 4  ;;  %v3356_v40 = vsel %vm7369_vm3, %v8596_v17, 0  ;;  %v3355_v36 = vsel %vm7365_vm1, %v8575_v42, 0 }
 0x153   :  { %v5912_v35 = vpack.c.bf16 %v1792_v32, %v1791_v47  ;;  %v1397_v48 = vadd.f32 %v1346_v15, %v8179_v61  ;;  %v1775_v23 = vadd.f32 %v8409_v6, %v1750_v53  ;;  %v10686_v15 = vrot.slane %v8492_v62, 4  ;;  %v10688_v53 = vld [vmem:[#allocation15_spill] sm:$0xff] }
 0x154   :  { %v6439_v34 = vpop.f32.mrf.mxu1  ;;  %v6380_v52 = vpop.f32.mrf.mxu0  ;;  %v8635_v49 = vor.u32 %v2051_v45, %v2048_v30  ;;  %v8637_v47 = vld [vmem:[#allocation2 + $0x10] sm:$0xf]  ;;  %v8641_v32 = vld [vmem:[#allocation2 + $0x14] sm:$0xf]  ;;  %v8651_v19 = vsel %vm8258_vm4, %v2955_v5, %v2962_v57  ;;  %v10692_v57 = vor.u32 %v8305_v1, %v8297_v60  ;;  %vm10693_vm8 = vsmask.f32 4352 }
 0x155   :  { %v8639_v61 = vld [vmem:[#allocation2 + $0x10] sm:$0xf]  ;;  %v8647_v34 = vsel %vm8258_vm4, %v10686_v15, %v2953_v46  ;;  %10687 = vst [vmem:[#allocation40_spill] sm:$0xff] %v8651_v19  ;;  %v10689_v52 = vand.u32 7, %v10688_v53  ;;  %5991 = vst [vmem:[#allocation2 + $0x18] sm:$0xff] %v5912_v35   ;;  %v1751_v45 = vadd.f32 %v8516_v59, %v1397_v48  ;;  %v3014_v62 = vsel %vm10474_vm7, %v8637_v47, 0 }
 0x156   :  { %v3097_v46 = vshrl.u32 %v8607_v39, 16  ;;  %v3101_v15 = vrot.slane %v3099_v0, 1  ;;  %v8664_v27 = vpop.f32.mrf.mxu1  ;;  %v1351_v5 = vpop.f32.mrf.mxu0  ;;  %v2053_v53 = vsel %vm10693_vm8, %v10692_v57, %v8635_v49  ;;  %v3357_v59 = vsel %vm7385_vm5, %v8637_v47, 0  ;;  %v8679_v0 = vld [vmem:[#allocation2 + $0x14] sm:$0xf] }
 0x157   :  { %vm8655_vm11 = vcmp.lt.s32.totalorder %v10689_v52, 7  ;;  %v8671_v52 = vcombine.low %v3013_v63, %v3014_v62  ;;  %v1958_v39 = vsel %vm7399_vm6, %v8639_v61, 0  ;;  %v1776_v48 = vadd.f32 %v8409_v6, %v1751_v45  ;;  %6470 = vmatmul.mubr.bf16.vlgmr.msra.gmra.mxu0 %v2053_v53  ;;  %v7060_v45 = vld [vmem:[%s10373_s3 + $0x70] sm:$0xff]  }
 0x158   :  { %v1398_v8 = vadd.f32 %v1351_v5, %v8181_v20  ;;  %v1959_v1 = vsel %vm7447_vm13, %v8641_v32, 0  ;;  %v6440_v63 = vpop.f32.mrf.mxu1  ;;  %vm10477_vm8 = vcmp.ne.s16.totalorder %v8446_v24, 0  ;;  %v8688_v62 = vcombine.low %v8365_v2, %v3355_v36  ;;  %v6383_v25 = vpop.f32.mrf.mxu0  ;;  %6558 = vmatpush3.bf16.msra.mxu0 %v7058_v10 }
 0x159   :  { %v1793_v57 = vmax.f32 %v1775_v23, 0.0  ;;  %v3104_v28 = vshll.u32 %v8671_v52, 16  ;;  %v10696_v17 = vmov 0.0   ;;  %v5542_v20 = vcombine.low %v1958_v39, %v1959_v1 }
 0x15a   :  { %6473 = vmatprep.mubr.msk.bf16.mxu0 %vm10575_vm0, %v10696_v17  ;;  %v1794_v53 = vmax.f32 %v1776_v48, 0.0  ;;  %v1752_v2 = vadd.f32 %v8551_v54, %v1398_v8  ;;  %6559 = vmatprep.subr.bf16.mxu0 %v10696_v17  ;;  %v8700_v25 = vpop.f32.mrf.mxu1  ;;  %v8704_v10 = vcombine.low %v3356_v40, %v3357_v59  ;;  %v1354_v36 = vpop.f32.mrf.mxu0  ;;  %v3102_v39 = vor.u32 %v3101_v15, %v3097_v46  ;;  %v7065_v8 = vld [vmem:[%s10373_s3 + $0x138] sm:$0xff]  }
 0x15b   :  { %v3106_v1 = vrot.slane %v3104_v28, 1  ;;  %v2055_v63 = vshrl.u32 %v5542_v20, 16  ;;  %v2058_v42 = vshll.u32 %v5542_v20, 16  ;;  %vm10481_vm12 = vcmp.ne.s16.totalorder %v8506_v4, 0  ;;  %v7061_v28 = vld [vmem:[%s10373_s3 + $0x68] sm:$0xff]  }
 0x15c   :  { %v5917_v54 = vpack.c.bf16 %v1794_v53, %v1793_v57  ;;  %v1399_v48 = vadd.f32 %v1354_v36, %v8183_v29  ;;  %v3015_v23 = vsel %vm10471_vm9, %v8679_v0, 0  ;;  %v3108_v40 = vshrl.u32 %v8671_v52, 16  ;;  %v6443_v59 = vpop.f32.mrf.mxu1  ;;  %v6384_v15 = vpop.f32.mrf.mxu0  ;;  %6560 = vmatpush3.bf16.msra.mxu0 %v7060_v45  ;;  %v8720_v29 = vld [vmem:[#allocation2 + $0x18] sm:$0xf]  ;;  %vm2809_vm9 = vmpackc.low %vm8655_vm11, %vm8655_vm11 }
 0x15d   :  { %v1777_v46 = vadd.f32 %v8409_v6, %v1752_v2  ;;  %v3107_v20 = vsel %vm10495_vm10, %v3102_v39, %v3106_v1  ;;  %v2057_v5 = vrot.slane %v2055_v63, 3  ;;  %v2060_v57 = vrot.slane %v2058_v42, 4  ;;  %v8722_v53 = vld [vmem:[#allocation2 + $0x18] sm:$0xf]  ;;  %v8728_v59 = vld [vmem:[#allocation2 + $0x1c] sm:$0xf]  ;;  %6561 = vmatprep.subr.bf16.mxu0 %v10696_v17 }
 0x15e   :  { %10697 = vst [vmem:[#allocation15_spill] sm:$0xff] %v8722_v53  ;;  %5992 = vst [vmem:[#allocation2 + $0x20] sm:$0xff] %v5917_v54   ;;  %v1753_v52 = vadd.f32 %v8594_v13, %v1399_v48  ;;  %6626 = vmatmul.mubr.bf16.vlgmr.msra.gmra.mxu1 %v3107_v20  ;;  %v3016_v36 = vsel %vm10470_vm14, %v8720_v29, 0  ;;  %v1960_v2 = vsel %vm7478_vm15, %v8722_v53, 0  ;;  %v8733_v42 = vpop.f32.mrf.mxu1  ;;  %v3439_v45 = vshrl.u32 %v8688_v62, 16  ;;  %v1359_v39 = vpop.f32.mrf.mxu0  ;;  %v7066_v15 = vld [vmem:[%s10373_s3 + $0x130] sm:$0xff]  }
 0x15f   :  { %v8737_v63 = vor.u32 %v2060_v57, %v2057_v5  ;;  %6629 = vmatprep.mubr.msk.bf16.mxu1 %vm10575_vm0, %v10696_v17  ;;  %v8741_v13 = vcombine.low %v3015_v23, %v3016_v36  ;;  %vm10698_vm14 = vnez %v10559_v43  ;;  %v8746_v48 = vld [vmem:[#allocation2 + $0x1c] sm:$0xf]  ;;  %6714 = vmatpush3.bf16.msra.mxu1 %v7065_v8  ;;  %v1400_v57 = vadd.f32 %v1359_v39, %v8185_v14  ;;  %v7062_v14 = vld [vmem:[%s10373_s3 + $0x60] sm:$0xff]  }
 0x160   :  { %v1961_v54 = vsel %vm10698_vm14, %v8728_v59, 0  ;;  %v1778_v20 = vadd.f32 %v8409_v6, %v1753_v52  ;;  %v6444_v36 = vpop.f32.mrf.mxu1  ;;  %6715 = vmatprep.subr.bf16.mxu1 %v10696_v17  ;;  %v3442_v8 = vshll.u32 %v8688_v62, 16  ;;  %v1795_v21 = vmax.f32 %v1777_v46, 0.0  ;;  %v6387_v5 = vpop.f32.mrf.mxu0  ;;  %6562 = vmatpush3.bf16.msra.mxu0 %v7061_v28 }
 0x161   :  { %v5543_v23 = vcombine.low %v1960_v2, %v1961_v54  ;;  %vm10699_vm7 = vsmask.f32 4352  ;;  %v3112_v52 = vshll.u32 %v8741_v13, 16  ;;  %v1754_v54 = vadd.f32 %v8617_v22, %v1400_v57  ;;  %6563 = vmatprep.subr.bf16.mxu0 %v10696_v17 }
 0x162   :  { %v2062_v16 = vsel %vm10699_vm7, %v8635_v49, %v8737_v63  ;;  %v1796_v39 = vmax.f32 %v1778_v20, 0.0  ;;  %v8770_v36 = vpop.f32.mrf.mxu1  ;;  %vm10486_vm7 = vcmp.ne.s16.totalorder %v8557_v3, 0  ;;  %v1362_v49 = vpop.f32.mrf.mxu0  ;;  %v3110_v28 = vor.u32 %v3108_v40, %v3106_v1 }
 0x163   :  { %6474 = vmatmul.mubr.bf16.gmra.mxu0 %v2062_v16  ;;  %v2064_v62 = vshrl.u32 %v5543_v23, 16  ;;  %v2067_v46 = vshll.u32 %v5543_v23, 16  ;;  %v8774_v5 = vrot.slane %v3112_v52, 1  ;;  %v3017_v22 = vsel %vm10477_vm8, %v8746_v48, 0  ;;  %6716 = vmatpush3.bf16.msra.mxu1 %v7066_v15  ;;  %v7068_v16 = vld [vmem:[%s10373_s3 + $0x128] sm:$0xff]   ;;  %v7063_v15 = vld [vmem:[%s10373_s3 + $0x58] sm:$0xff]  }
 0x164   :  { %6477 = vmatprep.mubr.msk.bf16.mxu0 %vm10575_vm0, %v10696_v17  ;;  %v8790_v1 = vsel %vm2809_vm9, 65537, %v10616_v7  ;;  %v5922_v40 = vpack.c.bf16 %v1796_v39, %v1795_v21  ;;  %v1401_v20 = vadd.f32 %v1362_v49, %v8189_v41  ;;  %v3116_v23 = vshrl.u32 %v8741_v13, 16  ;;  %v6447_v52 = vpop.f32.mrf.mxu1  ;;  %6717 = vmatprep.subr.bf16.mxu1 %v10696_v17  ;;  %v6388_v2 = vpop.f32.mrf.mxu0 }
 0x165   :  { %v2066_v57 = vrot.slane %v2064_v62, 3  ;;  %vm10487_vm8 = vcmp.ne.s16.totalorder %v8562_v31, 0  ;;  %v1779_v30 = vadd.f32 %v8409_v6, %v1754_v54  ;;  %v3115_v21 = vsel %vm10495_vm10, %v3110_v28, %v8774_v5  ;;  %v8802_v41 = vld [vmem:[#allocation2 + $0x20] sm:$0xf]  ;;  %6564 = vmatpush3.bf16.msra.mxu0 %v7062_v14  ;;  %v8812_v2 = vld [vmem:[#allocation2 + $0x24] sm:$0xf] }
 0x166   :  { %v2069_v39 = vrot.slane %v2067_v46, 4  ;;  %v8804_v62 = vld [vmem:[#allocation2 + $0x20] sm:$0xf]  ;;  %v8806_v13 = vrot.slane %v3439_v45, 3  ;;  %5993 = vst [vmem:[#allocation2 + $0x28] sm:$0xff] %v5922_v40   ;;  %v1755_v49 = vadd.f32 %v8664_v27, %v1401_v20  ;;  %6630 = vmatmul.mubr.bf16.gmra.mxu1 %v3115_v21  ;;  %v3018_v54 = vsel %vm10481_vm12, %v8802_v41, 0  ;;  %v8817_v28 = vpop.f32.mrf.mxu1  ;;  %6565 = vmatprep.subr.bf16.mxu0 %v10696_v17  ;;  %v1367_v27 = vpop.f32.mrf.mxu0 }
 0x167   :  { %10700 = vst [vmem:[#allocation41_spill] sm:$0xff] %v8804_v62  ;;  %10701 = vst [vmem:[#allocation42_spill] sm:$0xff] %v8812_v2  ;;  %vm10702_vm9 = vnez %v10562_v58  ;;  %v8820_v45 = vrot.slane %v3442_v8, 4  ;;  %6633 = vmatprep.mubr.msk.bf16.mxu1 %vm10575_vm0, %v10696_v17  ;;  %v8828_v40 = vcombine.low %v3017_v22, %v3018_v54  ;;  %vm10703_vm11 = vnez %v10566_v44  ;;  %v8833_v52 = vld [vmem:[#allocation2 + $0x24] sm:$0xf]  ;;  %6718 = vmatpush3.bf16.msra.mxu1 %v7068_v16  ;;  %v7113_v58 = vld [vmem:[%s10373_s3 + $0x158] sm:$0xff]  }
 0x168   :  { %v1962_v46 = vsel %vm10702_vm9, %v8804_v62, 0  ;;  %1897 = vst [vmem:[#allocation2 + $0x28] sm:$0xf] %v10616_v7  ;;  %1898 = vst [vmem:[#allocation2 + $0x2c] sm:$0xf] %v10616_v7  ;;  %v8824_v14 = vor.u32 %v2069_v39, %v2066_v57  ;;  %v1963_v20 = vsel %vm10703_vm11, %v8812_v2, 0  ;;  %v1780_v21 = vadd.f32 %v8409_v6, %v1755_v49  ;;  %v6448_v54 = vpop.f32.mrf.mxu1  ;;  %6719 = vmatprep.subr.bf16.mxu1 %v10696_v17  ;;  %v6391_v24 = vpop.f32.mrf.mxu0 }
 0x169   :  { %v7069_v8 = vld [vmem:[%s10373_s3 + $0x120] sm:$0xff]   ;;  %v1402_v39 = vadd.f32 %v1367_v27, %v8195_v18  ;;  %v5544_v22 = vcombine.low %v1962_v46, %v1963_v20  ;;  %v3447_v7 = vshrl.u32 %v8704_v10, 16  ;;  %v1797_v4 = vmax.f32 %v1779_v30, 0.0  ;;  %6566 = vmatpush3.bf16.msra.mxu0 %v7063_v15  ;;  %v7064_v18 = vld [vmem:[%s10373_s3 + $0x50] sm:$0xff]  }
 0x16a   :  { %vm10704_vm12 = vsmask.f32 4352  ;;  %v3120_v53 = vshll.u32 %v8828_v40, 16  ;;  %vm10496_vm2 = vcmp.ne.s16.totalorder %v8566_v33, 0  ;;  %v1798_v46 = vmax.f32 %v1780_v21, 0.0  ;;  %6567 = vmatprep.subr.bf16.mxu0 %v10696_v17  ;;  %v1370_v24 = vpop.f32.mrf.mxu0  ;;  %v7119_v44 = vld [vmem:[%s10373_s3 + $0x220] sm:$0xff]  }
 0x16b   :  { %v2071_v16 = vsel %vm10704_vm12, %v8737_v63, %v8824_v14  ;;  %v1756_v30 = vadd.f32 %v8700_v25, %v1402_v39  ;;  %v2073_v27 = vshrl.u32 %v5544_v22, 16  ;;  %v2076_v20 = vshll.u32 %v5544_v22, 16  ;;  %v8855_v63 = vpop.f32.mrf.mxu1  ;;  %6720 = vmatpush3.bf16.msra.mxu1 %v7069_v8  ;;  %v7070_v39 = vld [vmem:[%s10373_s3 + $0x118] sm:$0xff]  }
 0x16c   :  { %6478 = vmatmul.mubr.bf16.gmra.mxu0 %v2071_v16  ;;  %v3118_v15 = vor.u32 %v3116_v23, %v8774_v5  ;;  %v3122_v54 = vrot.slane %v3120_v53, 1  ;;  %v10705_v21 = vshll.u32 %v8536_v26, 16  ;;  %v3450_v22 = vshll.u32 %v8704_v10, 16  ;;  %6721 = vmatprep.subr.bf16.mxu1 %v10696_v17  ;;  %v6392_v57 = vpop.f32.mrf.mxu0 }
 0x16d   :  { %6481 = vmatprep.mubr.msk.bf16.mxu0 %vm10575_vm0, %v10696_v17  ;;  %v5927_v16 = vpack.c.bf16 %v1798_v46, %v1797_v4  ;;  %v1403_v53 = vadd.f32 %v1370_v24, %v8200_v11  ;;  %v2075_v5 = vrot.slane %v2073_v27, 3  ;;  %v6451_v23 = vpop.f32.mrf.mxu1  ;;  %v3019_v8 = vsel %vm10486_vm7, %v8833_v52, 0  ;;  %6568 = vmatpush3.bf16.msra.mxu0 %v7064_v18  ;;  %v7067_v4 = vld [vmem:[%s10373_s3 + $0x48] sm:$0xff]   ;;  %v10711_v11 = vld [vmem:[#allocation12_spill] sm:$0xff] }
 0x16e   :  { %v8865_v25 = vor.u32 %v10705_v21, %v8601_v37  ;;  %v3123_v26 = vsel %vm10495_vm10, %v3118_v15, %v3122_v54  ;;  %v2078_v21 = vrot.slane %v2076_v20, 4  ;;  %v1781_v10 = vadd.f32 %v8409_v6, %v1756_v30  ;;  %6569 = vmatprep.subr.bf16.mxu0 %v10696_v17  ;;  %v1375_v15 = vpop.f32.mrf.mxu0 }
 0x16f   :  { %5994 = vst [vmem:[#allocation2 + $0x30] sm:$0xff] %v5927_v16   ;;  %v1757_v57 = vadd.f32 %v8733_v42, %v1403_v53  ;;  %6634 = vmatmul.mubr.bf16.gmra.mxu1 %v3123_v26  ;;  %v8885_v46 = vld [vmem:[#allocation2 + $0x28] sm:$0xf]  ;;  %v8889_v20 = vpop.f32.mrf.mxu1  ;;  %v3449_v18 = vrot.slane %v3447_v7, 3  ;;  %v3452_v24 = vrot.slane %v3450_v22, 4  ;;  %v10708_v16 = vld [vmem:[#allocation11_spill] sm:$0xff] }
 0x170   :  { %v8887_v27 = vld [vmem:[#allocation2 + $0x28] sm:$0xf]  ;;  %v8892_v23 = vor.u32 %v2078_v21, %v2075_v5  ;;  %6637 = vmatprep.mubr.msk.bf16.mxu1 %vm10575_vm0, %v10696_v17  ;;  %v3020_v42 = vsel %vm10487_vm8, %v8885_v46, 0  ;;  %v8899_v30 = vld [vmem:[#allocation2 + $0x2c] sm:$0xf]  ;;  %vm10709_vm7 = vnez %v10708_v16  ;;  %6722 = vmatpush3.bf16.msra.mxu1 %v7070_v39  ;;  %v7072_v7 = vld [vmem:[%s10373_s3 + $0x110] sm:$0xff]   ;;  %vm10712_vm8 = vnez %v10711_v11  ;;  %v6395_v22 = vpop.f32.mrf.mxu0 }
 0x171   :  { %10706 = vst [vmem:[#allocation43_spill] sm:$0xff] %v8887_v27  ;;  %10707 = vst [vmem:[#allocation44_spill] sm:$0xff] %v8899_v30  ;;  %v1964_v53 = vsel %vm10709_vm7, %v8887_v27, 0  ;;  %v1782_v5 = vadd.f32 %v8409_v6, %v1757_v57  ;;  %v10710_v26 = vld [vmem:[#allocation21_spill] sm:$0xff]  ;;  %v8911_v49 = vcombine.low %v3019_v8, %v3020_v42  ;;  %v1965_v31 = vsel %vm10712_vm8, %v8899_v30, 0  ;;  %v6452_v3 = vpop.f32.mrf.mxu1  ;;  %6723 = vmatprep.subr.bf16.mxu1 %v10696_v17  ;;  %v7071_v8 = vld [vmem:[%s10373_s3 + $0x40] sm:$0xff]  }
 0x172   :  { %v1404_v21 = vadd.f32 %v1375_v15, %v10710_v26  ;;  %v8916_v62 = vld [vmem:[#allocation2 + $0x2c] sm:$0xf]  ;;  %v2080_v39 = vsel %vm10704_vm12, %v8824_v14, %v8892_v23  ;;  %v3124_v57 = vshrl.u32 %v8828_v40, 16  ;;  %v5545_v27 = vcombine.low %v1964_v53, %v1965_v31  ;;  %6570 = vmatpush3.bf16.msra.mxu0 %v7067_v4  ;;  %v1378_v31 = vpop.f32.mrf.mxu0  ;;  %v10714_v22 = vld [vmem:[#allocation38_spill] sm:$0xff] }
 0x173   :  { %v1799_v15 = vmax.f32 %v1781_v10, 0.0  ;;  %v1800_v42 = vmax.f32 %v1782_v5, 0.0  ;;  %v3128_v2 = vshll.u32 %v8911_v49, 16  ;;  %6571 = vmatprep.subr.bf16.mxu0 %v10696_v17  ;;  %v8931_v14 = vpop.f32.mrf.mxu1  ;;  %v10715_v5 = vld [vmem:[#allocation22_spill] sm:$0xff]  ;;  %vm10720_vm10 = vsmask.f32 7424 }
 0x174   :  { %v1758_v26 = vadd.f32 %v8770_v36, %v1404_v21  ;;  %6482 = vmatmul.mubr.bf16.gmra.mxu0 %v2080_v39  ;;  %10713 = vst [vmem:[#allocation11_spill] sm:$0xff] %v8931_v14  ;;  %v3126_v40 = vor.u32 %v3124_v57, %v3122_v54  ;;  %v2082_v4 = vshrl.u32 %v5545_v27, 16  ;;  %v2085_v53 = vshll.u32 %v5545_v27, 16  ;;  %6724 = vmatpush3.bf16.msra.mxu1 %v7072_v7  ;;  %v7073_v27 = vld [vmem:[%s10373_s3 + $0x108] sm:$0xff]   ;;  %v6396_v7 = vpop.f32.mrf.mxu0  ;;  %v10727_v14 = vld [vmem:[#allocation24_spill] sm:$0xff] }
 0x175   :  { %6485 = vmatprep.mubr.msk.bf16.mxu0 %vm10575_vm0, %v10696_v17  ;;  %v8937_v36 = vor.u32 %v3452_v24, %v3449_v18  ;;  %v5932_v10 = vpack.c.bf16 %v1800_v42, %v1799_v15  ;;  %v1405_v21 = vadd.f32 %v1378_v31, %v10715_v5  ;;  %v3130_v39 = vrot.slane %v3128_v2, 1  ;;  %6725 = vmatprep.subr.bf16.mxu1 %v10696_v17  ;;  %v6523_v57 = vpop.f32.mrf.mxu1  ;;  %v7117_v11 = vld [vmem:[%s10373_s3 + $0x148] sm:$0xff]  }
 0x176   :  { %v3021_v54 = vsel %vm10496_vm2, %v8916_v62, 0  ;;  %v1783_v3 = vadd.f32 %v8409_v6, %v1758_v26  ;;  %v2084_v18 = vrot.slane %v2082_v4, 3  ;;  %v2087_v24 = vrot.slane %v2085_v53, 4  ;;  %v8948_v15 = vld [vmem:[#allocation2 + $0x30] sm:$0xf]  ;;  %6572 = vmatpush3.bf16.msra.mxu0 %v7071_v8  ;;  %vm10718_vm2 = vmmov %vm10704_vm12 }
 0x177   :  { %v8950_v42 = vld [vmem:[#allocation2 + $0x30] sm:$0xf]  ;;  %v10717_v2 = vor.u32 %v8820_v45, %v8806_v13  ;;  %5995 = vst [vmem:[#allocation2 + $0x38] sm:$0xff] %v5932_v10   ;;  %v1759_v5 = vadd.f32 %v8817_v28, %v1405_v21  ;;  %v3131_v26 = vsel %vm10720_vm10, %v3126_v40, %v3130_v39  ;;  %vm10721_vm12 = vcmp.ne.s16.totalorder %v8579_v56, 0  ;;  %v8964_v53 = vld [vmem:[#allocation2 + $0x34] sm:$0xf]  ;;  %6661 = vmatprep.subr.bf16.mxu0 %v10696_v17  ;;  %v8968_v57 = vpop.f32.mrf.mxu1  ;;  %v1383_v13 = vpop.f32.mrf.mxu0 }
 0x178   :  { %10716 = vst [vmem:[#allocation21_spill] sm:$0xff] %v8950_v42  ;;  %v3022_v4 = vsel %vm10721_vm12, %v8948_v15, 0  ;;  %10722 = vst [vmem:[#allocation22_spill] sm:$0xff] %v8964_v53  ;;  %6638 = vmatmul.mubr.bf16.gmra.mxu1 %v3131_v26  ;;  %v8970_v45 = vor.u32 %v2087_v24, %v2084_v18  ;;  %v10724_v28 = vld [vmem:[#allocation13_spill] sm:$0xff]  ;;  %v8977_v21 = vld [vmem:[#allocation2 + $0x34] sm:$0xf] }
 0x179   :  { %v8957_v31 = vsel %vm10718_vm2, %v10717_v2, %v8937_v36  ;;  %10723 = vst [vmem:[#allocation45_spill] sm:$0xff] %v8968_v57  ;;  %v8972_v10 = vcombine.low %v3021_v54, %v3022_v4  ;;  %vm10725_vm2 = vnez %v10724_v28  ;;  %v10726_v7 = vshrl.u32 %v8790_v1, 16  ;;  %6641 = vmatprep.mubr.msk.bf16.mxu1 %vm10575_vm0, %v10696_v17  ;;  %v10728_v18 = vld [vmem:[#allocation14_spill] sm:$0xff]  ;;  %6726 = vmatpush3.bf16.msra.mxu1 %v7073_v27  ;;  %v7076_v26 = vld [vmem:[%s10373_s3 + $0x100] sm:$0xff]   ;;  %v6524_v4 = vpop.f32.mrf.mxu1 }
 0x17a   :  { %10719 = vst [vmem:[#allocation12_spill] sm:$0xff] %v8957_v31  ;;  %v1966_v40 = vsel %vm10725_vm2, %v8950_v42, 0  ;;  %v1784_v8 = vadd.f32 %v8409_v6, %v1759_v5  ;;  %v1406_v57 = vadd.f32 %v1383_v13, %v10727_v14  ;;  %v3132_v54 = vshrl.u32 %v8911_v49, 16  ;;  %v6399_v31 = vpop.f32.mrf.mxu0  ;;  %6727 = vmatprep.subr.bf16.mxu1 %v10696_v17 }
 0x17b   :  { %v8981_v2 = vrot.slane %v10726_v7, 7  ;;  %vm10729_vm10 = vnez %v10728_v18  ;;  %v1801_v7 = vmax.f32 %v1783_v3, 0.0  ;;  %vm10730_vm12 = vsmask.f32 4352  ;;  %v9005_v31 = vpop.f32.mrf.mxu1  ;;  %v7125_v18 = vld [vmem:[%s10373_s3 + $0x200] sm:$0xff]  }
 0x17c   :  { %v1967_v24 = vsel %vm10729_vm10, %v8964_v53, 0  ;;  %v2089_v14 = vsel %vm10730_vm12, %v8892_v23, %v8970_v45  ;;  %v3136_v5 = vshll.u32 %v8972_v10, 16  ;;  %v1802_v49 = vmax.f32 %v1784_v8, 0.0  ;;  %10731 = vst [vmem:[#allocation13_spill] sm:$0xff] %v9005_v31  ;;  %v1386_v23 = vpop.f32.mrf.mxu0 }
 0x17d   :  { %v5546_v13 = vcombine.low %v1966_v40, %v1967_v24  ;;  %v1760_v27 = vadd.f32 %v8855_v63, %v1406_v57  ;;  %6486 = vmatmul.mubr.bf16.gmra.mxu0 %v2089_v14  ;;  %v3134_v56 = vor.u32 %v3132_v54, %v3130_v39  ;;  %v10732_v57 = vld [vmem:[#allocation27_spill] sm:$0xff]  ;;  %v2987_v4 = vshll.u32 %v8790_v1, 16  ;;  %6728 = vmatpush3.bf16.msra.mxu1 %v7076_v26  ;;  %v6527_v42 = vpop.f32.mrf.mxu1 }
 0x17e   :  { %v3138_v33 = vrot.slane %v3136_v5, 1  ;;  %6489 = vmatprep.mubr.msk.bf16.mxu0 %vm10575_vm0, %v10696_v17  ;;  %v5937_v8 = vpack.c.bf16 %v1802_v49, %v1801_v7  ;;  %v1407_v14 = vadd.f32 %v1386_v23, %v10732_v57  ;;  %v6400_v3 = vpop.f32.mrf.mxu0  ;;  %vm10733_vm12 = vsmask.f32 7424  ;;  %v9013_v54 = vld [vmem:[#allocation2 + $0x38] sm:$0xf]  ;;  %6817 = vmatprep.subr.bf16.mxu1 %v10696_v17 }
 0x17f   :  { %v2091_v40 = vshrl.u32 %v5546_v13, 16  ;;  %v2094_v24 = vshll.u32 %v5546_v13, 16  ;;  %v1785_v63 = vadd.f32 %v8409_v6, %v1760_v27  ;;  %v9015_v5 = vld [vmem:[#allocation2 + $0x38] sm:$0xf]  ;;  %v10735_v7 = vrot.slane %v8539_v51, 4  ;;  %v10740_v51 = vld [vmem:[#allocation16_spill] sm:$0xff]  ;;  %v9037_v49 = vpop.f32.mrf.mxu1 }
 0x180   :  { %v3139_v31 = vsel %vm10733_vm12, %v3134_v56, %v3138_v33  ;;  %10734 = vst [vmem:[#allocation24_spill] sm:$0xff] %v9015_v5  ;;  %5996 = vst [vmem:[#allocation2 + $0x40] sm:$0xff] %v5937_v8   ;;  %v1761_v1 = vadd.f32 %v8889_v20, %v1407_v14  ;;  %vm10737_vm12 = vcmp.ne.s16.totalorder %v10714_v22, 0  ;;  %vm10738_vm1 = vcmp.ne.s16.totalorder %v8647_v34, 0  ;;  %v9032_v26 = vld [vmem:[#allocation2 + $0x3c] sm:$0xf] }
 0x181   :  { %v2093_v30 = vrot.slane %v2091_v40, 3  ;;  %v2096_v39 = vrot.slane %v2094_v24, 4  ;;  %v9022_v13 = vsel %vm8258_vm4, %v10735_v7, %v8865_v25  ;;  %v3023_v56 = vsel %vm10737_vm12, %v8977_v21, 0  ;;  %10739 = vst [vmem:[#allocation27_spill] sm:$0xff] %v9032_v26  ;;  %10742 = vst [vmem:[#allocation16_spill] sm:$0xff] %v9037_v49  ;;  %6642 = vmatmul.mubr.bf16.gmra.mxu1 %v3139_v31  ;;  %v10743_v20 = vld [vmem:[#allocation17_spill] sm:$0xff] }
 0x182   :  { %10736 = vst [vmem:[#allocation14_spill] sm:$0xff] %v9022_v13  ;;  %v3024_v42 = vsel %vm10738_vm1, %v9013_v54, 0  ;;  %vm10741_vm5 = vnez %v10740_v51  ;;  %vm10744_vm3 = vnez %v10743_v20  ;;  %v9042_v40 = vld [vmem:[#allocation2 + $0x3c] sm:$0xf]  ;;  %v1786_v8 = vadd.f32 %v8409_v6, %v1761_v1  ;;  %6645 = vmatprep.mubr.msk.bf16.mxu1 %vm10575_vm0, %v10696_v17 }
 0x183   :  { %v1968_v25 = vsel %vm10741_vm5, %v9015_v5, 0  ;;  %v2097_v27 = vor.u32 %v2096_v39, %v2093_v30  ;;  %v5630_v3 = vcombine.low %v3023_v56, %v3024_v42  ;;  %v1969_v23 = vsel %vm10744_vm3, %v9032_v26, 0  ;;  %v6528_v39 = vpop.f32.mrf.mxu1 }
 0x184   :  { %v5547_v57 = vcombine.low %v1968_v25, %v1969_v23  ;;  %v10745_v31 = vshll.u32 %v8548_v38, 16  ;;  %vm10746_vm1 = vsmask.f32 4352  ;;  %v3140_v56 = vshrl.u32 %v8972_v10, 16  ;;  %v9060_v38 = vld [vmem:[#allocation2 + $0x18] sm:$0xf] }
 0x185   :  { %v2098_v7 = vsel %vm10746_vm1, %v8970_v45, %v2097_v27  ;;  %v3144_v42 = vshll.u32 %v5630_v3, 16  ;;  %v1803_v6 = vmax.f32 %v1785_v63, 0.0  ;;  %v1804_v1 = vmax.f32 %v1786_v8, 0.0  ;;  %v9058_v24 = vpop.f32.mrf.mxu1 }
 0x186   :  { %v2980_v30 = vor.u32 %v10745_v31, %v8611_v50  ;;  %6490 = vmatmul.mubr.bf16.gmra.mxu0 %v2098_v7  ;;  %v2100_v25 = vshrl.u32 %v5547_v57, 16  ;;  %v2103_v23 = vshll.u32 %v5547_v57, 16  ;;  %10747 = vst [vmem:[#allocation17_spill] sm:$0xff] %v9058_v24  ;;  %v3142_v31 = vor.u32 %v3140_v56, %v3138_v33  ;;  %v9069_v7 = vld [vmem:[#allocation2 + $0x14] sm:$0xf] }
 0x187   :  { %v3146_v14 = vrot.slane %v3144_v42, 1  ;;  %6493 = vmatprep.mubr.msk.bf16.mxu0 %vm10575_vm0, %v10696_v17  ;;  %v2982_v45 = vrot.slane %v8611_v50, 4  ;;  %v2989_v10 = vor.u32 %v2987_v4, %v8981_v2  ;;  %v5942_v39 = vpack.c.bf16 %v1804_v1, %v1803_v6  ;;  %v6531_v57 = vpop.f32.mrf.mxu1  ;;  %v9072_v56 = vld [vmem:[#allocation2 + $0x40] sm:$0xf]  ;;  %v9076_v24 = vld [vmem:[#allocation2 + $0x44] sm:$0xf] }
 0x188   :  { %v2102_v49 = vrot.slane %v2100_v25, 3  ;;  %v2105_v63 = vrot.slane %v2103_v23, 4  ;;  %vm10748_vm1 = vcmp.ne.s16.totalorder %v8651_v19, 0  ;;  %vm10749_vm12 = vsmask.f32 7424  ;;  %10751 = vst [vmem:[#allocation47_spill] sm:$0xff] %v9076_v24 }
 0x189   :  { %v3025_v8 = vsel %vm10748_vm1, %v9042_v40, 0  ;;  %v3147_v33 = vsel %vm10749_vm12, %v3142_v31, %v3146_v14  ;;  %v9074_v42 = vld [vmem:[#allocation2 + $0x40] sm:$0xf]  ;;  %v10752_v50 = vrot.slane %v8601_v37, 4  ;;  %5997 = vst [vmem:[#allocation2 + $0x48] sm:$0xff] %v5942_v39   ;;  %vm10754_vm12 = vcmp.ne.s16.totalorder %v9022_v13, 0 }
 0x18a   :  { %10750 = vst [vmem:[#allocation46_spill] sm:$0xff] %v9074_v42  ;;  %v2106_v1 = vor.u32 %v2105_v63, %v2102_v49  ;;  %v3026_v25 = vsel %vm10754_vm12, %v9072_v56, 0  ;;  %v10755_v23 = vld [vmem:[#allocation18_spill] sm:$0xff]  ;;  %v10757_v57 = vld [vmem:[#allocation20_spill] sm:$0xff]  ;;  %6646 = vmatmul.mubr.bf16.gmra.mxu1 %v3147_v33  ;;  %v9101_v49 = vsel %vm8258_vm4, %v2982_v45, %v2989_v10  ;;  %vm10761_vm12 = vsmask.f32 4352 }
 0x18b   :  { %v9082_v4 = vsel %vm8258_vm4, %v10752_v50, %v2980_v30  ;;  %vm10756_vm1 = vnez %v10755_v23  ;;  %vm10758_vm3 = vnez %v10757_v57  ;;  %v9095_v5 = vld [vmem:[#allocation2 + $0x44] sm:$0xf]  ;;  %v9097_v30 = vpop.f32.mrf.mxu1  ;;  %v5631_v50 = vcombine.low %v3025_v8, %v3026_v25  ;;  %10760 = vst [vmem:[#allocation20_spill] sm:$0xff] %v9101_v49  ;;  %6649 = vmatprep.mubr.msk.bf16.mxu1 %vm10575_vm0, %v10696_v17  ;;  %v9669_v23 = vld [vmem:[#allocation2 + $0x50] sm:$0xf] }
 0x18c   :  { %10753 = vst [vmem:[#allocation48_spill] sm:$0xff] %v9082_v4  ;;  %v1970_v31 = vsel %vm10756_vm1, %v9074_v42, 0  ;;  %v1971_v37 = vsel %vm10758_vm3, %v9076_v24, 0  ;;  %10759 = vst [vmem:[#allocation18_spill] sm:$0xff] %v9097_v30  ;;  %v2107_v6 = vsel %vm10761_vm12, %v2097_v27, %v2106_v1  ;;  %v3148_v53 = vshrl.u32 %v5630_v3, 16 }
 0x18d   :  { %v5548_v39 = vcombine.low %v1970_v31, %v1971_v37  ;;  %vm10522_vm3 = vcmp.ne.s16.totalorder %v9082_v4, 0  ;;  %v6532_v8 = vpop.f32.mrf.mxu1  ;;  %v3152_v25 = vshll.u32 %v5631_v50, 16  ;;  %v2991_v45 = vrot.slane %v8981_v2, 4 }
 0x18e   :  { %6494 = vmatmul.mubr.bf16.gmra.mxu0 %v2107_v6  ;;  %v3150_v10 = vor.u32 %v3148_v53, %v3146_v14  ;;  %v3358_v3 = vsel %vm7399_vm6, %v8679_v0, 0  ;;  %v3359_v37 = vsel %vm7447_vm13, %v8720_v29, 0  ;;  %v3360_v14 = vsel %vm7478_vm15, %v8746_v48, 0 }
 0x18f   :  { %v2109_v31 = vshrl.u32 %v5548_v39, 16  ;;  %v2112_v12 = vshll.u32 %v5548_v39, 16  ;;  %v9113_v27 = vpop.f32.mrf.mxu1  ;;  %v3154_v8 = vrot.slane %v3152_v25, 1  ;;  %6497 = vmatprep.mubr.msk.bf16.mxu0 %vm10575_vm0, %v10696_v17  ;;  %v5660_v6 = vcombine.low %v3358_v3, %v3359_v37 }
 0x190   :  { %10762 = vst [vmem:[#allocation49_spill] sm:$0xff] %v9113_v27  ;;  %v3361_v33 = vsel %vm10698_vm14, %v8802_v41, 0  ;;  %vm10763_vm12 = vsmask.f32 7424  ;;  %v9130_v30 = vld [vmem:[#allocation2 + $0x48] sm:$0xf] }
 0x191   :  { %v2111_v39 = vrot.slane %v2109_v31, 3  ;;  %v2114_v2 = vrot.slane %v2112_v12, 4  ;;  %v6535_v53 = vpop.f32.mrf.mxu1  ;;  %v3155_v63 = vsel %vm10763_vm12, %v3150_v10, %v3154_v8  ;;  %v9132_v25 = vld [vmem:[#allocation2 + $0x48] sm:$0xf]  ;;  %vm9134_vm4 = vcmp.ne.s16.totalorder %v2991_v45, 0  ;;  %v10769_v10 = vld [vmem:[#allocation19_spill] sm:$0xff] }
 0x192   :  { %10764 = vst [vmem:[#allocation50_spill] sm:$0xff] %v9132_v25  ;;  %v10765_v31 = vmov 0  ;;  %v5661_v12 = vcombine.low %v3360_v14, %v3361_v33  ;;  %v3027_v3 = vsel %vm10522_vm3, %v9095_v5, 0  ;;  %vm10768_vm15 = vcmp.ne.s16.totalorder %v9101_v49, 0  ;;  %6650 = vmatmul.mubr.bf16.gmra.mxu1 %v3155_v63 }
 0x193   :  { %v2115_v27 = vor.u32 %v2114_v2, %v2111_v39  ;;  %v10766_v31 = vsel %vm9134_vm4, 4294967295, %v10765_v31  ;;  %v3028_v37 = vsel %vm10768_vm15, %v9130_v30, 0  ;;  %vm10770_vm12 = vcmp.ne.s16.totalorder %v10769_v10, 0  ;;  %v2755_v2 = vld [vmem:[#allocation2 + $0x4c] sm:$0x1]  ;;  %v9149_v53 = vpop.f32.mrf.mxu1  ;;  %6653 = vmatprep.mubr.msk.bf16.mxu1 %vm10575_vm0, %v10696_v17 }
 0x194   :  { %10767 = vst [vmem:[#allocation51_spill] sm:$0xff] %v10766_v31  ;;  %v1972_v39 = vsel %vm10770_vm12, %v9132_v25, 0  ;;  %10771 = vst [vmem:[#allocation52_spill] sm:$0xff] %v9149_v53  ;;  %vm10772_vm14 = vsmask.f32 4352  ;;  %v5632_v14 = vcombine.low %v3027_v3, %v3028_v37  ;;  %v3156_v55 = vshrl.u32 %v5631_v50, 16 }
 0x195   :  { %v2116_v33 = vsel %vm10772_vm14, %v2106_v1, %v2115_v27  ;;  %v5549_v43 = vcombine.low %v1972_v39, %v1972_v39  ;;  %v3456_v60 = vshrl.u32 %v5660_v6, 16  ;;  %v3459_v35 = vshll.u32 %v5660_v6, 16  ;;  %v6536_v42 = vpop.f32.mrf.mxu1  ;;  %vm10776_vm12 = vmmov %vm10772_vm14 }
 0x196   :  { %v3160_v10 = vshll.u32 %v5632_v14, 16  ;;  %v3029_v45 = vsel %vm9134_vm4, %v2755_v2, 0  ;;  %6498 = vmatmul.mubr.bf16.gmra.mxu0 %v2116_v33  ;;  %v3158_v1 = vor.u32 %v3156_v55, %v3154_v8  ;;  %v3465_v24 = vshrl.u32 %v5661_v12, 16 }
 0x197   :  { %v2118_v26 = vshrl.u32 %v5549_v43, 16  ;;  %v2121_v49 = vshll.u32 %v5549_v43, 16  ;;  %v3458_v53 = vrot.slane %v3456_v60, 3  ;;  %v3461_v63 = vrot.slane %v3459_v35, 4  ;;  %v9156_v25 = vpop.f32.mrf.mxu1  ;;  %6501 = vmatprep.mubr.msk.bf16.mxu0 %vm10575_vm0, %v10696_v17 }
 0x198   :  { %10773 = vst [vmem:[#allocation53_spill] sm:$0xff] %v9156_v25  ;;  %v3162_v3 = vrot.slane %v3160_v10, 1  ;;  %v5633_v6 = vcombine.low %v3029_v45, %v3029_v45  ;;  %vm10774_vm15 = vsmask.f32 7424  ;;  %v3467_v35 = vrot.slane %v3465_v24, 3 }
 0x199   :  { %v2120_v50 = vrot.slane %v2118_v26, 3  ;;  %v2123_v37 = vrot.slane %v2121_v49, 4  ;;  %v3462_v42 = vor.u32 %v3461_v63, %v3458_v53  ;;  %v6539_v39 = vpop.f32.mrf.mxu1  ;;  %v3468_v2 = vshll.u32 %v5661_v12, 16 }
 0x19a   :  { %v3163_v43 = vsel %vm10774_vm15, %v3158_v1, %v3162_v3  ;;  %v3164_v26 = vshrl.u32 %v5632_v14, 16  ;;  %v3168_v49 = vshll.u32 %v5633_v6, 16  ;;  %v3363_v53 = vsel %vm10703_vm11, %v8885_v46, 0  ;;  %vm10778_vm15 = vmmov %vm10776_vm12 }
 0x19b   :  { %v2124_v31 = vor.u32 %v2123_v37, %v2120_v50  ;;  %v9163_v60 = vsel %vm10772_vm14, %v8937_v36, %v3462_v42  ;;  %v9165_v55 = vpop.f32.mrf.mxu1  ;;  %6654 = vmatmul.mubr.bf16.gmra.mxu1 %v3163_v43  ;;  %v3470_v10 = vrot.slane %v3468_v2, 4  ;;  %v3364_v36 = vsel %vm10709_vm7, %v8916_v62, 0 }
 0x19c   :  { %10775 = vst [vmem:[#allocation54_spill] sm:$0xff] %v9165_v55  ;;  %6657 = vmatprep.mubr.msk.bf16.mxu1 %vm10575_vm0, %v10696_v17  ;;  %v3166_v24 = vor.u32 %v3164_v26, %v3162_v3  ;;  %v3365_v14 = vsel %vm10712_vm8, %v8948_v15, 0  ;;  %v3170_v63 = vrot.slane %v3168_v49, 1  ;;  %vm10779_vm14 = vsmask.f32 7424 }
 0x19d   :  { %v2125_v8 = vsel %vm10776_vm12, %v2115_v27, %v2124_v31  ;;  %v6540_v45 = vpop.f32.mrf.mxu1  ;;  %v3471_v12 = vor.u32 %v3470_v10, %v3467_v35  ;;  %v3362_v27 = vsel %vm10702_vm9, %v8833_v52, 0  ;;  %v5663_v50 = vcombine.low %v3364_v36, %v3365_v14  ;;  %v7142_v10 = vld [vmem:[#allocation2 + $0x4] sm:$0xf] }
 0x19e   :  { %6502 = vmatmul.mubr.bf16.gmra.mxu0 %v2125_v8  ;;  %v5662_v31 = vcombine.low %v3362_v27, %v3363_v53  ;;  %v3171_v39 = vsel %vm10779_vm14, %v3166_v24, %v3170_v63  ;;  %v7075_v8 = vld [vmem:[%s10373_s3 + $0xf8] sm:$0xff]   ;;  %v3367_v14 = vsel %vm10729_vm10, %v9013_v54, 0  ;;  %vm10783_vm14 = vnez %v10743_v20 }
 0x19f   :  { %v9176_v33 = vpop.f32.mrf.mxu1  ;;  %6573 = vmatprep.mubr.msk.bf16.mxu0 %vm10575_vm0, %v10696_v17  ;;  %v9187_v1 = vsel %vm10778_vm15, %v3462_v42, %v3471_v12  ;;  %v3483_v35 = vshrl.u32 %v5663_v50, 16  ;;  %v3486_v2 = vshll.u32 %v5663_v50, 16  ;;  %v7143_v42 = vld [vmem:[#allocation2 + $0x8] sm:$0xf]  ;;  %vm10782_vm15 = vmmov %vm10776_vm12 }
 0x1a0   :  { %10777 = vst [vmem:[#allocation55_spill] sm:$0xff] %v9176_v33  ;;  %v3474_v37 = vshrl.u32 %v5662_v31, 16  ;;  %v3477_v6 = vshll.u32 %v5662_v31, 16  ;;  %v5591_v45 = vcombine.low %v7142_v10, %v7143_v42  ;;  %v3366_v31 = vsel %vm10725_vm2, %v8977_v21, 0 }
 0x1a1   :  { %v6543_v3 = vpop.f32.mrf.mxu1  ;;  %v3485_v36 = vrot.slane %v3483_v35, 3  ;;  %v3488_v24 = vrot.slane %v3486_v2, 4  ;;  %v5664_v50 = vcombine.low %v3366_v31, %v3367_v14  ;;  %v10813_v33 = vcombine.low %v8802_v41, %v8833_v52  ;;  %v10818_v41 = vld [vmem:[#allocation34_spill] sm:$0xff] }
 0x1a2   :  { %v3476_v26 = vrot.slane %v3474_v37, 3  ;;  %v3479_v49 = vrot.slane %v3477_v6, 4  ;;  %v7079_v37 = vld [vmem:[%s10373_s3 + $0xf0] sm:$0xff]   ;;  %vm10819_vm4 = vcmp.ne.s16.totalorder %v10818_v41, 0 }
 0x1a3   :  { %v9190_v43 = vpop.f32.mrf.mxu1  ;;  %6658 = vmatmul.mubr.bf16.gmra.mxu1 %v3171_v39  ;;  %v3489_v3 = vor.u32 %v3488_v24, %v3485_v36  ;;  %v3492_v2 = vshrl.u32 %v5664_v50, 16  ;;  %v10786_v36 = vld [vmem:[#allocation39_spill] sm:$0xff] }
 0x1a4   :  { %10780 = vst [vmem:[#allocation56_spill] sm:$0xff] %v9190_v43  ;;  %6729 = vmatprep.mubr.msk.bf16.mxu1 %vm10575_vm0, %v10696_v17  ;;  %v3480_v27 = vor.u32 %v3479_v49, %v3476_v26  ;;  %v3495_v26 = vshll.u32 %v5664_v50, 16  ;;  %v3368_v49 = vsel %vm10741_vm5, %v9042_v40, 0 }
 0x1a5   :  { %v6544_v53 = vpop.f32.mrf.mxu1  ;;  %v3494_v42 = vrot.slane %v3492_v2, 3  ;;  %v7095_v2 = vld [vmem:[%s10373_s3 + $0x1b0] sm:$0xff]  }
 0x1a6   :  { %6574 = vmatmul.mubr.bf16.vlgmr.msra.gmra.mxu0 %v5591_v45  ;;  %v9211_v6 = vsel %vm10776_vm12, %v3471_v12, %v3480_v27  ;;  %v9215_v35 = vsel %vm10782_vm15, %v3480_v27, %v3489_v3  ;;  %v3369_v12 = vsel %vm10783_vm14, %v9072_v56, 0  ;;  %v10785_v53 = vld [vmem:[#allocation36_spill] sm:$0xff]  ;;  %v7082_v27 = vld [vmem:[%s10373_s3 + $0xe8] sm:$0xff]   ;;  %v3497_v31 = vrot.slane %v3495_v26, 4 }
 0x1a7   :  { %v9203_v63 = vpop.f32.mrf.mxu1  ;;  %6662 = vmatpush3.bf16.msra.mxu0 %v7075_v8  ;;  %6577 = vmatprep.mubr.msk.bf16.mxu0 %vm10575_vm0, %v10696_v17  ;;  %v7093_v8 = vld [vmem:[%s10373_s3 + $0x1b8] sm:$0xff]   ;;  %v5665_v45 = vcombine.low %v3368_v49, %v3369_v12  ;;  %v10787_v24 = vcombine.low %v10785_v53, %v10786_v36  ;;  %vm10790_vm15 = vnez %v10757_v57 }
 0x1a8   :  { %10781 = vst [vmem:[#allocation57_spill] sm:$0xff] %v9203_v63  ;;  %6663 = vmatprep.subr.bf16.mxu0 %v10696_v17  ;;  %v3498_v49 = vor.u32 %v3497_v31, %v3494_v42 }
 0x1a9   :  { %v6547_v39 = vpop.f32.mrf.mxu1  ;;  %v3501_v50 = vshrl.u32 %v5665_v45, 16 }
 0x1aa   :  { %v3504_v39 = vshll.u32 %v5665_v45, 16  ;;  %v9252_v42 = vsel %vm10776_vm12, %v3489_v3, %v3498_v49  ;;  %v9265_v3 = vld [vmem:[#allocation2 + $0x10] sm:$0xf] }
 0x1ab   :  { %v9226_v10 = vpop.f32.mrf.mxu1  ;;  %6730 = vmatmul.mubr.bf16.vlgmr.msra.gmra.mxu1 %v10787_v24  ;;  %6664 = vmatpush3.bf16.msra.mxu0 %v7079_v37  ;;  %v10788_v37 = vcombine.low %v8573_v9, %v8639_v61  ;;  %v3503_v12 = vrot.slane %v3501_v50, 3  ;;  %v3370_v9 = vsel %vm10756_vm1, %v9095_v5, 0  ;;  %v3371_v61 = vsel %vm10790_vm15, %v9130_v30, 0 }
 0x1ac   :  { %10784 = vst [vmem:[#allocation58_spill] sm:$0xff] %v9226_v10  ;;  %6733 = vmatprep.mubr.msk.bf16.mxu1 %vm10575_vm0, %v10696_v17  ;;  %6665 = vmatprep.subr.bf16.mxu0 %v10696_v17  ;;  %v3506_v53 = vrot.slane %v3504_v39, 4  ;;  %v5666_v24 = vcombine.low %v3370_v9, %v3371_v61  ;;  %v7100_v9 = vld [vmem:[%s10373_s3 + $0x1a0] sm:$0xff]  }
 0x1ad   :  { %v6548_v14 = vpop.f32.mrf.mxu1  ;;  %6818 = vmatpush3.bf16.msra.mxu1 %v7093_v8  ;;  %v7085_v8 = vld [vmem:[%s10373_s3 + $0xe0] sm:$0xff]  }
 0x1ae   :  { %6578 = vmatmul.mubr.bf16.gmra.mxu0 %v10788_v37  ;;  %6819 = vmatprep.subr.bf16.mxu1 %v10696_v17  ;;  %v3507_v36 = vor.u32 %v3506_v53, %v3503_v12  ;;  %v3510_v50 = vshrl.u32 %v5666_v24, 16  ;;  %v3513_v39 = vshll.u32 %v5666_v24, 16  ;;  %v10792_v37 = vcombine.low %v8637_v47, %v8679_v0  ;;  %v10793_v47 = vld [vmem:[#allocation26_spill] sm:$0xff] }
 0x1af   :  { %v9244_v26 = vpop.f32.mrf.mxu1  ;;  %6581 = vmatprep.mubr.msk.bf16.mxu0 %vm10575_vm0, %v10696_v17  ;;  %6666 = vmatpush3.bf16.msra.mxu0 %v7082_v27  ;;  %v7098_v27 = vld [vmem:[%s10373_s3 + $0x1a8] sm:$0xff]  }
 0x1b0   :  { %10789 = vst [vmem:[#allocation36_spill] sm:$0xff] %v9244_v26  ;;  %6667 = vmatprep.subr.bf16.mxu0 %v10696_v17  ;;  %v9270_v14 = vsel %vm10776_vm12, %v3498_v49, %v3507_v36  ;;  %v3512_v53 = vrot.slane %v3510_v50, 3  ;;  %v3515_v49 = vrot.slane %v3513_v39, 4  ;;  %vm10794_vm12 = vcmp.ne.s16.totalorder %v10793_v47, 0  ;;  %v7091_v39 = vld [vmem:[%s10373_s3 + $0xd0] sm:$0xff]  }
 0x1b1   :  { %v6551_v45 = vpop.f32.mrf.mxu1  ;;  %6820 = vmatpush3.bf16.msra.mxu1 %v7095_v2  ;;  %v7088_v2 = vld [vmem:[%s10373_s3 + $0xd8] sm:$0xff]   ;;  %v3970_v0 = vsel %vm10794_vm12, %v9265_v3, 0  ;;  %vm10800_vm12 = vsmask.f32 4352 }
 0x1b2   :  { %6821 = vmatprep.subr.bf16.mxu1 %v10696_v17  ;;  %v9293_v24 = vor.u32 %v3515_v49, %v3512_v53  ;;  %v7102_v49 = vld [vmem:[%s10373_s3 + $0x198] sm:$0xff]  }
 0x1b3   :  { %v9267_v31 = vpop.f32.mrf.mxu1  ;;  %6734 = vmatmul.mubr.bf16.gmra.mxu1 %v10792_v37  ;;  %6668 = vmatpush3.bf16.msra.mxu0 %v7085_v8  ;;  %v10795_v8 = vld [vmem:[#allocation15_spill] sm:$0xff] }
 0x1b4   :  { %10791 = vst [vmem:[#allocation39_spill] sm:$0xff] %v9267_v31  ;;  %6737 = vmatprep.mubr.msk.bf16.mxu1 %vm10575_vm0, %v10696_v17  ;;  %6669 = vmatprep.subr.bf16.mxu0 %v10696_v17  ;;  %v10796_v61 = vcombine.low %v8641_v32, %v10795_v8  ;;  %v9304_v37 = vld [vmem:[#allocation2 + $0x1c] sm:$0xf]  ;;  %v9308_v53 = vsel %vm10800_vm12, %v3507_v36, %v9293_v24  ;;  %v7097_v36 = vld [vmem:[%s10373_s3 + $0xc8] sm:$0xff]  }
 0x1b5   :  { %v6552_v12 = vpop.f32.mrf.mxu1  ;;  %6822 = vmatpush3.bf16.msra.mxu1 %v7098_v27  ;;  %v10798_v27 = vld [vmem:[#allocation28_spill] sm:$0xff]  ;;  %v10807_v31 = vld [vmem:[#allocation41_spill] sm:$0xff] }
 0x1b6   :  { %6582 = vmatmul.mubr.bf16.gmra.mxu0 %v10796_v61  ;;  %6823 = vmatprep.subr.bf16.mxu1 %v10696_v17  ;;  %vm10799_vm3 = vcmp.ne.s16.totalorder %v10798_v27, 0  ;;  %v10808_v26 = vcombine.low %v8728_v59, %v10807_v31  ;;  %v10811_v59 = vld [vmem:[#allocation32_spill] sm:$0xff]  ;;  %v7107_v31 = vld [vmem:[%s10373_s3 + $0x188] sm:$0xff]  }
 0x1b7   :  { %v9291_v45 = vpop.f32.mrf.mxu1  ;;  %v3971_v50 = vsel %vm10799_vm3, %v9069_v7, 0  ;;  %6585 = vmatprep.mubr.msk.bf16.mxu0 %vm10575_vm0, %v10696_v17  ;;  %6670 = vmatpush3.bf16.msra.mxu0 %v7088_v2 }
 0x1b8   :  { %10797 = vst [vmem:[#allocation26_spill] sm:$0xff] %v9291_v45  ;;  %v5726_v32 = vcombine.low %v3970_v0, %v3971_v50  ;;  %6671 = vmatprep.subr.bf16.mxu0 %v10696_v17  ;;  %v10802_v0 = vld [vmem:[#allocation29_spill] sm:$0xff]  ;;  %v10804_v50 = vcombine.low %v8720_v29, %v8746_v48  ;;  %v7105_v29 = vld [vmem:[%s10373_s3 + $0x190] sm:$0xff]   ;;  %v9336_v48 = vld [vmem:[#allocation2 + $0x24] sm:$0xf] }
 0x1b9   :  { %v6555_v12 = vpop.f32.mrf.mxu1  ;;  %6824 = vmatpush3.bf16.msra.mxu1 %v7100_v9  ;;  %vm10803_vm3 = vcmp.ne.s16.totalorder %v10802_v0, 0  ;;  %v10805_v9 = vld [vmem:[#allocation30_spill] sm:$0xff] }
 0x1ba   :  { %v4060_v2 = vshll.u32 %v5726_v32, 16  ;;  %6825 = vmatprep.subr.bf16.mxu1 %v10696_v17  ;;  %v3972_v61 = vsel %vm10803_vm3, %v9060_v38, 0  ;;  %vm10806_vm12 = vcmp.ne.s16.totalorder %v10805_v9, 0 }
 0x1bb   :  { %v9314_v8 = vpop.f32.mrf.mxu1  ;;  %6738 = vmatmul.mubr.bf16.gmra.mxu1 %v10804_v50  ;;  %6672 = vmatpush3.bf16.msra.mxu0 %v7091_v39  ;;  %v3973_v12 = vsel %vm10806_vm12, %v9304_v37, 0  ;;  %vm10812_vm12 = vcmp.ne.s16.totalorder %v10811_v59, 0 }
 0x1bc   :  { %10801 = vst [vmem:[#allocation15_spill] sm:$0xff] %v9314_v8  ;;  %6741 = vmatprep.mubr.msk.bf16.mxu1 %vm10575_vm0, %v10696_v17  ;;  %6673 = vmatprep.subr.bf16.mxu0 %v10696_v17  ;;  %v9331_v8 = vld [vmem:[#allocation2 + $0x20] sm:$0xf]  ;;  %v9338_v39 = vrot.slane %v4060_v2, 1  ;;  %v5727_v50 = vcombine.low %v3972_v61, %v3973_v12  ;;  %v10809_v2 = vld [vmem:[#allocation31_spill] sm:$0xff] }
 0x1bd   :  { %v6556_v45 = vpop.f32.mrf.mxu1  ;;  %6826 = vmatpush3.bf16.msra.mxu1 %v7102_v49  ;;  %v4064_v49 = vshrl.u32 %v5726_v32, 16  ;;  %vm10810_vm3 = vcmp.ne.s16.totalorder %v10809_v2, 0  ;;  %v9361_v12 = vld [vmem:[#allocation2 + $0x2c] sm:$0xf] }
 0x1be   :  { %6586 = vmatmul.mubr.bf16.gmra.mxu0 %v10808_v26  ;;  %6827 = vmatprep.subr.bf16.mxu1 %v10696_v17  ;;  %v7104_v45 = vld [vmem:[%s10373_s3 + $0xc0] sm:$0xff]   ;;  %v4068_v10 = vshll.u32 %v5727_v50, 16  ;;  %v3974_v61 = vsel %vm10810_vm3, %v9331_v8, 0  ;;  %v3975_v26 = vsel %vm10812_vm12, %v9336_v48, 0  ;;  %vm10814_vm3 = vsmask.f32 7424 }
 0x1bf   :  { %6589 = vmatprep.mubr.msk.bf16.mxu0 %vm10575_vm0, %v10696_v17  ;;  %6674 = vmatpush3.bf16.msra.mxu0 %v7097_v36  ;;  %v9359_v36 = vld [vmem:[#allocation2 + $0x28] sm:$0xf]  ;;  %v4066_v32 = vor.u32 %v4064_v49, %v9338_v39  ;;  %v5728_v43 = vcombine.low %v3974_v61, %v3975_v26  ;;  %v4072_v25 = vshrl.u32 %v5727_v50, 16  ;;  %v3977_v52 = vsel %vm10819_vm4, %v9361_v12, 0  ;;  %v9385_v50 = vld [vmem:[#allocation2 + $0x34] sm:$0xf] }
 0x1c0   :  { %6675 = vmatprep.subr.bf16.mxu0 %v10696_v17  ;;  %v4070_v63 = vrot.slane %v4068_v10, 1  ;;  %v10816_v10 = vld [vmem:[#allocation33_spill] sm:$0xff]  ;;  %vm10825_vm4 = vsmask.f32 7424 }
 0x1c1   :  { %6828 = vmatpush3.bf16.msra.mxu1 %v7105_v29  ;;  %v9368_v29 = vld [vmem:[#allocation2 + $0x30] sm:$0xf]  ;;  %v4076_v2 = vshll.u32 %v5728_v43, 16  ;;  %vm10817_vm12 = vcmp.ne.s16.totalorder %v10816_v10, 0  ;;  %v10823_v10 = vld [vmem:[#allocation35_spill] sm:$0xff] }
 0x1c2   :  { %6829 = vmatprep.subr.bf16.mxu1 %v10696_v17  ;;  %v9371_v55 = vsel %vm10814_vm3, %v4066_v32, %v4070_v63  ;;  %v3976_v49 = vsel %vm10817_vm12, %v9359_v36, 0  ;;  %v10820_v32 = vld [vmem:[#allocation42_spill] sm:$0xff]  ;;  %vm10824_vm3 = vcmp.ne.s16.totalorder %v10823_v10, 0 }
 0x1c3   :  { %6742 = vmatmul.mubr.bf16.gmra.mxu1 %v10813_v33  ;;  %6676 = vmatpush3.bf16.msra.mxu0 %v7104_v45  ;;  %10815 = vst [vmem:[#allocation28_spill] sm:$0xff] %v9371_v55  ;;  %v7109_v33 = vld [vmem:[%s10373_s3 + $0x180] sm:$0xff]   ;;  %v4074_v45 = vor.u32 %v4072_v25, %v4070_v63  ;;  %v4078_v61 = vrot.slane %v4076_v2, 1  ;;  %v5729_v26 = vcombine.low %v3976_v49, %v3977_v52  ;;  %v10821_v55 = vld [vmem:[#allocation43_spill] sm:$0xff]  ;;  %v3978_v41 = vsel %vm10824_vm3, %v9368_v29, 0  ;;  %v10826_v2 = vld [vmem:[#allocation37_spill] sm:$0xff] }
 0x1c4   :  { %6745 = vmatprep.mubr.msk.bf16.mxu1 %vm10575_vm0, %v10696_v17  ;;  %6765 = vmatprep.subr.bf16.mxu0 %v10696_v17  ;;  %v10822_v59 = vcombine.low %v10820_v32, %v10821_v55  ;;  %v4080_v25 = vshrl.u32 %v5728_v43, 16  ;;  %vm10827_vm12 = vcmp.ne.s16.totalorder %v10826_v2, 0  ;;  %v9404_v49 = vld [vmem:[#allocation2 + $0x3c] sm:$0xf]  ;;  %vm10828_vm3 = vcmp.ne.s16.totalorder %v10714_v22, 0 }
 0x1c5   :  { %6830 = vmatpush3.bf16.msra.mxu1 %v7107_v31  ;;  %v9396_v31 = vld [vmem:[#allocation2 + $0x38] sm:$0xf]  ;;  %v9399_v0 = vsel %vm10825_vm4, %v4074_v45, %v4078_v61  ;;  %v4084_v63 = vshll.u32 %v5729_v26, 16  ;;  %v3979_v55 = vsel %vm10827_vm12, %v9385_v50, 0  ;;  %v10829_v43 = vcombine.low %v8885_v46, %v8916_v62  ;;  %v10831_v62 = vld [vmem:[#allocation44_spill] sm:$0xff]  ;;  %v10832_v46 = vld [vmem:[#allocation21_spill] sm:$0xff] }
 0x1c6   :  { %6590 = vmatmul.mubr.bf16.gmra.mxu0 %v10822_v59  ;;  %6831 = vmatprep.subr.bf16.mxu1 %v10696_v17  ;;  %v4088_v59 = vshrl.u32 %v5729_v26, 16  ;;  %v4082_v52 = vor.u32 %v4080_v25, %v4078_v61  ;;  %v5730_v10 = vcombine.low %v3978_v41, %v3979_v55  ;;  %v3980_v45 = vsel %vm10828_vm3, %v9396_v31, 0  ;;  %v9421_v61 = vld [vmem:[#allocation2 + $0x40] sm:$0xf]  ;;  %v9423_v25 = vld [vmem:[#allocation2 + $0x44] sm:$0xf]  ;;  %vm10834_vm3 = vmmov %vm10825_vm4 }
 0x1c7   :  { %6593 = vmatprep.mubr.msk.bf16.mxu0 %vm10575_vm0, %v10696_v17  ;;  %v4086_v32 = vrot.slane %v4084_v63, 1  ;;  %vm10830_vm12 = vcmp.ne.s16.totalorder %v8647_v34, 0 }
 0x1c8   :  { %v3981_v41 = vsel %vm10830_vm12, %v9404_v49, 0  ;;  %vm10837_vm12 = vcmp.ne.s16.totalorder %v9022_v13, 0 }
 0x1c9   :  { %6832 = vmatpush3.bf16.msra.mxu1 %v7109_v33  ;;  %v9414_v2 = vsel %vm10825_vm4, %v4082_v52, %v4086_v32  ;;  %v4090_v26 = vor.u32 %v4088_v59, %v4086_v32  ;;  %v4092_v33 = vshll.u32 %v5730_v10, 16  ;;  %v5731_v55 = vcombine.low %v3980_v45, %v3981_v41  ;;  %v9441_v41 = vld [vmem:[#allocation2 + $0x4c] sm:$0xf] }
 0x1ca   :  { %6921 = vmatprep.subr.bf16.mxu1 %v10696_v17  ;;  %v4096_v52 = vshrl.u32 %v5730_v10, 16  ;;  %vm10836_vm4 = vcmp.ne.s16.totalorder %v8651_v19, 0  ;;  %v3983_v45 = vsel %vm10837_vm12, %v9423_v25, 0 }
 0x1cb   :  { %6746 = vmatmul.mubr.bf16.gmra.mxu1 %v10829_v43  ;;  %v4094_v63 = vrot.slane %v4092_v33, 1  ;;  %v10833_v43 = vcombine.low %v10831_v62, %v10832_v46  ;;  %v4100_v32 = vshll.u32 %v5731_v55, 16  ;;  %v3982_v22 = vsel %vm10836_vm4, %v9421_v61, 0  ;;  %v9439_v33 = vld [vmem:[#allocation2 + $0x48] sm:$0xf] }
 0x1cc   :  { %6749 = vmatprep.mubr.msk.bf16.mxu1 %vm10575_vm0, %v10696_v17  ;;  %v4104_v19 = vshrl.u32 %v5731_v55, 16  ;;  %vm10840_vm4 = vcmp.ne.s16.totalorder %v9082_v4, 0  ;;  %v4326_v20 = vsel %vm10756_vm1, %v9439_v33, 0 }
 0x1cd   :  { %v9431_v59 = vsel %vm10834_vm3, %v4090_v26, %v4094_v63  ;;  %v4098_v62 = vor.u32 %v4096_v52, %v4094_v63  ;;  %v4102_v46 = vrot.slane %v4100_v32, 1  ;;  %v10838_v26 = vcombine.low %v8948_v15, %v8977_v21  ;;  %v10841_v63 = vld [vmem:[#allocation20_spill] sm:$0xff]  ;;  %v10843_v21 = vld [vmem:[#allocation22_spill] sm:$0xff] }
 0x1ce   :  { %6594 = vmatmul.mubr.bf16.gmra.mxu0 %v10833_v43  ;;  %10835 = vst [vmem:[#allocation30_spill] sm:$0xff] %v9431_v59  ;;  %v5732_v43 = vcombine.low %v3982_v22, %v3983_v45  ;;  %v3984_v13 = vsel %vm10840_vm4, %v9439_v33, 0  ;;  %vm10842_vm12 = vcmp.ne.s16.totalorder %v10841_v63, 0  ;;  %v10844_v45 = vld [vmem:[#allocation24_spill] sm:$0xff]  ;;  %vm10847_vm4 = vmmov %vm10834_vm3 }
 0x1cf   :  { %6597 = vmatprep.mubr.msk.bf16.mxu0 %vm10575_vm0, %v10696_v17  ;;  %v9447_v10 = vsel %vm10834_vm3, %v4098_v62, %v4102_v46  ;;  %v3985_v22 = vsel %vm10842_vm12, %v9441_v41, 0  ;;  %v4106_v52 = vor.u32 %v4104_v19, %v4102_v46  ;;  %v10845_v62 = vcombine.low %v10843_v21, %v10844_v45  ;;  %v10851_v21 = vld [vmem:[#allocation5_spill] sm:$0xff] }
 0x1d0   :  { %10839 = vst [vmem:[#allocation41_spill] sm:$0xff] %v9447_v10  ;;  %v4108_v59 = vshll.u32 %v5732_v43, 16  ;;  %v9457_v15 = vcombine.low %v3984_v13, %v3985_v22  ;;  %v10846_v19 = vcombine.low %v9013_v54, %v9042_v40  ;;  %vm10852_vm12 = vnez %v10851_v21  ;;  %v10860_v21 = vld [vmem:[#allocation47_spill] sm:$0xff]  ;;  %v9515_v46 = vld [vmem:[#allocation2 + $0x4c] sm:$0xf] }
 0x1d1   :  { %v4312_v45 = vsel %vm10852_vm12, %v9265_v3, 0  ;;  %v10859_v54 = vcombine.low %v9072_v56, %v9095_v5  ;;  %v4314_v5 = vsel %vm7399_vm6, %v9060_v38, 0  ;;  %v10865_v56 = vld [vmem:[#allocation12_spill] sm:$0xff] }
 0x1d2   :  { %v4110_v32 = vrot.slane %v4108_v59, 1  ;;  %v4116_v4 = vshll.u32 %v9457_v15, 16 }
 0x1d3   :  { %6750 = vmatmul.mubr.bf16.gmra.mxu1 %v10838_v26  ;;  %v4112_v26 = vshrl.u32 %v5732_v43, 16  ;;  %v10848_v43 = vld [vmem:[#allocation27_spill] sm:$0xff] }
 0x1d4   :  { %6753 = vmatprep.mubr.msk.bf16.mxu1 %vm10575_vm0, %v10696_v17  ;;  %v9465_v55 = vsel %vm10834_vm3, %v4106_v52, %v4110_v32  ;;  %v9468_v63 = vrot.slane %v4116_v4, 1  ;;  %v9492_v52 = vld [vmem:[#allocation2 + $0xc] sm:$0xf]  ;;  %v10861_v4 = vld [vmem:[#allocation50_spill] sm:$0xff] }
 0x1d5   :  { %v4114_v10 = vor.u32 %v4112_v26, %v4110_v32  ;;  %v4308_v32 = vld [vmem:[#allocation2 + $0x8] sm:$0x8] }
 0x1d6   :  { %6598 = vmatmul.mubr.bf16.gmra.mxu0 %v10845_v62  ;;  %v10853_v62 = vld [vmem:[#allocation6_spill] sm:$0xff] }
 0x1d7   :  { %6601 = vmatprep.mubr.msk.bf16.mxu0 %vm10575_vm0, %v10696_v17  ;;  %v9475_v13 = vsel %vm10847_vm4, %v4114_v10, %v9468_v63  ;;  %v10849_v10 = vld [vmem:[#allocation46_spill] sm:$0xff]  ;;  %vm10854_vm3 = vnez %v10853_v62  ;;  %v10862_v62 = vcombine.low %v10860_v21, %v10861_v4  ;;  %v5700_v4 = vcombine.low %v9130_v30, %v9515_v46 }
 0x1d8   :  { %v10850_v22 = vcombine.low %v10848_v43, %v10849_v10  ;;  %v4313_v26 = vsel %vm10854_vm3, %v9069_v7, 0  ;;  %v10857_v43 = vld [vmem:[#allocation4_spill] sm:$0xff]  ;;  %v7110_v30 = vld [vmem:[%s10373_s3 + $0x170] sm:$0xff]  }
 0x1d9   :  { %vm10858_vm15 = vnez %v10857_v43 }
 0x1da   :  { %v4311_v10 = vsel %vm10858_vm15, %v9492_v52, 0  ;;  %vm10870_vm15 = vsmask.f32 4352 }
 0x1db   :  { %6754 = vmatmul.mubr.bf16.gmra.mxu1 %v10846_v19  ;;  %v10855_v19 = vld [vmem:[#allocation3_spill] sm:$0xff]  ;;  %vm10871_vm12 = vmmov %vm10870_vm15 }
 0x1dc   :  { %6757 = vmatprep.mubr.msk.bf16.mxu1 %vm10575_vm0, %v10696_v17  ;;  %vm10856_vm4 = vcmp.ne.s16.totalorder %v10855_v19, 0 }
 0x1dd   :  { %v4310_v40 = vsel %vm10856_vm4, %v4308_v32, 0 }
 0x1de   :  { %6602 = vmatmul.mubr.bf16.gmra.mxu0 %v10850_v22  ;;  %v5760_v22 = vcombine.low %v4312_v45, %v4313_v26  ;;  %v5759_v3 = vcombine.low %v4310_v40, %v4311_v10 }
 0x1df   :  { %6605 = vmatprep.mubr.msk.bf16.mxu0 %vm10575_vm0, %v10696_v17 }
 0x1e0   :  { %v4403_v32 = vshrl.u32 %v5760_v22, 16  ;;  %v4406_v19 = vshll.u32 %v5760_v22, 16  ;;  %v4395_v40 = vshrl.u32 %v5759_v3, 16  ;;  %v4398_v26 = vshll.u32 %v5759_v3, 16  ;;  %v7108_v22 = vld [vmem:[%s10373_s3 + $0x178] sm:$0xff]  }
 0x1e2   :  { %v4405_v43 = vrot.slane %v4403_v32, 3  ;;  %v4408_v10 = vrot.slane %v4406_v19, 4  ;;  %v4400_v45 = vrot.slane %v4398_v26, 4  ;;  %v10866_v32 = vld [vmem:[#allocation9_spill] sm:$0xff]  ;;  %v7115_v26 = vld [vmem:[%s10373_s3 + $0x238] sm:$0xff]  }
 0x1e3   :  { %6758 = vmatmul.mubr.bf16.gmra.mxu1 %v10859_v54  ;;  %v4315_v54 = vsel %vm7447_vm13, %v9304_v37, 0  ;;  %vm10867_vm6 = vnez %v10866_v32 }
 0x1e4   :  { %6761 = vmatprep.mubr.msk.bf16.mxu1 %vm10575_vm0, %v10696_v17  ;;  %v5761_v21 = vcombine.low %v4314_v5, %v4315_v54  ;;  %v4409_v37 = vor.u32 %v4408_v10, %v4405_v43  ;;  %v4316_v19 = vsel %vm10867_vm6, %v9331_v8, 0  ;;  %v10868_v5 = vld [vmem:[#allocation10_spill] sm:$0xff]  ;;  %v7111_v8 = vld [vmem:[%s10373_s3 + $0x168] sm:$0xff]  }
 0x1e5   :  { %vm10869_vm13 = vnez %v10868_v5 }
 0x1e6   :  { %6606 = vmatmul.mubr.bf16.gmra.mxu0 %v10862_v62  ;;  %v4397_v62 = vrot.slane %v4395_v40, 3  ;;  %v4412_v3 = vshrl.u32 %v5761_v21, 16  ;;  %v4415_v59 = vshll.u32 %v5761_v21, 16  ;;  %v4317_v54 = vsel %vm10869_vm13, %v9336_v48, 0 }
 0x1e7   :  { %6677 = vmatprep.mubr.msk.bf16.mxu0 %vm10575_vm0, %v10696_v17  ;;  %v5762_v21 = vcombine.low %v4316_v19, %v4317_v54 }
 0x1e8   :  { %v4401_v40 = vor.u32 %v4400_v45, %v4397_v62  ;;  %v4414_v43 = vrot.slane %v4412_v3, 3  ;;  %v4417_v10 = vrot.slane %v4415_v59, 4  ;;  %v4318_v3 = vsel %vm10702_vm9, %v9359_v36, 0  ;;  %vm10872_vm9 = vmmov %vm10871_vm12 }
 0x1e9   :  { %v4421_v62 = vshrl.u32 %v5762_v21, 16  ;;  %v4424_v45 = vshll.u32 %v5762_v21, 16 }
 0x1ea   :  { %v4418_v59 = vor.u32 %v4417_v10, %v4414_v43  ;;  %v4321_v43 = vsel %vm10712_vm8, %v9385_v50, 0  ;;  %v7120_v10 = vld [vmem:[%s10373_s3 + $0x218] sm:$0xff]   ;;  %vm10873_vm8 = vmmov %vm10872_vm9 }
 0x1eb   :  { %6762 = vmatmul.mubr.bf16.gmra.mxu1 %v5700_v4  ;;  %v4410_v4 = vsel %vm10870_vm15, %v4401_v40, %v4409_v37  ;;  %v4423_v19 = vrot.slane %v4421_v62, 3  ;;  %v4426_v5 = vrot.slane %v4424_v45, 4  ;;  %vm10888_vm15 = vcmp.ne.s16.totalorder %v10798_v27, 0 }
 0x1ec   :  { %6833 = vmatprep.mubr.msk.bf16.mxu1 %vm10575_vm0, %v10696_v17  ;;  %v4419_v32 = vsel %vm10871_vm12, %v4409_v37, %v4418_v59 }
 0x1ed   :  { %v4427_v37 = vor.u32 %v4426_v5, %v4423_v19 }
 0x1ee   :  { %6678 = vmatmul.mubr.bf16.vlgmr.msra.gmra.mxu0 %v10865_v56  ;;  %v7112_v56 = vld [vmem:[%s10373_s3 + $0x160] sm:$0xff]  }
 0x1ef   :  { %6766 = vmatpush3.bf16.msra.mxu0 %v7108_v22  ;;  %6681 = vmatprep.mubr.msk.bf16.mxu0 %vm10575_vm0, %v10696_v17  ;;  %v7116_v22 = vld [vmem:[%s10373_s3 + $0x230] sm:$0xff]   ;;  %v4428_v21 = vsel %vm10872_vm9, %v4418_v59, %v4427_v37  ;;  %vm10890_vm9 = vcmp.ne.s16.totalorder %v10793_v47, 0 }
 0x1f0   :  { %6767 = vmatprep.subr.bf16.mxu0 %v10696_v17  ;;  %v7122_v59 = vld [vmem:[%s10373_s3 + $0x210] sm:$0xff]  }
 0x1f3   :  { %6834 = vmatmul.mubr.bf16.vlgmr.msra.gmra.mxu1 %v4410_v4  ;;  %6768 = vmatpush3.bf16.msra.mxu0 %v7110_v30  ;;  %v7118_v30 = vld [vmem:[%s10373_s3 + $0x228] sm:$0xff]   ;;  %v4320_v4 = vsel %vm10709_vm7, %v9368_v29, 0  ;;  %vm10874_vm7 = vmmov %vm10873_vm8 }
 0x1f4   :  { %6837 = vmatprep.mubr.msk.bf16.mxu1 %vm10575_vm0, %v10696_v17  ;;  %6769 = vmatprep.subr.bf16.mxu0 %v10696_v17 }
 0x1f5   :  { %6922 = vmatpush3.bf16.msra.mxu1 %v7115_v26 }
 0x1f6   :  { %6682 = vmatmul.mubr.bf16.gmra.mxu0 %v9163_v60  ;;  %6923 = vmatprep.subr.bf16.mxu1 %v10696_v17  ;;  %v4319_v60 = vsel %vm10703_vm11, %v9361_v12, 0 }
 0x1f7   :  { %6685 = vmatprep.mubr.msk.bf16.mxu0 %vm10575_vm0, %v10696_v17  ;;  %6770 = vmatpush3.bf16.msra.mxu0 %v7111_v8  ;;  %v5763_v54 = vcombine.low %v4318_v3, %v4319_v60  ;;  %v4322_v3 = vsel %vm10725_vm2, %v9396_v31, 0  ;;  %v4323_v60 = vsel %vm10729_vm10, %v9404_v49, 0  ;;  %vm10878_vm2 = vmmov %vm10874_vm7 }
 0x1f8   :  { %6771 = vmatprep.subr.bf16.mxu0 %v10696_v17  ;;  %v5765_v5 = vcombine.low %v4322_v3, %v4323_v60  ;;  %vm10880_vm1 = vmmov %vm10878_vm2 }
 0x1f9   :  { %6924 = vmatpush3.bf16.msra.mxu1 %v7116_v22  ;;  %v4430_v40 = vshrl.u32 %v5763_v54, 16  ;;  %v4433_v26 = vshll.u32 %v5763_v54, 16  ;;  %v5764_v22 = vcombine.low %v4320_v4, %v4321_v43  ;;  %vm10886_vm6 = vmmov %vm10880_vm1 }
 0x1fa   :  { %6925 = vmatprep.subr.bf16.mxu1 %v10696_v17  ;;  %vm10889_vm12 = vmmov %vm10880_vm1 }
 0x1fb   :  { %6838 = vmatmul.mubr.bf16.gmra.mxu1 %v4419_v32  ;;  %6772 = vmatpush3.bf16.msra.mxu0 %v7112_v56  ;;  %v4432_v8 = vrot.slane %v4430_v40, 3  ;;  %v4435_v16 = vrot.slane %v4433_v26, 4  ;;  %v4439_v45 = vshrl.u32 %v5764_v22, 16  ;;  %v4442_v56 = vshll.u32 %v5764_v22, 16 }
 0x1fc   :  { %6841 = vmatprep.mubr.msk.bf16.mxu1 %vm10575_vm0, %v10696_v17  ;;  %6773 = vmatprep.subr.bf16.mxu0 %v10696_v17  ;;  %v4325_v40 = vsel %vm10783_vm14, %v9423_v25, 0 }
 0x1fd   :  { %6926 = vmatpush3.bf16.msra.mxu1 %v7118_v30  ;;  %v4436_v62 = vor.u32 %v4435_v16, %v4432_v8  ;;  %v7123_v30 = vld [vmem:[%s10373_s3 + $0x208] sm:$0xff]   ;;  %v4441_v28 = vrot.slane %v4439_v45, 3  ;;  %v4444_v19 = vrot.slane %v4442_v56, 4  ;;  %v10876_v8 = vld [vmem:[#allocation19_spill] sm:$0xff] }
 0x1fe   :  { %6686 = vmatmul.mubr.bf16.gmra.mxu0 %v9187_v1  ;;  %6927 = vmatprep.subr.bf16.mxu1 %v10696_v17  ;;  %v7114_v1 = vld [vmem:[%s10373_s3 + $0x150] sm:$0xff]   ;;  %vm10877_vm11 = vcmp.ne.s16.totalorder %v10876_v8, 0 }
 0x1ff   :  { %6689 = vmatprep.mubr.msk.bf16.mxu0 %vm10575_vm0, %v10696_v17  ;;  %6774 = vmatpush3.bf16.msra.mxu0 %v7113_v58  ;;  %v4437_v32 = vsel %vm10873_vm8, %v4427_v37, %v4436_v62  ;;  %v4445_v54 = vor.u32 %v4444_v19, %v4441_v28  ;;  %v4448_v58 = vshrl.u32 %v5765_v5, 16  ;;  %v4324_v37 = vsel %vm10741_vm5, %v9421_v61, 0  ;;  %vm10879_vm10 = vmmov %vm10877_vm11 }
 0x200   :  { %6775 = vmatprep.subr.bf16.mxu0 %v10696_v17  ;;  %v5766_v43 = vcombine.low %v4324_v37, %v4325_v40  ;;  %vm10875_vm5 = vnez %v10757_v57  ;;  %v3372_v16 = vsel %vm10877_vm11, %v9515_v46, 0  ;;  %v4328_v3 = vsel %vm10879_vm10, %v9669_v23, 0  ;;  %v10883_v40 = vld [vmem:[#allocation25_spill] sm:$0xff]  ;;  %vm10891_vm8 = vmmov %vm10880_vm1 }
 0x201   :  { %6928 = vmatpush3.bf16.msra.mxu1 %v7119_v44  ;;  %v4451_v44 = vshll.u32 %v5765_v5, 16  ;;  %v4446_v26 = vsel %vm10874_vm7, %v4436_v62, %v4445_v54  ;;  %v5667_v45 = vcombine.low %v3372_v16, %v3372_v16  ;;  %vm10884_vm3 = vcmp.ne.s16.totalorder %v10883_v40, 0 }
 0x202   :  { %6929 = vmatprep.subr.bf16.mxu1 %v10696_v17  ;;  %v4460_v51 = vshll.u32 %v5766_v43, 16  ;;  %vm10885_vm4 = vmmov %vm10884_vm3  ;;  %vm10892_vm7 = vcmp.ne.s16.totalorder %v10805_v9, 0 }
 0x203   :  { %6842 = vmatmul.mubr.bf16.gmra.mxu1 %v4428_v21  ;;  %6776 = vmatpush3.bf16.msra.mxu0 %v7114_v1  ;;  %v4453_v4 = vrot.slane %v4451_v44, 4  ;;  %v4327_v21 = vsel %vm10875_vm5, %v9441_v41, 0  ;;  %v10881_v44 = vld [vmem:[#allocation23_spill] sm:$0xff]  ;;  %vm10893_vm5 = vsmask.f32 7424 }
 0x204   :  { %6845 = vmatprep.mubr.msk.bf16.mxu1 %vm10575_vm0, %v10696_v17  ;;  %6777 = vmatprep.subr.bf16.mxu0 %v10696_v17  ;;  %vm10882_vm14 = vcmp.ne.s16.totalorder %v10881_v44, 0 }
 0x205   :  { %6930 = vmatpush3.bf16.msra.mxu1 %v7120_v10  ;;  %v4457_v10 = vshrl.u32 %v5766_v43, 16  ;;  %vm10887_vm13 = vmmov %vm10882_vm14 }
 0x206   :  { %6690 = vmatmul.mubr.bf16.gmra.mxu0 %v9211_v6  ;;  %6931 = vmatprep.subr.bf16.mxu1 %v10696_v17  ;;  %v7121_v6 = vld [vmem:[%s10373_s3 + $0x140] sm:$0xff]  }
 0x207   :  { %6693 = vmatprep.mubr.msk.bf16.mxu0 %vm10575_vm0, %v10696_v17  ;;  %6778 = vmatpush3.bf16.msra.mxu0 %v7117_v11  ;;  %v4459_v22 = vrot.slane %v4457_v10, 3  ;;  %v4462_v11 = vrot.slane %v4460_v51, 4 }
 0x208   :  { %6779 = vmatprep.subr.bf16.mxu0 %v10696_v17 }
 0x209   :  { %6932 = vmatpush3.bf16.msra.mxu1 %v7122_v59  ;;  %v5767_v59 = vcombine.low %v4326_v20, %v4327_v21  ;;  %v4463_v41 = vor.u32 %v4462_v11, %v4459_v22  ;;  %v4906_v21 = vld [vmem:[#allocation2 + $0x10] sm:$0xf]  ;;  %v4905_v22 = vld [vmem:[#allocation2 + $0xc] sm:$0xf]  ;;  %v4908_v11 = vld [vmem:[#allocation2 + $0x18] sm:$0xf] }
 0x20a   :  { %6933 = vmatprep.subr.bf16.mxu1 %v10696_v17 }
 0x20b   :  { %6846 = vmatmul.mubr.bf16.gmra.mxu1 %v4437_v32  ;;  %6780 = vmatpush3.bf16.msra.mxu0 %v7121_v6  ;;  %v4466_v56 = vshrl.u32 %v5767_v59, 16  ;;  %v4469_v46 = vshll.u32 %v5767_v59, 16  ;;  %v3519_v6 = vshrl.u32 %v5667_v45, 16  ;;  %v3949_v32 = vld [vmem:[#allocation2 + $0x8] sm:$0xf] }
 0x20c   :  { %6849 = vmatprep.mubr.msk.bf16.mxu1 %vm10575_vm0, %v10696_v17  ;;  %6869 = vmatprep.subr.bf16.mxu0 %v10696_v17  ;;  %v3968_v37 = vsel %vm10882_vm14, %v3949_v32, 0  ;;  %v4924_v32 = vsel %vm10887_vm13, %v4905_v22, 0 }
 0x20d   :  { %6934 = vmatpush3.bf16.msra.mxu1 %v7123_v30  ;;  %v3522_v30 = vshll.u32 %v5667_v45, 16  ;;  %v4468_v5 = vrot.slane %v4466_v56, 3  ;;  %v4925_v45 = vsel %vm10885_vm4, %v4906_v21, 0 }
 0x20e   :  { %6694 = vmatmul.mubr.bf16.gmra.mxu0 %v9215_v35  ;;  %6935 = vmatprep.subr.bf16.mxu1 %v10696_v17  ;;  %v4450_v35 = vrot.slane %v4448_v58, 3 }
 0x20f   :  { %6697 = vmatprep.mubr.msk.bf16.mxu0 %vm10575_vm0, %v10696_v17 }
 0x210   :  { %v4454_v1 = vor.u32 %v4453_v4, %v4450_v35  ;;  %v3521_v35 = vrot.slane %v3519_v6, 3  ;;  %v3524_v4 = vrot.slane %v3522_v30, 4  ;;  %v4907_v6 = vld [vmem:[#allocation2 + $0x14] sm:$0xf] }
 0x211   :  { %6936 = vmatpush3.bf16.msra.mxu1 %v7125_v18  ;;  %v4471_v18 = vrot.slane %v4469_v46, 4 }
 0x212   :  { %v3525_v59 = vor.u32 %v3524_v4, %v3521_v35 }
 0x213   :  { %6850 = vmatmul.mubr.bf16.gmra.mxu1 %v4446_v26  ;;  %v3969_v26 = vsel %vm10884_vm3, %v9492_v52, 0  ;;  %v4472_v10 = vor.u32 %v4471_v18, %v4468_v5  ;;  %v5826_v18 = vcombine.low %v4924_v32, %v4925_v45 }
 0x214   :  { %6853 = vmatprep.mubr.msk.bf16.mxu1 %vm10575_vm0, %v10696_v17  ;;  %v5725_v8 = vcombine.low %v3968_v37, %v3969_v26 }
 0x215   :  { %v4473_v56 = vsel %vm10886_vm6, %v4463_v41, %v4472_v10  ;;  %v5011_v4 = vshll.u32 %v5826_v18, 16  ;;  %v5009_v32 = vshrl.u32 %v5826_v18, 16 }
 0x216   :  { %6698 = vmatmul.mubr.bf16.gmra.mxu0 %v9252_v42  ;;  %v4455_v42 = vsel %vm10878_vm2, %v4445_v54, %v4454_v1  ;;  %v5768_v54 = vcombine.low %v4328_v3, %v4328_v3  ;;  %v4055_v30 = vshll.u32 %v5725_v8, 16  ;;  %vm10896_vm2 = vmmov %vm10893_vm5 }
 0x217   :  { %6701 = vmatprep.mubr.msk.bf16.mxu0 %vm10575_vm0, %v10696_v17  ;;  %v9665_v62 = vpop.f32.mrf.mxu0  ;;  %vm10904_vm14 = vmmov %vm10896_vm2 }
 0x218   :  { %v4475_v51 = vshrl.u32 %v5768_v54, 16  ;;  %v4478_v20 = vshll.u32 %v5768_v54, 16  ;;  %v4926_v54 = vsel %vm10890_vm9, %v4907_v6, 0  ;;  %v4057_v40 = vrot.slane %v4055_v30, 1  ;;  %vm10911_vm6 = vmmov %vm10896_vm2 }
 0x219   :  { %v6471_v57 = vpop.f32.mrf.mxu0  ;;  %vm10920_vm9 = vcmp.ne.s16.totalorder %v8647_v34, 0 }
 0x21a   :  { %v4477_v46 = vrot.slane %v4475_v51, 3  ;;  %v4480_v3 = vrot.slane %v4478_v20, 4  ;;  %v4910_v51 = vld [vmem:[#allocation2 + $0x20] sm:$0xf]  ;;  %v4053_v20 = vshrl.u32 %v5725_v8, 16  ;;  %v5013_v8 = vrot.slane %v5011_v4, 1 }
 0x21b   :  { %6854 = vmatmul.mubr.bf16.gmra.mxu1 %v4455_v42  ;;  %v9677_v60 = vpop.f32.mrf.mxu0  ;;  %v7127_v4 = vld [vmem:[%s10373_s3 + $0x1e8] sm:$0xff]  }
 0x21c   :  { %6857 = vmatprep.mubr.msk.bf16.mxu1 %vm10575_vm0, %v10696_v17  ;;  %v4481_v37 = vor.u32 %v4480_v3, %v4477_v46  ;;  %v4058_v22 = vor.u32 %v4057_v40, %v4053_v20  ;;  %v10894_v46 = vld [vmem:[#allocation29_spill] sm:$0xff] }
 0x21d   :  { %v6472_v28 = vpop.f32.mrf.mxu0  ;;  %vm10895_vm11 = vcmp.ne.s16.totalorder %v10894_v46, 0  ;;  %v7128_v46 = vld [vmem:[%s10373_s3 + $0x1e0] sm:$0xff]  }
 0x21e   :  { %6702 = vmatmul.mubr.bf16.gmra.mxu0 %v9270_v14  ;;  %v9679_v19 = vpop.f32.mrf.mxu1  ;;  %v4464_v14 = vsel %vm10880_vm1, %v4454_v1, %v4463_v41  ;;  %v4927_v28 = vsel %vm10888_vm15, %v4908_v11, 0  ;;  %v3526_v41 = vsel %vm10889_vm12, %v9293_v24, %v3525_v59  ;;  %v4482_v21 = vsel %vm10891_vm8, %v4472_v10, %v4481_v37  ;;  %v7124_v11 = vld [vmem:[%s10373_s3 + $0x1f8] sm:$0xff]   ;;  %vm10918_vm12 = vmmov %vm10896_vm2 }
 0x21f   :  { %6705 = vmatprep.mubr.msk.bf16.mxu0 %vm10575_vm0, %v10696_v17  ;;  %v5827_v27 = vcombine.low %v4926_v54, %v4927_v28  ;;  %v4929_v59 = vsel %vm10892_vm7, %v4910_v51, 0  ;;  %v4063_v10 = vsel %vm10893_vm5, %v4058_v22, %v9338_v39  ;;  %v4912_v54 = vld [vmem:[#allocation2 + $0x28] sm:$0xf]  ;;  %v10898_v51 = vld [vmem:[#allocation32_spill] sm:$0xff]  ;;  %vm10925_vm7 = vmmov %vm10896_vm2 }
 0x220   :  { %v6627_v58 = vpop.f32.mrf.mxu1  ;;  %vm10899_vm10 = vcmp.ne.s16.totalorder %v10898_v51, 0  ;;  %v7129_v51 = vld [vmem:[%s10373_s3 + $0x1d8] sm:$0xff]  }
 0x221   :  { %v4931_v20 = vsel %vm10899_vm10, %v4912_v54, 0 }
 0x222   :  { %v9692_v1 = vpop.f32.mrf.mxu1 }
 0x223   :  { %6858 = vmatmul.mubr.bf16.gmra.mxu1 %v4464_v14  ;;  %v9689_v43 = vpop.f32.mrf.mxu0 }
 0x224   :  { %6861 = vmatprep.mubr.msk.bf16.mxu1 %vm10575_vm0, %v10696_v17  ;;  %v6628_v42 = vpop.f32.mrf.mxu1 }
 0x225   :  { %v6475_v16 = vpop.f32.mrf.mxu0  ;;  %v4909_v42 = vld [vmem:[#allocation2 + $0x1c] sm:$0xf] }
 0x226   :  { %6706 = vmatmul.mubr.bf16.gmra.mxu0 %v9308_v53  ;;  %v9700_v53 = vpop.f32.mrf.mxu1  ;;  %v5016_v16 = vshll.u32 %v5827_v27, 16  ;;  %v4928_v3 = vsel %vm10895_vm11, %v4909_v42, 0  ;;  %v10900_v42 = vld [vmem:[#allocation31_spill] sm:$0xff] }
 0x227   :  { %6709 = vmatprep.mubr.msk.bf16.mxu0 %vm10575_vm0, %v10696_v17  ;;  %v9698_v57 = vpop.f32.mrf.mxu0  ;;  %v5828_v28 = vcombine.low %v4928_v3, %v4929_v59  ;;  %vm10901_vm1 = vcmp.ne.s16.totalorder %v10900_v42, 0  ;;  %v10902_v59 = vld [vmem:[#allocation28_spill] sm:$0xff] }
 0x228   :  { %v6631_v5 = vpop.f32.mrf.mxu1  ;;  %v5018_v9 = vrot.slane %v5016_v16, 1 }
 0x229   :  { %v6476_v14 = vpop.f32.mrf.mxu0  ;;  %v5024_v40 = vshll.u32 %v5828_v28, 16  ;;  %v5028_v42 = vshrl.u32 %v5828_v28, 16 }
 0x22a   :  { %v9715_v44 = vpop.f32.mrf.mxu1  ;;  %v7126_v14 = vld [vmem:[%s10373_s3 + $0x1f0] sm:$0xff]  }
 0x22b   :  { %6862 = vmatmul.mubr.bf16.gmra.mxu1 %v4473_v56 }
 0x22c   :  { %6865 = vmatprep.mubr.msk.bf16.mxu1 %vm10575_vm0, %v10696_v17  ;;  %v9713_v58 = vpop.f32.mrf.mxu0  ;;  %v6632_v35 = vpop.f32.mrf.mxu1 }
 0x22e   :  { %6710 = vmatmul.mubr.bf16.gmra.mxu0 %v3526_v41  ;;  %v6479_v26 = vpop.f32.mrf.mxu0  ;;  %v5014_v41 = vor.u32 %v5013_v8, %v5009_v32 }
 0x22f   :  { %6781 = vmatprep.mubr.msk.bf16.mxu0 %vm10575_vm0, %v10696_v17  ;;  %v9721_v47 = vpop.f32.mrf.mxu1  ;;  %v4911_v26 = vld [vmem:[#allocation2 + $0x24] sm:$0xf] }
 0x230   :  { %v9719_v24 = vpop.f32.mrf.mxu0  ;;  %v5019_v18 = vsel %vm10896_vm2, %v5014_v41, %v5018_v9  ;;  %v4930_v22 = vsel %vm10901_vm1, %v4911_v26, 0 }
 0x231   :  { %v6635_v56 = vpop.f32.mrf.mxu1  ;;  %v9763_v8 = vcombine.low %v4930_v22, %v4931_v20 }
 0x232   :  { %v6480_v45 = vpop.f32.mrf.mxu0  ;;  %v5026_v56 = vrot.slane %v5024_v40, 1  ;;  %v10906_v40 = vld [vmem:[#allocation33_spill] sm:$0xff] }
 0x233   :  { %6866 = vmatmul.mubr.bf16.gmra.mxu1 %v4482_v21  ;;  %v9737_v30 = vpop.f32.mrf.mxu1  ;;  %v5020_v45 = vshrl.u32 %v5827_v27, 16  ;;  %v5032_v54 = vshll.u32 %v9763_v8, 16  ;;  %vm10907_vm3 = vcmp.ne.s16.totalorder %v10906_v40, 0  ;;  %v10913_v40 = vld [vmem:[#allocation37_spill] sm:$0xff] }
 0x234   :  { %6937 = vmatprep.mubr.msk.bf16.mxu1 %vm10575_vm0, %v10696_v17  ;;  %v9735_v6 = vpop.f32.mrf.mxu0  ;;  %vm10914_vm13 = vcmp.ne.s16.totalorder %v10913_v40, 0 }
 0x235   :  { %v6636_v5 = vpop.f32.mrf.mxu1  ;;  %v5022_v32 = vor.u32 %v5020_v45, %v5018_v9  ;;  %v5034_v22 = vrot.slane %v5032_v54, 1 }
 0x236   :  { %6782 = vmatmul.mubr.bf16.vlgmr.msra.gmra.mxu0 %v4063_v10  ;;  %v6483_v39 = vpop.f32.mrf.mxu0 }
 0x237   :  { %6870 = vmatpush3.bf16.msra.mxu0 %v7124_v11  ;;  %6785 = vmatprep.mubr.msk.bf16.mxu0 %vm10575_vm0, %v10696_v17  ;;  %v4914_v39 = vld [vmem:[#allocation2 + $0x30] sm:$0xf]  ;;  %v5027_v41 = vsel %vm10904_vm14, %v5022_v32, %v5026_v56  ;;  %v5030_v32 = vor.u32 %v5028_v42, %v5026_v56  ;;  %v7131_v56 = vld [vmem:[%s10373_s3 + $0x1c8] sm:$0xff]   ;;  %v5036_v42 = vshrl.u32 %v9763_v8, 16 }
 0x238   :  { %6871 = vmatprep.subr.bf16.mxu0 %v10696_v17  ;;  %v9745_v37 = vpop.f32.mrf.mxu0  ;;  %v9748_v35 = vpop.f32.mrf.mxu1 }
 0x239   :  { %10897 = vst [vmem:[#allocation42_spill] sm:$0xff] %v9748_v35  ;;  %v5035_v28 = vsel %vm10911_vm6, %v5030_v32, %v5034_v22  ;;  %vm10947_vm6 = vmmov %vm10896_vm2 }
 0x23a   :  { %v6484_v21 = vpop.f32.mrf.mxu0  ;;  %v6639_v16 = vpop.f32.mrf.mxu1 }
 0x23b   :  { %6938 = vmatmul.mubr.bf16.vlgmr.msra.gmra.mxu1 %v5019_v18  ;;  %6872 = vmatpush3.bf16.msra.mxu0 %v7126_v14  ;;  %v4913_v14 = vld [vmem:[#allocation2 + $0x2c] sm:$0xf] }
 0x23c   :  { %6941 = vmatprep.mubr.msk.bf16.mxu1 %vm10575_vm0, %v10696_v17  ;;  %6873 = vmatprep.subr.bf16.mxu0 %v10696_v17  ;;  %v9765_v10 = vpop.f32.mrf.mxu1  ;;  %v4932_v26 = vsel %vm10907_vm3, %v4913_v14, 0  ;;  %v4916_v14 = vld [vmem:[#allocation2 + $0x38] sm:$0xf]  ;;  %vm10942_vm3 = vmmov %vm10896_vm2 }
 0x23d   :  { %v9760_v11 = vpop.f32.mrf.mxu0  ;;  %10903 = vst [vmem:[#allocation43_spill] sm:$0xff] %v9765_v10 }
 0x23e   :  { %6786 = vmatmul.mubr.bf16.gmra.mxu0 %v10902_v59  ;;  %v6640_v27 = vpop.f32.mrf.mxu1 }
 0x23f   :  { %6789 = vmatprep.mubr.msk.bf16.mxu0 %vm10575_vm0, %v10696_v17  ;;  %6874 = vmatpush3.bf16.msra.mxu0 %v7127_v4  ;;  %v6487_v3 = vpop.f32.mrf.mxu0  ;;  %v10908_v4 = vld [vmem:[#allocation34_spill] sm:$0xff] }
 0x240   :  { %6875 = vmatprep.subr.bf16.mxu0 %v10696_v17  ;;  %vm10909_vm4 = vcmp.ne.s16.totalorder %v10908_v4, 0 }
 0x241   :  { %v9773_v5 = vpop.f32.mrf.mxu0  ;;  %v9777_v18 = vpop.f32.mrf.mxu1  ;;  %v4933_v9 = vsel %vm10909_vm4, %v4914_v39, 0  ;;  %vm10945_vm4 = vmmov %vm10896_vm2 }
 0x242   :  { %10905 = vst [vmem:[#allocation44_spill] sm:$0xff] %v9777_v18  ;;  %v5830_v59 = vcombine.low %v4932_v26, %v4933_v9  ;;  %v4935_v26 = vsel %vm10914_vm13, %v4916_v14, 0  ;;  %v7132_v14 = vld [vmem:[%s10373_s3 + $0x1c0] sm:$0xff]   ;;  %vm10949_vm13 = vmmov %vm10896_vm2 }
 0x243   :  { %6942 = vmatmul.mubr.bf16.gmra.mxu1 %v5027_v41  ;;  %6876 = vmatpush3.bf16.msra.mxu0 %v7128_v46  ;;  %v6488_v20 = vpop.f32.mrf.mxu0  ;;  %v6643_v21 = vpop.f32.mrf.mxu1  ;;  %v7130_v46 = vld [vmem:[%s10373_s3 + $0x1d0] sm:$0xff]  }
 0x244   :  { %6945 = vmatprep.mubr.msk.bf16.mxu1 %vm10575_vm0, %v10696_v17  ;;  %6877 = vmatprep.subr.bf16.mxu0 %v10696_v17  ;;  %v5040_v27 = vshll.u32 %v5830_v59, 16  ;;  %v4915_v41 = vld [vmem:[#allocation2 + $0x34] sm:$0xf] }
 0x245   :  { %v9792_v45 = vpop.f32.mrf.mxu1 }
 0x246   :  { %v9789_v16 = vpop.f32.mrf.mxu0  ;;  %6790 = vmatmul.mubr.bf16.gmra.mxu0 %v9399_v0  ;;  %10910 = vst [vmem:[#allocation21_spill] sm:$0xff] %v9792_v45  ;;  %v4922_v45 = vld [vmem:[#allocation2 + $0x50] sm:$0xf] }
 0x247   :  { %6793 = vmatprep.mubr.msk.bf16.mxu0 %vm10575_vm0, %v10696_v17  ;;  %6878 = vmatpush3.bf16.msra.mxu0 %v7129_v51  ;;  %v6644_v39 = vpop.f32.mrf.mxu1  ;;  %v10915_v51 = vld [vmem:[#allocation35_spill] sm:$0xff] }
 0x248   :  { %v6491_v3 = vpop.f32.mrf.mxu0  ;;  %6879 = vmatprep.subr.bf16.mxu0 %v10696_v17  ;;  %vm10916_vm15 = vcmp.ne.s16.totalorder %v10915_v51, 0  ;;  %v10921_v51 = vld [vmem:[#allocation38_spill] sm:$0xff] }
 0x249   :  { %v4934_v20 = vsel %vm10916_vm15, %v4915_v41, 0  ;;  %v4918_v41 = vld [vmem:[#allocation2 + $0x40] sm:$0xf]  ;;  %vm10922_vm8 = vcmp.ne.s16.totalorder %v10921_v51, 0 }
 0x24a   :  { %v9800_v0 = vpop.f32.mrf.mxu0  ;;  %v9803_v54 = vpop.f32.mrf.mxu1  ;;  %v5831_v3 = vcombine.low %v4934_v20, %v4935_v26  ;;  %v4917_v26 = vld [vmem:[#allocation2 + $0x3c] sm:$0xf] }
 0x24b   :  { %10912 = vst [vmem:[#allocation22_spill] sm:$0xff] %v9803_v54  ;;  %6946 = vmatmul.mubr.bf16.gmra.mxu1 %v5035_v28  ;;  %6880 = vmatpush3.bf16.msra.mxu0 %v7130_v46  ;;  %v5042_v46 = vrot.slane %v5040_v27, 1  ;;  %v5038_v28 = vor.u32 %v5036_v42, %v5034_v22  ;;  %v4936_v20 = vsel %vm10922_vm8, %v4917_v26, 0 }
 0x24c   :  { %v6492_v4 = vpop.f32.mrf.mxu0  ;;  %6949 = vmatprep.mubr.msk.bf16.mxu1 %vm10575_vm0, %v10696_v17  ;;  %6881 = vmatprep.subr.bf16.mxu0 %v10696_v17  ;;  %v6647_v9 = vpop.f32.mrf.mxu1  ;;  %v5048_v27 = vshll.u32 %v5831_v3, 16 }
 0x24d   :  { %v5043_v8 = vsel %vm10918_vm12, %v5038_v28, %v5042_v46  ;;  %v5044_v28 = vshrl.u32 %v5830_v59, 16  ;;  %v10927_v59 = vld [vmem:[#allocation14_spill] sm:$0xff] }
 0x24e   :  { %v9815_v21 = vpop.f32.mrf.mxu0  ;;  %6794 = vmatmul.mubr.bf16.gmra.mxu0 %v9414_v2  ;;  %v9819_v32 = vpop.f32.mrf.mxu1  ;;  %vm10928_vm5 = vcmp.ne.s16.totalorder %v10927_v59, 0 }
 0x24f   :  { %10917 = vst [vmem:[#allocation24_spill] sm:$0xff] %v9819_v32  ;;  %6797 = vmatprep.mubr.msk.bf16.mxu0 %vm10575_vm0, %v10696_v17  ;;  %6882 = vmatpush3.bf16.msra.mxu0 %v7131_v56  ;;  %v4937_v56 = vsel %vm10920_vm9, %v4918_v41, 0  ;;  %v4920_v41 = vld [vmem:[#allocation2 + $0x48] sm:$0xf]  ;;  %v4919_v32 = vld [vmem:[#allocation2 + $0x44] sm:$0xf] }
 0x250   :  { %v6495_v39 = vpop.f32.mrf.mxu0  ;;  %6883 = vmatprep.subr.bf16.mxu0 %v10696_v17  ;;  %v6648_v2 = vpop.f32.mrf.mxu1 }
 0x251   :  { %v10923_v39 = vld [vmem:[#allocation30_spill] sm:$0xff]  ;;  %v5050_v2 = vrot.slane %v5048_v27, 1  ;;  %v4939_v27 = vsel %vm10928_vm5, %v4920_v41, 0 }
 0x252   :  { %v9827_v40 = vpop.f32.mrf.mxu0  ;;  %v9830_v4 = vpop.f32.mrf.mxu1 }
 0x253   :  { %10919 = vst [vmem:[#allocation27_spill] sm:$0xff] %v9830_v4  ;;  %6950 = vmatmul.mubr.bf16.gmra.mxu1 %v5043_v8  ;;  %6884 = vmatpush3.bf16.msra.mxu0 %v7132_v14  ;;  %v5832_v4 = vcombine.low %v4936_v20, %v4937_v56  ;;  %v5046_v14 = vor.u32 %v5044_v28, %v5042_v46  ;;  %v10929_v46 = vld [vmem:[#allocation40_spill] sm:$0xff] }
 0x254   :  { %v6496_v9 = vpop.f32.mrf.mxu0  ;;  %6953 = vmatprep.mubr.msk.bf16.mxu1 %vm10575_vm0, %v10696_v17  ;;  %v6651_v22 = vpop.f32.mrf.mxu1  ;;  %vm10930_vm11 = vcmp.ne.s16.totalorder %v10929_v46, 0  ;;  %v4921_v46 = vld [vmem:[#allocation2 + $0x4c] sm:$0xf] }
 0x255   :  { %v5051_v26 = vsel %vm10925_vm7, %v5046_v14, %v5050_v2  ;;  %v5056_v51 = vshll.u32 %v5832_v4, 16  ;;  %v5052_v14 = vshrl.u32 %v5831_v3, 16  ;;  %v3967_v3 = vld [vmem:[#allocation2 + $0x50] sm:$0x1] }
 0x256   :  { %v9838_v42 = vpop.f32.mrf.mxu0  ;;  %6798 = vmatmul.mubr.bf16.gmra.mxu0 %v10923_v39  ;;  %v9841_v8 = vpop.f32.mrf.mxu1  ;;  %v4938_v39 = vsel %vm10930_vm11, %v4919_v32, 0 }
 0x257   :  { %10924 = vst [vmem:[#allocation46_spill] sm:$0xff] %v9841_v8  ;;  %6801 = vmatprep.mubr.msk.bf16.mxu0 %vm10575_vm0, %v10696_v17  ;;  %v5833_v8 = vcombine.low %v4938_v39, %v4939_v27  ;;  %v10934_v27 = vld [vmem:[#allocation11_spill] sm:$0xff] }
 0x258   :  { %v6499_v34 = vpop.f32.mrf.mxu0  ;;  %v6652_v9 = vpop.f32.mrf.mxu1  ;;  %v2425_v39 = vadd.f32 %v10934_v27, %v9665_v62 }
 0x259   :  { %v10931_v34 = vld [vmem:[#allocation41_spill] sm:$0xff]  ;;  %v5058_v9 = vrot.slane %v5056_v51, 1  ;;  %v5064_v32 = vshll.u32 %v5833_v8, 16 }
 0x25a   :  { %v9845_v22 = vpop.f32.mrf.mxu0 }
 0x25b   :  { %v9848_v54 = vpop.f32.mrf.mxu1  ;;  %6954 = vmatmul.mubr.bf16.gmra.mxu1 %v5051_v26  ;;  %v5054_v26 = vor.u32 %v5052_v14, %v5050_v2 }
 0x25c   :  { %10926 = vst [vmem:[#allocation5_spill] sm:$0xff] %v9848_v54  ;;  %v6500_v56 = vpop.f32.mrf.mxu0  ;;  %6957 = vmatprep.mubr.msk.bf16.mxu1 %vm10575_vm0, %v10696_v17 }
 0x25d   :  { %v6655_v20 = vpop.f32.mrf.mxu1 }
 0x25e   :  { %v9856_v28 = vpop.f32.mrf.mxu0  ;;  %6802 = vmatmul.mubr.bf16.gmra.mxu0 %v10931_v34  ;;  %v5059_v20 = vsel %vm10896_vm2, %v5054_v26, %v5058_v9  ;;  %v10935_v34 = vld [vmem:[#allocation48_spill] sm:$0xff] }
 0x25f   :  { %v9859_v54 = vpop.f32.mrf.mxu1  ;;  %6805 = vmatprep.mubr.msk.bf16.mxu0 %vm10575_vm0, %v10696_v17  ;;  %vm10936_vm10 = vcmp.ne.s16.totalorder %v10935_v34, 0 }
 0x260   :  { %10932 = vst [vmem:[#allocation6_spill] sm:$0xff] %v9859_v54  ;;  %v6503_v41 = vpop.f32.mrf.mxu0  ;;  %v4940_v14 = vsel %vm10936_vm10, %v4921_v46, 0  ;;  %v10939_v54 = vld [vmem:[#allocation51_spill] sm:$0xff] }
 0x261   :  { %v6656_v59 = vpop.f32.mrf.mxu1  ;;  %v10937_v41 = vld [vmem:[#allocation20_spill] sm:$0xff]  ;;  %vm10940_vm14 = vnez %v10939_v54 }
 0x262   :  { %v9863_v56 = vpop.f32.mrf.mxu0  ;;  %vm10938_vm1 = vcmp.ne.s16.totalorder %v10937_v41, 0 }
 0x263   :  { %v9866_v18 = vpop.f32.mrf.mxu1  ;;  %6958 = vmatmul.mubr.bf16.gmra.mxu1 %v5059_v20  ;;  %v4941_v26 = vsel %vm10938_vm1, %v4922_v45, 0  ;;  %v5066_v20 = vrot.slane %v5064_v32, 1  ;;  %v10941_v45 = vld [vmem:[#allocation45_spill] sm:$0xff] }
 0x264   :  { %10933 = vst [vmem:[#allocation3_spill] sm:$0xff] %v9866_v18  ;;  %v6504_v51 = vpop.f32.mrf.mxu0  ;;  %6961 = vmatprep.mubr.msk.bf16.mxu1 %vm10575_vm0, %v10696_v17  ;;  %v5060_v18 = vshrl.u32 %v5832_v4, 16  ;;  %v5834_v27 = vcombine.low %v4940_v14, %v4941_v26  ;;  %v2428_v34 = vadd.f32 %v10941_v45, %v9677_v60  ;;  %v10943_v60 = vld [vmem:[#allocation13_spill] sm:$0xff] }
 0x265   :  { %v6659_v2 = vpop.f32.mrf.mxu1  ;;  %v3986_v51 = vsel %vm10940_vm14, %v3967_v3, 0  ;;  %v2433_v14 = vadd.f32 %v10943_v60, %v9689_v43  ;;  %v10944_v43 = vld [vmem:[#allocation16_spill] sm:$0xff] }
 0x266   :  { %v2648_v59 = vpop.f32.mrf.mxu0  ;;  %6806 = vmatmul.mubr.bf16.gmra.mxu0 %v9465_v55  ;;  %v5062_v46 = vor.u32 %v5060_v18, %v5058_v9  ;;  %v4923_v2 = vld [vmem:[#allocation2 + $0x54] sm:$0x1]  ;;  %v5734_v4 = vcombine.low %v3986_v51, %v3986_v51  ;;  %v5068_v18 = vshrl.u32 %v5833_v8, 16  ;;  %v5072_v9 = vshll.u32 %v5834_v27, 16 }
 0x267   :  { %v9879_v10 = vadd.f32 %v2648_v59, %v2425_v39  ;;  %v9881_v35 = vpop.f32.mrf.mxu1  ;;  %6809 = vmatprep.mubr.msk.bf16.mxu0 %vm10575_vm0, %v10696_v17  ;;  %v4942_v59 = vsel %vm10940_vm14, %v4923_v2, 0  ;;  %v4120_v8 = vshrl.u32 %v9457_v15, 16  ;;  %v5076_v15 = vshrl.u32 %v5834_v27, 16  ;;  %v10948_v27 = vld [vmem:[#allocation18_spill] sm:$0xff] }
 0x268   :  { %v6575_v62 = vpop.f32.mrf.mxu0  ;;  %v5067_v41 = vsel %vm10942_vm3, %v5062_v46, %v5066_v20  ;;  %v4124_v51 = vshll.u32 %v5734_v4, 16  ;;  %v5070_v45 = vor.u32 %v5068_v18, %v5066_v20 }
 0x269   :  { %v6660_v55 = vpop.f32.mrf.mxu1 }
 0x26a   :  { %v2651_v32 = vpop.f32.mrf.mxu0 }
 0x26b   :  { %v9888_v3 = vadd.f32 %v2651_v32, %v2428_v34  ;;  %v9890_v39 = vpop.f32.mrf.mxu1  ;;  %6962 = vmatmul.mubr.bf16.gmra.mxu1 %v5067_v41  ;;  %v5835_v34 = vcombine.low %v4942_v59, %v4942_v59  ;;  %v5074_v32 = vrot.slane %v5072_v9, 1  ;;  %v2436_v41 = vadd.f32 %v10944_v43, %v9698_v57  ;;  %v10946_v57 = vld [vmem:[#allocation17_spill] sm:$0xff] }
 0x26c   :  { %v6576_v62 = vpop.f32.mrf.mxu0  ;;  %6965 = vmatprep.mubr.msk.bf16.mxu1 %vm10575_vm0, %v10696_v17  ;;  %v2441_v9 = vadd.f32 %v10946_v57, %v9713_v58 }
 0x26d   :  { %v6731_v26 = vpop.f32.mrf.mxu1  ;;  %v4122_v62 = vor.u32 %v4120_v8, %v9468_v63  ;;  %v5075_v59 = vsel %vm10945_vm4, %v5070_v45, %v5074_v32  ;;  %v5080_v18 = vshll.u32 %v5835_v34, 16  ;;  %v5078_v45 = vor.u32 %v5076_v15, %v5074_v32 }
 0x26e   :  { %v2656_v46 = vpop.f32.mrf.mxu0  ;;  %6810 = vmatmul.mubr.bf16.gmra.mxu0 %v9475_v13  ;;  %v4126_v13 = vrot.slane %v4124_v51, 1 }
 0x26f   :  { %v9899_v55 = vadd.f32 %v2656_v46, %v2433_v14  ;;  %v9901_v54 = vpop.f32.mrf.mxu1  ;;  %6813 = vmatprep.mubr.msk.bf16.mxu0 %vm10575_vm0, %v10696_v17  ;;  %v5082_v34 = vrot.slane %v5080_v18, 1 }
 0x270   :  { %v6579_v2 = vpop.f32.mrf.mxu0  ;;  %v4127_v63 = vsel %vm10947_vm6, %v4122_v62, %v4126_v13 }
 0x271   :  { %v6732_v4 = vpop.f32.mrf.mxu1 }
 0x272   :  { %v2659_v20 = vpop.f32.mrf.mxu0 }
 0x273   :  { %v9910_v60 = vadd.f32 %v2659_v20, %v2436_v41  ;;  %v9912_v14 = vpop.f32.mrf.mxu1  ;;  %6966 = vmatmul.mubr.bf16.gmra.mxu1 %v5075_v59  ;;  %v2444_v41 = vadd.f32 %v10948_v27, %v9719_v24  ;;  %v5083_v20 = vsel %vm10949_vm13, %v5078_v45, %v5082_v34  ;;  %v7144_v59 = vld [vmem:[#allocation2 + $0x10] sm:$0xf] }
 0x274   :  { %v6580_v26 = vpop.f32.mrf.mxu0  ;;  %6969 = vmatprep.mubr.msk.bf16.mxu1 %vm10575_vm0, %v10696_v17  ;;  %v5793_v18 = vcombine.low %v9492_v52, %v7144_v59 }
 0x275   :  { %v6735_v46 = vpop.f32.mrf.mxu1  ;;  %v10950_v26 = vld [vmem:[#allocation49_spill] sm:$0xff] }
 0x276   :  { %v2664_v51 = vpop.f32.mrf.mxu0  ;;  %6814 = vmatmul.mubr.bf16.gmra.mxu0 %v4127_v63  ;;  %v2449_v15 = vadd.f32 %v10950_v26, %v9735_v6  ;;  %v10954_v26 = vld [vmem:[#allocation54_spill] sm:$0xff] }
 0x277   :  { %v9919_v8 = vadd.f32 %v2664_v51, %v2441_v9  ;;  %v9921_v2 = vpop.f32.mrf.mxu1  ;;  %6885 = vmatprep.mubr.msk.bf16.mxu0 %vm10575_vm0, %v10696_v17  ;;  %v10951_v51 = vld [vmem:[#allocation52_spill] sm:$0xff] }
 0x278   :  { %v6583_v43 = vpop.f32.mrf.mxu0  ;;  %v2452_v45 = vadd.f32 %v10951_v51, %v9745_v37 }
 0x279   :  { %v6736_v4 = vpop.f32.mrf.mxu1 }
 0x27a   :  { %v2667_v58 = vpop.f32.mrf.mxu0 }
 0x27b   :  { %v9928_v62 = vadd.f32 %v2667_v58, %v2444_v41  ;;  %v9930_v13 = vpop.f32.mrf.mxu1  ;;  %6970 = vmatmul.mubr.bf16.gmra.mxu1 %v5083_v20  ;;  %v10952_v41 = vld [vmem:[#allocation53_spill] sm:$0xff] }
 0x27c   :  { %v6584_v32 = vpop.f32.mrf.mxu0  ;;  %v2457_v4 = vadd.f32 %v10952_v41, %v9760_v11 }
 0x27d   :  { %v6739_v57 = vpop.f32.mrf.mxu1  ;;  %v10953_v32 = vcombine.low %v9069_v7, %v9060_v38  ;;  %v7145_v38 = vld [vmem:[#allocation2 + $0x1c] sm:$0xf]  ;;  %v7146_v7 = vld [vmem:[#allocation2 + $0x20] sm:$0xf] }
 0x27e   :  { %v2672_v9 = vpop.f32.mrf.mxu0  ;;  %6886 = vmatmul.mubr.bf16.vlgmr.msra.gmra.mxu0 %v5793_v18 }
 0x27f   :  { %v9935_v24 = vadd.f32 %v2672_v9, %v2449_v15  ;;  %v9937_v46 = vpop.f32.mrf.mxu1  ;;  %6889 = vmatprep.mubr.msk.bf16.mxu0 %vm10575_vm0, %v10696_v17  ;;  %v2460_v15 = vadd.f32 %v10954_v26, %v9773_v5 }
 0x280   :  { %v6587_v63 = vpop.f32.mrf.mxu0 }
 0x281   :  { %v6740_v34 = vpop.f32.mrf.mxu1 }
 0x282   :  { %v2675_v43 = vpop.f32.mrf.mxu0  ;;  %v10955_v34 = vld [vmem:[#allocation55_spill] sm:$0xff] }
 0x283   :  { %v9943_v52 = vadd.f32 %v2675_v43, %v2452_v45  ;;  %v9945_v27 = vpop.f32.mrf.mxu1  ;;  %v5795_v45 = vcombine.low %v7145_v38, %v7146_v7  ;;  %v2465_v43 = vadd.f32 %v10955_v34, %v9789_v16 }
 0x284   :  { %v6588_v6 = vpop.f32.mrf.mxu0 }
 0x285   :  { %v6743_v58 = vpop.f32.mrf.mxu1 }
 0x286   :  { %v2680_v20 = vpop.f32.mrf.mxu0  ;;  %6890 = vmatmul.mubr.bf16.gmra.mxu0 %v10953_v32 }
 0x287   :  { %v9952_v59 = vadd.f32 %v2680_v20, %v2457_v4  ;;  %v9954_v18 = vpop.f32.mrf.mxu1  ;;  %6893 = vmatprep.mubr.msk.bf16.mxu0 %vm10575_vm0, %v10696_v17  ;;  %v10956_v20 = vld [vmem:[#allocation56_spill] sm:$0xff] }
 0x288   :  { %v6591_v37 = vpop.f32.mrf.mxu0  ;;  %v2468_v32 = vadd.f32 %v10956_v20, %v9800_v0 }
 0x289   :  { %v6744_v57 = vpop.f32.mrf.mxu1 }
 0x28a   :  { %v2683_v9 = vpop.f32.mrf.mxu0 }
 0x28b   :  { %v9960_v11 = vadd.f32 %v2683_v9, %v2460_v15  ;;  %v9962_v63 = vpop.f32.mrf.mxu1  ;;  %v10957_v9 = vld [vmem:[#allocation57_spill] sm:$0xff] }
 0x28c   :  { %v6592_v51 = vpop.f32.mrf.mxu0 }
 0x28d   :  { %v6747_v6 = vpop.f32.mrf.mxu1  ;;  %v2473_v51 = vadd.f32 %v10957_v9, %v9815_v21  ;;  %v10961_v9 = vcombine.low %v9361_v12, %v9368_v29  ;;  %v10963_v12 = vld [vmem:[#allocation26_spill] sm:$0xff] }
 0x28e   :  { %v2688_v41 = vpop.f32.mrf.mxu0  ;;  %6894 = vmatmul.mubr.bf16.gmra.mxu0 %v5795_v45  ;;  %v10958_v45 = vcombine.low %v9336_v48, %v9359_v36  ;;  %v10959_v6 = vld [vmem:[#allocation58_spill] sm:$0xff]  ;;  %v10960_v48 = vld [vmem:[#allocation36_spill] sm:$0xff]  ;;  %v2489_v29 = vadd.f32 %v10963_v12, %v9856_v28 }
 0x28f   :  { %v9966_v4 = vadd.f32 %v2688_v41, %v2465_v43  ;;  %v9968_v58 = vpop.f32.mrf.mxu1  ;;  %6897 = vmatprep.mubr.msk.bf16.mxu0 %vm10575_vm0, %v10696_v17  ;;  %v2476_v41 = vadd.f32 %v10959_v6, %v9827_v40  ;;  %v2481_v36 = vadd.f32 %v10960_v48, %v9838_v42  ;;  %v10964_v48 = vcombine.low %v9385_v50, %v9396_v31 }
 0x290   :  { %v6595_v5 = vpop.f32.mrf.mxu0  ;;  %v3334_v50 = vadd.f32 %v9679_v19, %v9879_v10 }
 0x291   :  { %v6748_v37 = vpop.f32.mrf.mxu1 }
 0x292   :  { %v2691_v26 = vpop.f32.mrf.mxu0 }
 0x293   :  { %v9974_v15 = vadd.f32 %v2691_v26, %v2468_v32  ;;  %v9976_v57 = vpop.f32.mrf.mxu1 }
 0x294   :  { %v6596_v16 = vpop.f32.mrf.mxu0 }
 0x295   :  { %v6751_v38 = vpop.f32.mrf.mxu1 }
 0x296   :  { %v2696_v7 = vpop.f32.mrf.mxu0  ;;  %6898 = vmatmul.mubr.bf16.gmra.mxu0 %v10958_v45 }
 0x297   :  { %v9983_v34 = vadd.f32 %v2696_v7, %v2473_v51  ;;  %v9985_v43 = vpop.f32.mrf.mxu1  ;;  %6901 = vmatprep.mubr.msk.bf16.mxu0 %vm10575_vm0, %v10696_v17  ;;  %v10962_v7 = vld [vmem:[#allocation39_spill] sm:$0xff] }
 0x298   :  { %v6599_v0 = vpop.f32.mrf.mxu0  ;;  %v2484_v45 = vadd.f32 %v10962_v7, %v9845_v22 }
 0x299   :  { %v6752_v5 = vpop.f32.mrf.mxu1 }
 0x29a   :  { %v2699_v20 = vpop.f32.mrf.mxu0 }
 0x29b   :  { %v9991_v21 = vadd.f32 %v2699_v20, %v2476_v41  ;;  %v9993_v32 = vpop.f32.mrf.mxu1 }
 0x29c   :  { %v6600_v37 = vpop.f32.mrf.mxu0 }
 0x29d   :  { %v6755_v26 = vpop.f32.mrf.mxu1 }
 0x29e   :  { %v2704_v16 = vpop.f32.mrf.mxu0  ;;  %6902 = vmatmul.mubr.bf16.gmra.mxu0 %v10961_v9 }
 0x29f   :  { %v10000_v51 = vadd.f32 %v2704_v16, %v2481_v36  ;;  %v10002_v38 = vpop.f32.mrf.mxu1  ;;  %6905 = vmatprep.mubr.msk.bf16.mxu0 %vm10575_vm0, %v10696_v17  ;;  %v10965_v16 = vld [vmem:[#allocation15_spill] sm:$0xff] }
 0x2a0   :  { %v6603_v40 = vpop.f32.mrf.mxu0  ;;  %v2492_v9 = vadd.f32 %v10965_v16, %v9863_v56 }
 0x2a1   :  { %v6756_v0 = vpop.f32.mrf.mxu1 }
 0x2a2   :  { %v2707_v6 = vpop.f32.mrf.mxu0 }
 0x2a3   :  { %v10008_v42 = vadd.f32 %v2707_v6, %v2484_v45  ;;  %v10010_v41 = vpop.f32.mrf.mxu1 }
 0x2a4   :  { %v6604_v5 = vpop.f32.mrf.mxu0 }
 0x2a5   :  { %v6759_v20 = vpop.f32.mrf.mxu1  ;;  %v10966_v5 = vcombine.low %v9404_v49, %v9421_v61  ;;  %v3336_v49 = vadd.f32 %v9700_v53, %v9899_v55 }
 0x2a6   :  { %v2712_v37 = vpop.f32.mrf.mxu0  ;;  %6906 = vmatmul.mubr.bf16.gmra.mxu0 %v10964_v48  ;;  %v3335_v20 = vadd.f32 %v9692_v1, %v9888_v3  ;;  %v3337_v3 = vadd.f32 %v9715_v44, %v9910_v60  ;;  %v3339_v60 = vadd.f32 %v9737_v30, %v9928_v62 }
 0x2a7   :  { %v10017_v36 = vadd.f32 %v2712_v37, %v2489_v29  ;;  %v10019_v26 = vpop.f32.mrf.mxu1  ;;  %6909 = vmatprep.mubr.msk.bf16.mxu0 %vm10575_vm0, %v10696_v17 }
 0x2a8   :  { %v6607_v22 = vpop.f32.mrf.mxu0 }
 0x2a9   :  { %v6760_v40 = vpop.f32.mrf.mxu1 }
 0x2aa   :  { %v2715_v7 = vpop.f32.mrf.mxu0 }
 0x2ab   :  { %v10025_v28 = vadd.f32 %v2715_v7, %v2492_v9  ;;  %v10027_v45 = vpop.f32.mrf.mxu1  ;;  %v10967_v9 = vcombine.low %v9423_v25, %v9439_v33  ;;  %v7147_v25 = vld [vmem:[#allocation2 + $0x4c] sm:$0xf] }
 0x2ac   :  { %v6608_v0 = vpop.f32.mrf.mxu0  ;;  %v5801_v33 = vcombine.low %v7147_v25, %v9669_v23 }
 0x2ad   :  { %v6763_v31 = vpop.f32.mrf.mxu1 }
 0x2ae   :  { %v3618_v6 = vpop.f32.mrf.mxu0  ;;  %6910 = vmatmul.mubr.bf16.gmra.mxu0 %v10966_v5 }
 0x2af   :  { %v10034_v12 = vadd.f32 %v3618_v6, %v3334_v50  ;;  %v10036_v29 = vpop.f32.mrf.mxu1  ;;  %6913 = vmatprep.mubr.msk.bf16.mxu0 %vm10575_vm0, %v10696_v17  ;;  %v3338_v6 = vadd.f32 %v9721_v47, %v9919_v8  ;;  %v10968_v47 = vld [vmem:[#allocation42_spill] sm:$0xff] }
 0x2b0   :  { %v6679_v56 = vpop.f32.mrf.mxu0  ;;  %v3340_v8 = vadd.f32 %v10968_v47, %v9935_v24 }
 0x2b1   :  { %v6764_v37 = vpop.f32.mrf.mxu1 }
 0x2b2   :  { %v3621_v48 = vpop.f32.mrf.mxu0 }
 0x2b3   :  { %v10042_v19 = vadd.f32 %v3621_v48, %v3335_v20  ;;  %v10044_v10 = vpop.f32.mrf.mxu1 }
 0x2b4   :  { %v6680_v22 = vpop.f32.mrf.mxu0 }
 0x2b5   :  { %v6835_v61 = vpop.f32.mrf.mxu1 }
 0x2b6   :  { %v3626_v16 = vpop.f32.mrf.mxu0  ;;  %6914 = vmatmul.mubr.bf16.gmra.mxu0 %v10967_v9  ;;  %v10969_v9 = vmov 0  }
 0x2b7   :  { %v10051_v40 = vadd.f32 %v3626_v16, %v3336_v49  ;;  %v10053_v7 = vpop.f32.mrf.mxu1  ;;  %6917 = vmatprep.mubr.msk.bf16.mxu0 %vm10575_vm0, %v10696_v17  ;;  %5264 = vst [vmem:[%s10375_s6] sm:$0xf] %v10969_v9  ;;  %5265 = vst [vmem:[%s10375_s6 + $0x4] sm:$0xf] %v10969_v9 }
 0x2b8   :  { %v6683_v1 = vpop.f32.mrf.mxu0 }
 0x2b9   :  { %v6836_v0 = vpop.f32.mrf.mxu1 }
 0x2ba   :  { %v3629_v50 = vpop.f32.mrf.mxu0 }
 0x2bb   :  { %v10059_v53 = vadd.f32 %v3629_v50, %v3337_v3  ;;  %v10061_v55 = vpop.f32.mrf.mxu1  ;;  %v10970_v3 = vld [vmem:[#allocation43_spill] sm:$0xff] }
 0x2bc   :  { %v6684_v31 = vpop.f32.mrf.mxu0  ;;  %v3341_v24 = vadd.f32 %v10970_v3, %v9943_v52 }
 0x2bd   :  { %v6839_v5 = vpop.f32.mrf.mxu1 }
 0x2be   :  { %v3634_v56 = vpop.f32.mrf.mxu0  ;;  %6918 = vmatmul.mubr.bf16.gmra.mxu0 %v5801_v33 }
 0x2bf   :  { %v10066_v17 = vadd.f32 %v3634_v56, %v3338_v6  ;;  %v10068_v20 = vpop.f32.mrf.mxu1  ;;  %v10971_v6 = vld [vmem:[#allocation44_spill] sm:$0xff] }
 0x2c0   :  { %v6687_v44 = vpop.f32.mrf.mxu0  ;;  %v3342_v5 = vadd.f32 %v10971_v6, %v9952_v59  ;;  %v10974_v6 = vld [vmem:[#allocation24_spill] sm:$0xff] }
 0x2c1   :  { %v6840_v37 = vpop.f32.mrf.mxu1 }
 0x2c2   :  { %v3637_v48 = vpop.f32.mrf.mxu0 }
 0x2c3   :  { %v10072_v22 = vadd.f32 %v3637_v48, %v3339_v60  ;;  %v10074_v49 = vpop.f32.mrf.mxu1 }
 0x2c4   :  { %v6688_v23 = vpop.f32.mrf.mxu0 }
 0x2c5   :  { %v6843_v61 = vpop.f32.mrf.mxu1  ;;  %v10972_v23 = vld [vmem:[#allocation21_spill] sm:$0xff] }
 0x2c6   :  { %v3642_v16 = vpop.f32.mrf.mxu0  ;;  %v3343_v52 = vadd.f32 %v10972_v23, %v9960_v11  ;;  %v3345_v11 = vadd.f32 %v10974_v6, %v9974_v15 }
 0x2c7   :  { %v10086_v30 = vadd.f32 %v3642_v16, %v3340_v8  ;;  %v10088_v62 = vpop.f32.mrf.mxu1 }
 0x2c8   :  { %v6691_v1 = vpop.f32.mrf.mxu0 }
 0x2c9   :  { %v6844_v0 = vpop.f32.mrf.mxu1  ;;  %v10973_v1 = vld [vmem:[#allocation22_spill] sm:$0xff] }
 0x2ca   :  { %v3645_v50 = vpop.f32.mrf.mxu0  ;;  %v3344_v59 = vadd.f32 %v10973_v1, %v9966_v4 }
 0x2cb   :  { %v10092_v31 = vadd.f32 %v3645_v50, %v3341_v24  ;;  %v10094_v25 = vpop.f32.mrf.mxu1 }
 0x2cc   :  { %v6692_v33 = vpop.f32.mrf.mxu0 }
 0x2cd   :  { %v6847_v56 = vpop.f32.mrf.mxu1 }
 0x2ce   :  { %v3650_v44 = vpop.f32.mrf.mxu0 }
 0x2cf   :  { %v10098_v60 = vadd.f32 %v3650_v44, %v3342_v5  ;;  %v10100_v37 = vpop.f32.mrf.mxu1 }
 0x2d0   :  { %v6695_v48 = vpop.f32.mrf.mxu0 }
 0x2d1   :  { %v6848_v47 = vpop.f32.mrf.mxu1 }
 0x2d2   :  { %v3653_v8 = vpop.f32.mrf.mxu0 }
 0x2d3   :  { %v10104_v61 = vadd.f32 %v3653_v8, %v3343_v52  ;;  %v10106_v16 = vpop.f32.mrf.mxu1  ;;  %v10975_v52 = vld [vmem:[#allocation27_spill] sm:$0xff] }
 0x2d4   :  { %v6696_v9 = vpop.f32.mrf.mxu0  ;;  %v3346_v4 = vadd.f32 %v10975_v52, %v9983_v34 }
 0x2d5   :  { %v6851_v3 = vpop.f32.mrf.mxu1 }
 0x2d6   :  { %v3658_v24 = vpop.f32.mrf.mxu0  ;;  %v10976_v3 = vld [vmem:[#allocation46_spill] sm:$0xff] }
 0x2d7   :  { %v10110_v0 = vadd.f32 %v3658_v24, %v3344_v59  ;;  %v10112_v50 = vpop.f32.mrf.mxu1  ;;  %v3347_v15 = vadd.f32 %v10976_v3, %v9991_v21 }
 0x2d8   :  { %v6699_v33 = vpop.f32.mrf.mxu0 }
 0x2d9   :  { %v6852_v5 = vpop.f32.mrf.mxu1 }
 0x2da   :  { %v3661_v56 = vpop.f32.mrf.mxu0 }
 0x2db   :  { %v10116_v44 = vadd.f32 %v3661_v56, %v3345_v11  ;;  %v10118_v48 = vpop.f32.mrf.mxu1  ;;  %v10978_v56 = vld [vmem:[#allocation5_spill] sm:$0xff] }
 0x2dc   :  { %v6700_v23 = vpop.f32.mrf.mxu0  ;;  %v3348_v34 = vadd.f32 %v10978_v56, %v10000_v51 }
 0x2dd   :  { %v6855_v47 = vpop.f32.mrf.mxu1 }
 0x2de   :  { %v3666_v8 = vpop.f32.mrf.mxu0 }
 0x2df   :  { %v10122_v9 = vadd.f32 %v3666_v8, %v3346_v4  ;;  %v10124_v1 = vpop.f32.mrf.mxu1 }
 0x2e0   :  { %v6703_v59 = vpop.f32.mrf.mxu0 }
 0x2e1   :  { %v6856_v24 = vpop.f32.mrf.mxu1  ;;  %v10979_v59 = vld [vmem:[#allocation6_spill] sm:$0xff] }
 0x2e2   :  { %v3669_v33 = vpop.f32.mrf.mxu0  ;;  %v3349_v21 = vadd.f32 %v10979_v59, %v10008_v42  ;;  %v3351_v42 = vadd.f32 %v9881_v35, %v10025_v28  ;;  %v3932_v35 = vadd.f32 %v9901_v54, %v10042_v19  ;;  %v3934_v54 = vadd.f32 %v9921_v2, %v10059_v53 }
 0x2e3   :  { %v10128_v6 = vadd.f32 %v3669_v33, %v3347_v15  ;;  %v10130_v11 = vpop.f32.mrf.mxu1  ;;  %v3936_v2 = vadd.f32 %v9937_v46, %v10072_v22  ;;  %v3938_v46 = vadd.f32 %v9954_v18, %v10092_v31  ;;  %v3940_v18 = vadd.f32 %v9968_v58, %v10104_v61 }
 0x2e4   :  { %10977 = vst [vmem:[#allocation4_spill] sm:$0xff] %v10130_v11  ;;  %v6704_v5 = vpop.f32.mrf.mxu0  ;;  %v10980_v11 = vld [vmem:[#allocation3_spill] sm:$0xff]  ;;  %v3942_v58 = vadd.f32 %v9985_v43, %v10116_v44 }
 0x2e5   :  { %v6859_v23 = vpop.f32.mrf.mxu1  ;;  %v3350_v51 = vadd.f32 %v10980_v11, %v10017_v36  ;;  %v3931_v36 = vadd.f32 %v9890_v39, %v10034_v12  ;;  %v3933_v39 = vadd.f32 %v9912_v14, %v10051_v40  ;;  %v3935_v14 = vadd.f32 %v9930_v13, %v10066_v17 }
 0x2e6   :  { %v3674_v52 = vpop.f32.mrf.mxu0  ;;  %v3937_v13 = vadd.f32 %v9945_v27, %v10086_v30  ;;  %v3939_v27 = vadd.f32 %v9962_v63, %v10098_v60  ;;  %v3941_v63 = vadd.f32 %v9976_v57, %v10110_v0  ;;  %v3943_v57 = vadd.f32 %v9993_v32, %v10122_v9 }
 0x2e7   :  { %v10134_v4 = vadd.f32 %v3674_v52, %v3348_v34  ;;  %v10136_v47 = vpop.f32.mrf.mxu1  ;;  %v3944_v43 = vadd.f32 %v10002_v38, %v10128_v6 }
 0x2e8   :  { %v6707_v8 = vpop.f32.mrf.mxu0 }
 0x2e9   :  { %v6860_v3 = vpop.f32.mrf.mxu1  ;;  %v3945_v32 = vadd.f32 %v10010_v41, %v10134_v4 }
 0x2ea   :  { %v3677_v24 = vpop.f32.mrf.mxu0 }
 0x2eb   :  { %v10140_v15 = vadd.f32 %v3677_v24, %v3349_v21  ;;  %v10142_v33 = vpop.f32.mrf.mxu1 }
 0x2ec   :  { %v6708_v5 = vpop.f32.mrf.mxu0 }
 0x2ed   :  { %v6863_v56 = vpop.f32.mrf.mxu1  ;;  %v3946_v38 = vadd.f32 %v10019_v26, %v10140_v15 }
 0x2ee   :  { %v3682_v23 = vpop.f32.mrf.mxu0 }
 0x2ef   :  { %v10146_v34 = vadd.f32 %v3682_v23, %v3350_v51  ;;  %v10148_v52 = vpop.f32.mrf.mxu1 }
 0x2f0   :  { %v6711_v8 = vpop.f32.mrf.mxu0 }
 0x2f1   :  { %v6864_v59 = vpop.f32.mrf.mxu1  ;;  %v3947_v41 = vadd.f32 %v10027_v45, %v10146_v34 }
 0x2f2   :  { %v3685_v3 = vpop.f32.mrf.mxu0 }
 0x2f3   :  { %v10152_v21 = vadd.f32 %v3685_v3, %v3351_v42  ;;  %v10154_v24 = vpop.f32.mrf.mxu1 }
 0x2f4   :  { %v6712_v5 = vpop.f32.mrf.mxu0 }
 0x2f5   :  { %v6867_v11 = vpop.f32.mrf.mxu1  ;;  %v3948_v26 = vadd.f32 %v10036_v29, %v10152_v21 }
 0x2f6   :  { %v4219_v56 = vpop.f32.mrf.mxu0 }
 0x2f7   :  { %v10158_v51 = vadd.f32 %v4219_v56, %v3931_v36  ;;  %v10160_v23 = vpop.f32.mrf.mxu1 }
 0x2f8   :  { %10981 = vst [vmem:[#allocation47_spill] sm:$0xff] %v10160_v23  ;;  %v6783_v8 = vpop.f32.mrf.mxu0 }
 0x2f9   :  { %v6868_v28 = vpop.f32.mrf.mxu1  ;;  %v4645_v45 = vadd.f32 %v10044_v10, %v10158_v51 }
 0x2fa   :  { %v4222_v59 = vpop.f32.mrf.mxu0 }
 0x2fb   :  { %v10164_v42 = vadd.f32 %v4222_v59, %v3932_v35  ;;  %v10166_v3 = vpop.f32.mrf.mxu1 }
 0x2fc   :  { %v6784_v5 = vpop.f32.mrf.mxu0 }
 0x2fd   :  { %v6939_v12 = vpop.f32.mrf.mxu1  ;;  %v4646_v29 = vadd.f32 %v10053_v7, %v10164_v42 }
 0x2fe   :  { %v4227_v11 = vpop.f32.mrf.mxu0 }
 0x2ff   :  { %v10170_v36 = vadd.f32 %v4227_v11, %v3933_v39  ;;  %v10172_v56 = vpop.f32.mrf.mxu1 }
 0x300   :  { %v6787_v8 = vpop.f32.mrf.mxu0 }
 0x301   :  { %v6940_v19 = vpop.f32.mrf.mxu1 }
 0x302   :  { %v4230_v28 = vpop.f32.mrf.mxu0 }
 0x303   :  { %v10176_v35 = vadd.f32 %v4230_v28, %v3934_v54  ;;  %v10178_v59 = vpop.f32.mrf.mxu1 }
 0x304   :  { %v6788_v5 = vpop.f32.mrf.mxu0 }
 0x305   :  { %v6943_v40 = vpop.f32.mrf.mxu1 }
 0x306   :  { %v4235_v12 = vpop.f32.mrf.mxu0 }
 0x307   :  { %v10182_v39 = vadd.f32 %v4235_v12, %v3935_v14  ;;  %v10184_v11 = vpop.f32.mrf.mxu1 }
 0x308   :  { %v6791_v8 = vpop.f32.mrf.mxu0 }
 0x309   :  { %v6944_v53 = vpop.f32.mrf.mxu1 }
 0x30a   :  { %v4238_v19 = vpop.f32.mrf.mxu0 }
 0x30b   :  { %v10188_v54 = vadd.f32 %v4238_v19, %v3936_v2  ;;  %v10190_v28 = vpop.f32.mrf.mxu1 }
 0x30c   :  { %v6792_v5 = vpop.f32.mrf.mxu0 }
 0x30d   :  { %v6947_v17 = vpop.f32.mrf.mxu1 }
 0x30e   :  { %v4243_v40 = vpop.f32.mrf.mxu0 }
 0x30f   :  { %v10194_v14 = vadd.f32 %v4243_v40, %v3937_v13  ;;  %v10196_v12 = vpop.f32.mrf.mxu1 }
 0x310   :  { %v6795_v8 = vpop.f32.mrf.mxu0 }
 0x311   :  { %v6948_v22 = vpop.f32.mrf.mxu1 }
 0x312   :  { %v4246_v53 = vpop.f32.mrf.mxu0 }
 0x313   :  { %v10200_v2 = vadd.f32 %v4246_v53, %v3938_v46  ;;  %v10202_v19 = vpop.f32.mrf.mxu1 }
 0x314   :  { %v6796_v5 = vpop.f32.mrf.mxu0 }
 0x315   :  { %v6951_v30 = vpop.f32.mrf.mxu1 }
 0x316   :  { %v4251_v17 = vpop.f32.mrf.mxu0 }
 0x317   :  { %v10206_v13 = vadd.f32 %v4251_v17, %v3939_v27  ;;  %v10208_v40 = vpop.f32.mrf.mxu1 }
 0x318   :  { %v6799_v8 = vpop.f32.mrf.mxu0 }
 0x319   :  { %v6952_v31 = vpop.f32.mrf.mxu1 }
 0x31a   :  { %v4254_v22 = vpop.f32.mrf.mxu0 }
 0x31b   :  { %v10212_v46 = vadd.f32 %v4254_v22, %v3940_v18  ;;  %v10214_v53 = vpop.f32.mrf.mxu1 }
 0x31c   :  { %v6800_v5 = vpop.f32.mrf.mxu0 }
 0x31d   :  { %v6955_v60 = vpop.f32.mrf.mxu1 }
 0x31e   :  { %v4259_v30 = vpop.f32.mrf.mxu0 }
 0x31f   :  { %v10218_v27 = vadd.f32 %v4259_v30, %v3941_v63  ;;  %v10220_v17 = vpop.f32.mrf.mxu1 }
 0x320   :  { %v6803_v8 = vpop.f32.mrf.mxu0 }
 0x321   :  { %v6956_v61 = vpop.f32.mrf.mxu1 }
 0x322   :  { %v4262_v31 = vpop.f32.mrf.mxu0 }
 0x323   :  { %v10224_v18 = vadd.f32 %v4262_v31, %v3942_v58  ;;  %v10226_v22 = vpop.f32.mrf.mxu1 }
 0x324   :  { %v6804_v5 = vpop.f32.mrf.mxu0 }
 0x325   :  { %v6959_v0 = vpop.f32.mrf.mxu1 }
 0x326   :  { %v4267_v60 = vpop.f32.mrf.mxu0 }
 0x327   :  { %v10230_v63 = vadd.f32 %v4267_v60, %v3943_v57  ;;  %v10232_v30 = vpop.f32.mrf.mxu1 }
 0x328   :  { %v6807_v8 = vpop.f32.mrf.mxu0 }
 0x329   :  { %v6960_v44 = vpop.f32.mrf.mxu1 }
 0x32a   :  { %v4270_v61 = vpop.f32.mrf.mxu0 }
 0x32b   :  { %v10236_v58 = vadd.f32 %v4270_v61, %v3944_v43  ;;  %v10238_v31 = vpop.f32.mrf.mxu1 }
 0x32c   :  { %v6808_v5 = vpop.f32.mrf.mxu0 }
 0x32d   :  { %v6963_v9 = vpop.f32.mrf.mxu1 }
 0x32e   :  { %v4275_v0 = vpop.f32.mrf.mxu0 }
 0x32f   :  { %v10242_v57 = vadd.f32 %v4275_v0, %v3945_v32  ;;  %v10244_v60 = vpop.f32.mrf.mxu1 }
 0x330   :  { %v6811_v8 = vpop.f32.mrf.mxu0 }
 0x331   :  { %v6964_v6 = vpop.f32.mrf.mxu1 }
 0x332   :  { %v4278_v44 = vpop.f32.mrf.mxu0 }
 0x333   :  { %v10248_v43 = vadd.f32 %v4278_v44, %v3946_v38  ;;  %v10250_v61 = vpop.f32.mrf.mxu1 }
 0x334   :  { %v6812_v5 = vpop.f32.mrf.mxu0 }
 0x335   :  { %v6967_v4 = vpop.f32.mrf.mxu1 }
 0x336   :  { %v4283_v9 = vpop.f32.mrf.mxu0 }
 0x337   :  { %v10254_v32 = vadd.f32 %v4283_v9, %v3947_v41  ;;  %v10256_v0 = vpop.f32.mrf.mxu1 }
 0x338   :  { %v6815_v8 = vpop.f32.mrf.mxu0 }
 0x339   :  { %v6968_v15 = vpop.f32.mrf.mxu1 }
 0x33a   :  { %v4286_v6 = vpop.f32.mrf.mxu0 }
 0x33b   :  { %v10260_v38 = vadd.f32 %v4286_v6, %v3948_v26  ;;  %v10262_v44 = vpop.f32.mrf.mxu1  ;;  %v10274_v26 = vld [vmem:[%s10376_s5] ss:$0 sm:$0xff] }
 0x33c   :  { %v6816_v5 = vpop.f32.mrf.mxu0 }
 0x33d   :  { %v6971_v34 = vpop.f32.mrf.mxu1 }
 0x33e   :  { %v4816_v4 = vpop.f32.mrf.mxu0 }
 0x33f   :  { %v4887_v41 = vadd.f32 %v4816_v4, %v4645_v45  ;;  %v10266_v9 = vpop.f32.mrf.mxu1 }
 0x340   :  { %v6887_v23 = vpop.f32.mrf.mxu0 }
 0x341   :  { %v5246_v8 = vadd.f32 %v10166_v3, %v4887_v41  ;;  %v6972_v21 = vpop.f32.mrf.mxu1  ;;  %v4647_v23 = vadd.f32 %v10061_v55, %v10170_v36 }
 0x342   :  { %v4819_v15 = vpop.f32.mrf.mxu0 }
 0x343   :  { %v4888_v6 = vadd.f32 %v4819_v15, %v4646_v29  ;;  %v5273_v51 = vadd.f32 %v10274_v26, %v5246_v8  ;;  %v4648_v29 = vadd.f32 %v10068_v20, %v10176_v35 }
 0x344   :  { %v6888_v10 = vpop.f32.mrf.mxu0 }
 0x345   :  { %v5247_v5 = vadd.f32 %v10172_v56, %v4888_v6  ;;  %v5291_v34 = vmax.f32 %v5273_v51, 0.0  ;;  %v4649_v56 = vadd.f32 %v10074_v49, %v10182_v39 }
 0x346   :  { %v4824_v3 = vpop.f32.mrf.mxu0 }
 0x347   :  { %v5274_v45 = vadd.f32 %v10274_v26, %v5247_v5  ;;  %v4889_v7 = vadd.f32 %v4824_v3, %v4647_v23  ;;  %v4650_v3 = vadd.f32 %v10088_v62, %v10188_v54 }
 0x348   :  { %v6891_v42 = vpop.f32.mrf.mxu0 }
 0x349   :  { %v5292_v4 = vmax.f32 %v5274_v45, 0.0  ;;  %v5248_v41 = vadd.f32 %v10178_v59, %v4889_v7 }
 0x34a   :  { %v4827_v21 = vpop.f32.mrf.mxu0 }
 0x34b   :  { %v5947_v15 = vpack.c.bf16 %v5292_v4, %v5291_v34  ;;  %v4890_v8 = vadd.f32 %v4827_v21, %v4648_v29  ;;  %v5275_v55 = vadd.f32 %v10274_v26, %v5248_v41 }
 0x34c   :  { %v6892_v10 = vpop.f32.mrf.mxu0 }
 0x34d   :  { %5998 = vst [vmem:[%s10375_s6 + $0x8] sm:$0xff] %v5947_v15   ;;  %v5249_v36 = vadd.f32 %v10184_v11, %v4890_v8  ;;  %v5293_v35 = vmax.f32 %v5275_v55, 0.0  ;;  %v4651_v11 = vadd.f32 %v10094_v25, %v10194_v14  ;;  %v4652_v15 = vadd.f32 %v10100_v37, %v10200_v2 }
 0x34e   :  { %v4832_v6 = vpop.f32.mrf.mxu0 }
 0x34f   :  { %v5276_v59 = vadd.f32 %v10274_v26, %v5249_v36  ;;  %v4891_v51 = vadd.f32 %v4832_v6, %v4649_v56 }
 0x350   :  { %v6895_v20 = vpop.f32.mrf.mxu0 }
 0x351   :  { %v5294_v5 = vmax.f32 %v5276_v59, 0.0  ;;  %v5250_v23 = vadd.f32 %v10190_v28, %v4891_v51  ;;  %v4654_v20 = vadd.f32 %v10112_v50, %v10212_v46 }
 0x352   :  { %v4835_v45 = vpop.f32.mrf.mxu0 }
 0x353   :  { %v5952_v7 = vpack.c.bf16 %v5294_v5, %v5293_v35  ;;  %v4892_v42 = vadd.f32 %v4835_v45, %v4650_v3  ;;  %v5277_v49 = vadd.f32 %v10274_v26, %v5250_v23 }
 0x354   :  { %v6896_v34 = vpop.f32.mrf.mxu0 }
 0x355   :  { %5999 = vst [vmem:[%s10375_s6 + $0x10] sm:$0xff] %v5952_v7   ;;  %v5251_v39 = vadd.f32 %v10196_v12, %v4892_v42  ;;  %v5295_v54 = vmax.f32 %v5277_v49, 0.0  ;;  %v4653_v12 = vadd.f32 %v10106_v16, %v10206_v13  ;;  %v4656_v49 = vadd.f32 %v10124_v1, %v10224_v18 }
 0x356   :  { %v4840_v4 = vpop.f32.mrf.mxu0 }
 0x357   :  { %v5278_v28 = vadd.f32 %v10274_v26, %v5251_v39  ;;  %v4893_v41 = vadd.f32 %v4840_v4, %v4651_v11 }
 0x358   :  { %v6899_v62 = vpop.f32.mrf.mxu0 }
 0x359   :  { %v5296_v29 = vmax.f32 %v5278_v28, 0.0  ;;  %v5252_v21 = vadd.f32 %v10202_v19, %v4893_v41 }
 0x35a   :  { %v4843_v8 = vpop.f32.mrf.mxu0 }
 0x35b   :  { %v5957_v10 = vpack.c.bf16 %v5296_v29, %v5295_v54  ;;  %v4894_v55 = vadd.f32 %v4843_v8, %v4652_v15  ;;  %v5279_v25 = vadd.f32 %v10274_v26, %v5252_v21  ;;  %v4658_v15 = vadd.f32 %v10136_v47, %v10236_v58 }
 0x35c   :  { %v6900_v36 = vpop.f32.mrf.mxu0 }
 0x35d   :  { %6000 = vst [vmem:[%s10375_s6 + $0x18] sm:$0xff] %v5957_v10   ;;  %v5253_v14 = vadd.f32 %v10208_v40, %v4894_v55  ;;  %v5297_v2 = vmax.f32 %v5279_v25, 0.0  ;;  %v4655_v40 = vadd.f32 %v10118_v48, %v10218_v27  ;;  %v4659_v25 = vadd.f32 %v10142_v33, %v10242_v57 }
 0x35e   :  { %v4848_v56 = vpop.f32.mrf.mxu0 }
 0x35f   :  { %v5280_v19 = vadd.f32 %v10274_v26, %v5253_v14  ;;  %v4895_v6 = vadd.f32 %v4848_v56, %v4653_v12 }
 0x360   :  { %v6903_v37 = vpop.f32.mrf.mxu0 }
 0x361   :  { %v5298_v59 = vmax.f32 %v5280_v19, 0.0  ;;  %v5254_v51 = vadd.f32 %v10214_v53, %v4895_v6  ;;  %v4660_v6 = vadd.f32 %v10148_v52, %v10248_v43 }
 0x362   :  { %v4851_v35 = vpop.f32.mrf.mxu0 }
 0x363   :  { %v5962_v5 = vpack.c.bf16 %v5298_v59, %v5297_v2  ;;  %v4896_v23 = vadd.f32 %v4851_v35, %v4654_v20  ;;  %v5281_v16 = vadd.f32 %v10274_v26, %v5254_v51 }
 0x364   :  { %v6904_v3 = vpop.f32.mrf.mxu0 }
 0x365   :  { %6001 = vst [vmem:[%s10375_s6 + $0x20] sm:$0xff] %v5962_v5   ;;  %v5255_v13 = vadd.f32 %v10220_v17, %v4896_v23  ;;  %v5299_v46 = vmax.f32 %v5281_v16, 0.0  ;;  %v10982_v17 = vld [vmem:[#allocation4_spill] sm:$0xff]  ;;  %v10983_v3 = vld [vmem:[#allocation47_spill] sm:$0xff] }
 0x366   :  { %v4856_v45 = vpop.f32.mrf.mxu0  ;;  %v4657_v41 = vadd.f32 %v10982_v17, %v10230_v63  ;;  %v4662_v16 = vadd.f32 %v10983_v3, %v10260_v38 }
 0x367   :  { %v5282_v53 = vadd.f32 %v10274_v26, %v5255_v13  ;;  %v4897_v7 = vadd.f32 %v4856_v45, %v4655_v40 }
 0x368   :  { %v6907_v50 = vpop.f32.mrf.mxu0 }
 0x369   :  { %v5300_v42 = vmax.f32 %v5282_v53, 0.0  ;;  %v5256_v34 = vadd.f32 %v10226_v22, %v4897_v7 }
 0x36a   :  { %v4859_v39 = vpop.f32.mrf.mxu0 }
 0x36b   :  { %v5967_v11 = vpack.c.bf16 %v5300_v42, %v5299_v46  ;;  %v4898_v4 = vadd.f32 %v4859_v39, %v4656_v49  ;;  %v5283_v48 = vadd.f32 %v10274_v26, %v5256_v34 }
 0x36c   :  { %v6908_v28 = vpop.f32.mrf.mxu0 }
 0x36d   :  { %6002 = vst [vmem:[%s10375_s6 + $0x28] sm:$0xff] %v5967_v11   ;;  %v5257_v27 = vadd.f32 %v10232_v30, %v4898_v4  ;;  %v5301_v18 = vmax.f32 %v5283_v48, 0.0 }
 0x36e   :  { %v4864_v62 = vpop.f32.mrf.mxu0 }
 0x36f   :  { %v5284_v22 = vadd.f32 %v10274_v26, %v5257_v27  ;;  %v4899_v54 = vadd.f32 %v4864_v62, %v4657_v41 }
 0x370   :  { %v6911_v1 = vpop.f32.mrf.mxu0 }
 0x371   :  { %v5302_v29 = vmax.f32 %v5284_v22, 0.0  ;;  %v5258_v21 = vadd.f32 %v10238_v31, %v4899_v54 }
 0x372   :  { %v4867_v8 = vpop.f32.mrf.mxu0 }
 0x373   :  { %v5972_v10 = vpack.c.bf16 %v5302_v29, %v5301_v18  ;;  %v4900_v55 = vadd.f32 %v4867_v8, %v4658_v15  ;;  %v5285_v63 = vadd.f32 %v10274_v26, %v5258_v21 }
 0x374   :  { %v6912_v36 = vpop.f32.mrf.mxu0 }
 0x375   :  { %6003 = vst [vmem:[%s10375_s6 + $0x30] sm:$0xff] %v5972_v10   ;;  %v5259_v30 = vadd.f32 %v10244_v60, %v4900_v55  ;;  %v5303_v58 = vmax.f32 %v5285_v63, 0.0  ;;  %v4661_v60 = vadd.f32 %v10154_v24, %v10254_v32 }
 0x376   :  { %v4872_v14 = vpop.f32.mrf.mxu0 }
 0x377   :  { %v5286_v31 = vadd.f32 %v10274_v26, %v5259_v30  ;;  %v4901_v12 = vadd.f32 %v4872_v14, %v4659_v25 }
 0x378   :  { %v6915_v47 = vpop.f32.mrf.mxu0 }
 0x379   :  { %v5304_v56 = vmax.f32 %v5286_v31, 0.0  ;;  %v5260_v19 = vadd.f32 %v10250_v61, %v4901_v12 }
 0x37a   :  { %v4875_v37 = vpop.f32.mrf.mxu0 }
 0x37b   :  { %v5977_v2 = vpack.c.bf16 %v5304_v56, %v5303_v58  ;;  %v4902_v59 = vadd.f32 %v4875_v37, %v4660_v6  ;;  %v5287_v33 = vadd.f32 %v10274_v26, %v5260_v19 }
 0x37c   :  { %v6916_v51 = vpop.f32.mrf.mxu0 }
 0x37d   :  { %6004 = vst [vmem:[%s10375_s6 + $0x38] sm:$0xff] %v5977_v2   ;;  %v5261_v57 = vadd.f32 %v10256_v0, %v4902_v59  ;;  %v5305_v43 = vmax.f32 %v5287_v33, 0.0 }
 0x37e   :  { %v4880_v20 = vpop.f32.mrf.mxu0 }
 0x37f   :  { %v5288_v61 = vadd.f32 %v10274_v26, %v5261_v57  ;;  %v4903_v35 = vadd.f32 %v4880_v20, %v4661_v60 }
 0x380   :  { %v6919_v52 = vpop.f32.mrf.mxu0 }
 0x381   :  { %v5306_v5 = vmax.f32 %v5288_v61, 0.0  ;;  %v5262_v23 = vadd.f32 %v10262_v44, %v4903_v35 }
 0x382   :  { %v4883_v13 = vpop.f32.mrf.mxu0 }
 0x383   :  { %v5982_v40 = vpack.c.bf16 %v5306_v5, %v5305_v43  ;;  %v5289_v45 = vadd.f32 %v10274_v26, %v5262_v23  ;;  %v4904_v0 = vadd.f32 %v4883_v13, %v4662_v16 }
 0x384   :  { %v6920_v53 = vpop.f32.mrf.mxu0 }
 0x385   :  { %6005 = vst [vmem:[%s10375_s6 + $0x40] sm:$0xff] %v5982_v40   ;;  %v5263_v24 = vadd.f32 %v10266_v9, %v4904_v0  ;;  %v5307_v7 = vmax.f32 %v5289_v45, 0.0 }
 0x387   :  { %v5290_v32 = vadd.f32 %v10274_v26, %v5263_v24 }
 0x389   :  { %v5308_v50 = vmax.f32 %v5290_v32, 0.0 }
 0x38b   :  { %v5987_v44 = vpack.c.bf16 %v5308_v50, %v5307_v7 }
 0x38d   :  { %6006 = vst [vmem:[%s10375_s6 + $0x48] sm:$0xff] %v5987_v44  }

</bundles_post_ra>
